<compile_context>
chip_gen: v6e
topology: v6e:2x2x1
jax: 0.10.0
libtpu: 0.0.40
codegen_flags: <defaults>
</compile_context>

<pallas_src>
import jax
import jax.numpy as jnp
from jax import lax
from jax.experimental import pallas as pl
from jax.experimental.pallas import tpu as pltpu

# Logical (PyTorch) dims.
IN_DIM = 784
H1 = 784
H2 = 196
H3 = 256
H4 = 196
OUT_DIM = 10


def _round_up(n, m):
    return ((n + m - 1) // m) * m


# Lane-aligned (padded) dims.
IN_PAD = _round_up(IN_DIM, 128)    # 896
H1_PAD = _round_up(H1, 128)        # 896
H2_PAD = _round_up(H2, 128)        # 256
H3_PAD = _round_up(H3, 128)        # 256
H4_PAD = _round_up(H4, 128)        # 256
OUT_PAD = _round_up(OUT_DIM, 128)  # 128


def mlp5_kernel(x_ref,
                w1_ref, b1_ref, w2_ref, b2_ref, w3_ref, b3_ref,
                w4_ref, b4_ref, w5_ref, b5_ref,
                logits_ref, probs_ref):
    # x_ref: (tb, IN_PAD) bf16 batch tile; all padded weights resident in VMEM.

    def layer(h_bf16, w_ref, b_ref, out_dtype=jnp.bfloat16):
        # bf16 MXU matmul, f32 accumulation, bias + ReLU in f32, single cast out.
        acc = jnp.dot(h_bf16, w_ref[...], preferred_element_type=jnp.float32)
        return jnp.maximum(acc + b_ref[...], 0.0).astype(out_dtype)

    h = layer(x_ref[...], w1_ref, b1_ref)                       # fc1 + relu
    h = layer(h, w2_ref, b2_ref)                                 # fc2 + relu
    h = layer(h, w3_ref, b3_ref)                                 # fc3 + relu
    h = layer(h, w4_ref, b4_ref)                                 # fc4 + relu
    # dropout: identity (inference semantics)
    # TODO(synk): add stochastic dropout via pltpu.prng_* if training mode is needed.
    z = layer(h, w5_ref, b5_ref, out_dtype=jnp.float32)          # fc5 + relu, (tb, OUT_PAD) f32

    logits_ref[...] = z.astype(logits_ref.dtype)                 # unmasked 128-lane store

    # Softmax over the 10 real columns. z >= 0 everywhere and padded lanes are
    # exactly 0, so the unmasked row max is already the max over the real lanes;
    # only the exponentials of padded lanes must be zeroed.
    col = lax.broadcasted_iota(jnp.int32, z.shape, 1)
    valid = col < OUT_DIM
    m = jnp.max(z, axis=1, keepdims=True)
    e = jnp.where(valid, jnp.exp(z - m), 0.0)
    denom = jnp.sum(e, axis=1, keepdims=True)
    probs_ref[...] = (e * pl.reciprocal(denom, approx=True)).astype(probs_ref.dtype)


def _pad2(a, rows, cols, dtype):
    a = jnp.asarray(a, dtype)
    if a.ndim == 1:
        a = a.reshape(1, -1)
    return jnp.pad(a, ((0, rows - a.shape[0]), (0, cols - a.shape[1])))


def prepare_params(params):
    """Pad + cast parameters ONCE (weights -> lane-aligned bf16, biases -> f32 (1,N)).

    Keep the returned tuple around and reuse it for every forward call; this hoists
    ~2.4 MiB of per-call re-pad / re-cast work out of the hot path.
    """
    w1, b1, w2, b2, w3, b3, w4, b4, w5, b5 = params
    return (
        _pad2(w1, IN_PAD, H1_PAD, jnp.bfloat16), _pad2(b1, 1, H1_PAD, jnp.float32),
        _pad2(w2, H1_PAD, H2_PAD, jnp.bfloat16), _pad2(b2, 1, H2_PAD, jnp.float32),
        _pad2(w3, H2_PAD, H3_PAD, jnp.bfloat16), _pad2(b3, 1, H3_PAD, jnp.float32),
        _pad2(w4, H3_PAD, H4_PAD, jnp.bfloat16), _pad2(b4, 1, H4_PAD, jnp.float32),
        _pad2(w5, H4_PAD, OUT_PAD, jnp.bfloat16), _pad2(b5, 1, OUT_PAD, jnp.float32),
    )


def mlp5_forward(x, prepared_params, *, tile_b=512):
    """x: any shape flattening to (-1, 784). prepared_params: from prepare_params().

    Returns (relu(fc5(.)), softmax probs), each (B, 10) float32.
    """
    (w1p, b1p, w2p, b2p, w3p, b3p, w4p, b4p, w5p, b5p) = prepared_params
    x2d = x.reshape(-1, IN_DIM)
    B = x2d.shape[0]

    # Batch tile: 16-row aligned (bf16 sublane packing). For large batches cap the
    # tile so the grid has >= 2 steps — the 1-D "parallel" axis is how work shards
    # across v7x's two TensorCores.
    tb = min(tile_b, _round_up(B, 16))
    if B >= 256:
        tb = min(tb, _round_up((B + 1) // 2, 16))
    tb = _round_up(max(tb, 16), 16)
    Bp = _round_up(B, tb)
    grid = (Bp // tb,)

    # Pad batch rows + input features; MXU operand in bf16.
    xp = jnp.pad(x2d.astype(jnp.bfloat16), ((0, Bp - B), (0, IN_PAD - IN_DIM)))

    # Weights / biases: full-array blocks, resident across the batch grid
    # (constant index_map -> no re-DMA per step).
    full = lambda shape: pl.BlockSpec(shape, lambda i: (0, 0))

    out_shapes = (
        jax.ShapeDtypeStruct((Bp, OUT_PAD), jnp.float32),
        jax.ShapeDtypeStruct((Bp, OUT_PAD), jnp.float32),
    )

    logits_pad, probs_pad = pl.pallas_call(
        mlp5_kernel,
        out_shape=out_shapes,
        grid_spec=pltpu.PrefetchScalarGridSpec(
            num_scalar_prefetch=0,
            grid=grid,
            in_specs=[
                pl.BlockSpec((tb, IN_PAD), lambda i: (i, 0)),   # x tile
                full((IN_PAD, H1_PAD)), full((1, H1_PAD)),      # fc1
                full((H1_PAD, H2_PAD)), full((1, H2_PAD)),      # fc2
                full((H2_PAD, H3_PAD)), full((1, H3_PAD)),      # fc3
                full((H3_PAD, H4_PAD)), full((1, H4_PAD)),      # fc4
                full((H4_PAD, OUT_PAD)), full((1, OUT_PAD)),    # fc5
            ],
            out_specs=[
                pl.BlockSpec((tb, OUT_PAD), lambda i: (i, 0)),  # relu(fc5) slab
                pl.BlockSpec((tb, OUT_PAD), lambda i: (i, 0)),  # softmax slab
            ],
        ),
        compiler_params=pltpu.CompilerParams(
            dimension_semantics=("parallel",),
            # Above v5e's 16 MiB scoped default (needed for tb >= 512), below
            # v7x's 64 MiB physical VMEM.
            vmem_limit_bytes=48 * 1024 * 1024,
        ),
    )(xp, w1p, b1p, w2p, b2p, w3p, b3p, w4p, b4p, w5p, b5p)

    return logits_pad[:B, :OUT_DIM], probs_pad[:B, :OUT_DIM]


def init_params(key):
    """PyTorch Linear-style init U(-1/sqrt(fan_in), +); weights stored as (in, out)."""
    def linear(k, fan_in, fan_out):
        kw, kb = jax.random.split(k)
        bound = 1.0 / jnp.sqrt(float(fan_in))
        w = jax.random.uniform(kw, (fan_in, fan_out), jnp.float32, -bound, bound)
        b = jax.random.uniform(kb, (1, fan_out), jnp.float32, -bound, bound)
        return w, b

    ks = jax.random.split(key, 5)
    w1, b1 = linear(ks[0], IN_DIM, H1)
    w2, b2 = linear(ks[1], H1, H2)
    w3, b3 = linear(ks[2], H2, H3)
    w4, b4 = linear(ks[3], H3, H4)
    w5, b5 = linear(ks[4], H4, OUT_DIM)
    return (w1, b1, w2, b2, w3, b3, w4, b4, w5, b5)


def ref_forward(x, params):
    """Pure-JAX reference with matching bf16-matmul / f32-epilogue numerics."""
    w1, b1, w2, b2, w3, b3, w4, b4, w5, b5 = params

    def layer(h, w, b):
        acc = jnp.dot(h.astype(jnp.bfloat16), w.astype(jnp.bfloat16),
                      preferred_element_type=jnp.float32)
        return jnp.maximum(acc + b, 0.0)

    h = x.reshape(-1, IN_DIM)
    h = layer(h, w1, b1)
    h = layer(h, w2, b2)
    h = layer(h, w3, b3)
    h = layer(h, w4, b4)
    z = layer(h, w5, b5)          # dropout = identity in eval
    return z, jax.nn.softmax(z, axis=1)


if __name__ == "__main__":
    key = jax.random.PRNGKey(0)
    k_params, k_x1, k_x2 = jax.random.split(key, 3)
    params = init_params(k_params)
    prepared = prepare_params(params)   # pad/cast weights once, reuse below

    # MNIST-like input, small shape: (B, 1, 28, 28) flattened to (B, 784).
    B = 8
    x = jax.random.normal(k_x1, (B, 1, 28, 28), jnp.float32)
    logits, probs = mlp5_forward(x, prepared)
    jax.block_until_ready((logits, probs))

    z_ref, p_ref = ref_forward(x, params)
    assert logits.shape == (B, OUT_DIM) and probs.shape == (B, OUT_DIM)
    assert jnp.allclose(logits, z_ref, atol=2e-3, rtol=2e-3)
    assert jnp.allclose(probs, p_ref, atol=5e-3, rtol=5e-3)
    assert jnp.allclose(jnp.sum(probs, axis=1), 1.0, atol=5e-3)

    # Second check: batch not a multiple of the tile + multi-step grid (padding path).
    B2 = 200
    x2 = jax.random.normal(k_x2, (B2, 1, 28, 28), jnp.float32)
    logits2, probs2 = mlp5_forward(x2, prepared, tile_b=64)
    jax.block_until_ready((logits2, probs2))
    z2_ref, p2_ref = ref_forward(x2, params)
    assert logits2.shape == (B2, OUT_DIM) and probs2.shape == (B2, OUT_DIM)
    assert jnp.allclose(logits2, z2_ref, atol=2e-3, rtol=2e-3)
    assert jnp.allclose(probs2, p2_ref, atol=5e-3, rtol=5e-3)

    print("KERNEL_OK")
</pallas_src>

<mosaic_0001>
module attributes {stable_mosaic.version = 11 : i64} {
  func.func @mlp5_kernel(%arg0: i32, %arg1: memref<16x896xbf16, #tpu.memory_space<vmem>>, %arg2: memref<896x896xbf16, #tpu.memory_space<vmem>>, %arg3: memref<1x896xf32, #tpu.memory_space<vmem>>, %arg4: memref<896x256xbf16, #tpu.memory_space<vmem>>, %arg5: memref<1x256xf32, #tpu.memory_space<vmem>>, %arg6: memref<256x256xbf16, #tpu.memory_space<vmem>>, %arg7: memref<1x256xf32, #tpu.memory_space<vmem>>, %arg8: memref<256x256xbf16, #tpu.memory_space<vmem>>, %arg9: memref<1x256xf32, #tpu.memory_space<vmem>>, %arg10: memref<256x128xbf16, #tpu.memory_space<vmem>>, %arg11: memref<1x128xf32, #tpu.memory_space<vmem>>, %arg12: memref<16x128xf32, #tpu.memory_space<vmem>>, %arg13: memref<16x128xf32, #tpu.memory_space<vmem>>) attributes {dimension_semantics = [#tpu.dimension_semantics<parallel>], iteration_bounds = array<i64: 1>, scalar_prefetch = 0 : i64, scratch_operands = 0 : i64, tpu.core_type = #tpu.core_type<tc>, window_params = [{transform_indices = @transform_0, window_bounds = array<i64: 16, 896>}, {pipeline_mode = #tpu.pipeline_mode<synchronous>, transform_indices = @transform_1, window_bounds = array<i64: 896, 896>}, {pipeline_mode = #tpu.pipeline_mode<synchronous>, transform_indices = @transform_2, window_bounds = array<i64: 1, 896>}, {pipeline_mode = #tpu.pipeline_mode<synchronous>, transform_indices = @transform_3, window_bounds = array<i64: 896, 256>}, {pipeline_mode = #tpu.pipeline_mode<synchronous>, transform_indices = @transform_4, window_bounds = array<i64: 1, 256>}, {pipeline_mode = #tpu.pipeline_mode<synchronous>, transform_indices = @transform_5, window_bounds = array<i64: 256, 256>}, {pipeline_mode = #tpu.pipeline_mode<synchronous>, transform_indices = @transform_6, window_bounds = array<i64: 1, 256>}, {pipeline_mode = #tpu.pipeline_mode<synchronous>, transform_indices = @transform_7, window_bounds = array<i64: 256, 256>}, {pipeline_mode = #tpu.pipeline_mode<synchronous>, transform_indices = @transform_8, window_bounds = array<i64: 1, 256>}, {pipeline_mode = #tpu.pipeline_mode<synchronous>, transform_indices = @transform_9, window_bounds = array<i64: 256, 128>}, {pipeline_mode = #tpu.pipeline_mode<synchronous>, transform_indices = @transform_10, window_bounds = array<i64: 1, 128>}, {transform_indices = @transform_11, window_bounds = array<i64: 16, 128>}, {transform_indices = @transform_12, window_bounds = array<i64: 16, 128>}]} {
    %c0 = arith.constant 0 : index
    %c0_0 = arith.constant 0 : index
    %0 = vector.load %arg1[%c0, %c0_0] : memref<16x896xbf16, #tpu.memory_space<vmem>>, vector<16x896xbf16>
    %c0_1 = arith.constant 0 : index
    %c0_2 = arith.constant 0 : index
    %1 = vector.load %arg2[%c0_1, %c0_2] : memref<896x896xbf16, #tpu.memory_space<vmem>>, vector<896x896xbf16>
    %cst = arith.constant dense<0.000000e+00> : vector<16x896xf32>
    %2 = tpu.matmul %0, %1, %cst {dimension_numbers = #tpu.dot_dimension_numbers<[1], [0], [0], [1], [0, 0, 1, 1], [], []>} : vector<16x896xbf16>, vector<896x896xbf16>, vector<16x896xf32> -> vector<16x896xf32>
    %c0_3 = arith.constant 0 : index
    %c0_4 = arith.constant 0 : index
    %3 = vector.load %arg3[%c0_3, %c0_4] : memref<1x896xf32, #tpu.memory_space<vmem>>, vector<1x896xf32>
    %4 = vector.broadcast %3 : vector<1x896xf32> to vector<16x896xf32>
    %5 = arith.addf %2, %4 : vector<16x896xf32>
    %cst_5 = arith.constant 0.000000e+00 : f32
    %6 = vector.broadcast %cst_5 : f32 to vector<16x896xf32>
    %7 = arith.maximumf %5, %6 : vector<16x896xf32>
    %8 = arith.truncf %7 : vector<16x896xf32> to vector<16x896xbf16>
    %c0_6 = arith.constant 0 : index
    %c0_7 = arith.constant 0 : index
    %9 = vector.load %arg4[%c0_6, %c0_7] : memref<896x256xbf16, #tpu.memory_space<vmem>>, vector<896x256xbf16>
    %cst_8 = arith.constant dense<0.000000e+00> : vector<16x256xf32>
    %10 = tpu.matmul %8, %9, %cst_8 {dimension_numbers = #tpu.dot_dimension_numbers<[1], [0], [0], [1], [0, 0, 1, 1], [], []>} : vector<16x896xbf16>, vector<896x256xbf16>, vector<16x256xf32> -> vector<16x256xf32>
    %c0_9 = arith.constant 0 : index
    %c0_10 = arith.constant 0 : index
    %11 = vector.load %arg5[%c0_9, %c0_10] : memref<1x256xf32, #tpu.memory_space<vmem>>, vector<1x256xf32>
    %12 = vector.broadcast %11 : vector<1x256xf32> to vector<16x256xf32>
    %13 = arith.addf %10, %12 : vector<16x256xf32>
    %cst_11 = arith.constant 0.000000e+00 : f32
    %14 = vector.broadcast %cst_11 : f32 to vector<16x256xf32>
    %15 = arith.maximumf %13, %14 : vector<16x256xf32>
    %16 = arith.truncf %15 : vector<16x256xf32> to vector<16x256xbf16>
    %c0_12 = arith.constant 0 : index
    %c0_13 = arith.constant 0 : index
    %17 = vector.load %arg6[%c0_12, %c0_13] : memref<256x256xbf16, #tpu.memory_space<vmem>>, vector<256x256xbf16>
    %cst_14 = arith.constant dense<0.000000e+00> : vector<16x256xf32>
    %18 = tpu.matmul %16, %17, %cst_14 {dimension_numbers = #tpu.dot_dimension_numbers<[1], [0], [0], [1], [0, 0, 1, 1], [], []>} : vector<16x256xbf16>, vector<256x256xbf16>, vector<16x256xf32> -> vector<16x256xf32>
    %c0_15 = arith.constant 0 : index
    %c0_16 = arith.constant 0 : index
    %19 = vector.load %arg7[%c0_15, %c0_16] : memref<1x256xf32, #tpu.memory_space<vmem>>, vector<1x256xf32>
    %20 = vector.broadcast %19 : vector<1x256xf32> to vector<16x256xf32>
    %21 = arith.addf %18, %20 : vector<16x256xf32>
    %cst_17 = arith.constant 0.000000e+00 : f32
    %22 = vector.broadcast %cst_17 : f32 to vector<16x256xf32>
    %23 = arith.maximumf %21, %22 : vector<16x256xf32>
    %24 = arith.truncf %23 : vector<16x256xf32> to vector<16x256xbf16>
    %c0_18 = arith.constant 0 : index
    %c0_19 = arith.constant 0 : index
    %25 = vector.load %arg8[%c0_18, %c0_19] : memref<256x256xbf16, #tpu.memory_space<vmem>>, vector<256x256xbf16>
    %cst_20 = arith.constant dense<0.000000e+00> : vector<16x256xf32>
    %26 = tpu.matmul %24, %25, %cst_20 {dimension_numbers = #tpu.dot_dimension_numbers<[1], [0], [0], [1], [0, 0, 1, 1], [], []>} : vector<16x256xbf16>, vector<256x256xbf16>, vector<16x256xf32> -> vector<16x256xf32>
    %c0_21 = arith.constant 0 : index
    %c0_22 = arith.constant 0 : index
    %27 = vector.load %arg9[%c0_21, %c0_22] : memref<1x256xf32, #tpu.memory_space<vmem>>, vector<1x256xf32>
    %28 = vector.broadcast %27 : vector<1x256xf32> to vector<16x256xf32>
    %29 = arith.addf %26, %28 : vector<16x256xf32>
    %cst_23 = arith.constant 0.000000e+00 : f32
    %30 = vector.broadcast %cst_23 : f32 to vector<16x256xf32>
    %31 = arith.maximumf %29, %30 : vector<16x256xf32>
    %32 = arith.truncf %31 : vector<16x256xf32> to vector<16x256xbf16>
    %c0_24 = arith.constant 0 : index
    %c0_25 = arith.constant 0 : index
    %33 = vector.load %arg10[%c0_24, %c0_25] : memref<256x128xbf16, #tpu.memory_space<vmem>>, vector<256x128xbf16>
    %cst_26 = arith.constant dense<0.000000e+00> : vector<16x128xf32>
    %34 = tpu.matmul %32, %33, %cst_26 {dimension_numbers = #tpu.dot_dimension_numbers<[1], [0], [0], [1], [0, 0, 1, 1], [], []>} : vector<16x256xbf16>, vector<256x128xbf16>, vector<16x128xf32> -> vector<16x128xf32>
    %c0_27 = arith.constant 0 : index
    %c0_28 = arith.constant 0 : index
    %35 = vector.load %arg11[%c0_27, %c0_28] : memref<1x128xf32, #tpu.memory_space<vmem>>, vector<1x128xf32>
    %36 = vector.broadcast %35 : vector<1x128xf32> to vector<16x128xf32>
    %37 = arith.addf %34, %36 : vector<16x128xf32>
    %cst_29 = arith.constant 0.000000e+00 : f32
    %38 = vector.broadcast %cst_29 : f32 to vector<16x128xf32>
    %39 = arith.maximumf %37, %38 : vector<16x128xf32>
    %c0_30 = arith.constant 0 : index
    %c0_31 = arith.constant 0 : index
    %40 = vector.load %arg12[%c0_30, %c0_31] : memref<16x128xf32, #tpu.memory_space<vmem>>, vector<16x128xf32>
    tpu.vector_store %arg12[%c0_30, %c0_31], %39 {strides = array<i32>} : memref<16x128xf32, #tpu.memory_space<vmem>>, vector<16x128xf32>,
    %41 = tpu.iota {dimensions = array<i32: 1>} : vector<16x128xi32>
    %c10_i32 = arith.constant 10 : i32
    %42 = vector.broadcast %c10_i32 : i32 to vector<16x128xi32>
    %43 = arith.cmpi slt, %41, %42 : vector<16x128xi32>
    %cst_32 = arith.constant dense<0xFF800000> : vector<16xf32>
    %44 = vector.multi_reduction <maximumf>, %39, %cst_32 [1] : vector<16x128xf32> to vector<16xf32>
    %45 = vector.shape_cast %44 : vector<16xf32> to vector<16x1xf32>
    %46 = vector.broadcast %45 : vector<16x1xf32> to vector<16x128xf32>
    %47 = arith.subf %39, %46 : vector<16x128xf32>
    %48 = math.exp %47 : vector<16x128xf32>
    %cst_33 = arith.constant 0.000000e+00 : f32
    %49 = vector.broadcast %cst_33 : f32 to vector<16x128xf32>
    %50 = arith.select %43, %48, %49 : vector<16x128xi1>, vector<16x128xf32>
    %cst_34 = arith.constant dense<0.000000e+00> : vector<16xf32>
    %51 = vector.multi_reduction <add>, %50, %cst_34 [1] : vector<16x128xf32> to vector<16xf32>
    %52 = vector.shape_cast %51 : vector<16xf32> to vector<16x1xf32>
    %53 = tpu.reciprocal %52 {approx = true} : vector<16x1xf32> -> vector<16x1xf32>
    %54 = vector.broadcast %53 : vector<16x1xf32> to vector<16x128xf32>
    %55 = arith.mulf %50, %54 : vector<16x128xf32>
    %c0_35 = arith.constant 0 : index
    %c0_36 = arith.constant 0 : index
    %56 = vector.load %arg13[%c0_35, %c0_36] : memref<16x128xf32, #tpu.memory_space<vmem>>, vector<16x128xf32>
    tpu.vector_store %arg13[%c0_35, %c0_36], %55 {strides = array<i32>} : memref<16x128xf32, #tpu.memory_space<vmem>>, vector<16x128xf32>,
    return
  }
  func.func @transform_0(%arg0: i32) -> (i32, i32) {
    %c0_i32 = arith.constant 0 : i32
    %c0_i32_0 = arith.constant 0 : i32
    return %arg0, %c0_i32 : i32, i32
  }
  func.func @transform_1(%arg0: i32) -> (i32, i32) {
    %c0_i32 = arith.constant 0 : i32
    %c0_i32_0 = arith.constant 0 : i32
    %c0_i32_1 = arith.constant 0 : i32
    return %c0_i32, %c0_i32_0 : i32, i32
  }
  func.func @transform_2(%arg0: i32) -> (i32, i32) {
    %c0_i32 = arith.constant 0 : i32
    %c0_i32_0 = arith.constant 0 : i32
    %c0_i32_1 = arith.constant 0 : i32
    return %c0_i32, %c0_i32_0 : i32, i32
  }
  func.func @transform_3(%arg0: i32) -> (i32, i32) {
    %c0_i32 = arith.constant 0 : i32
    %c0_i32_0 = arith.constant 0 : i32
    %c0_i32_1 = arith.constant 0 : i32
    return %c0_i32, %c0_i32_0 : i32, i32
  }
  func.func @transform_4(%arg0: i32) -> (i32, i32) {
    %c0_i32 = arith.constant 0 : i32
    %c0_i32_0 = arith.constant 0 : i32
    %c0_i32_1 = arith.constant 0 : i32
    return %c0_i32, %c0_i32_0 : i32, i32
  }
  func.func @transform_5(%arg0: i32) -> (i32, i32) {
    %c0_i32 = arith.constant 0 : i32
    %c0_i32_0 = arith.constant 0 : i32
    %c0_i32_1 = arith.constant 0 : i32
    return %c0_i32, %c0_i32_0 : i32, i32
  }
  func.func @transform_6(%arg0: i32) -> (i32, i32) {
    %c0_i32 = arith.constant 0 : i32
    %c0_i32_0 = arith.constant 0 : i32
    %c0_i32_1 = arith.constant 0 : i32
    return %c0_i32, %c0_i32_0 : i32, i32
  }
  func.func @transform_7(%arg0: i32) -> (i32, i32) {
    %c0_i32 = arith.constant 0 : i32
    %c0_i32_0 = arith.constant 0 : i32
    %c0_i32_1 = arith.constant 0 : i32
    return %c0_i32, %c0_i32_0 : i32, i32
  }
  func.func @transform_8(%arg0: i32) -> (i32, i32) {
    %c0_i32 = arith.constant 0 : i32
    %c0_i32_0 = arith.constant 0 : i32
    %c0_i32_1 = arith.constant 0 : i32
    return %c0_i32, %c0_i32_0 : i32, i32
  }
  func.func @transform_9(%arg0: i32) -> (i32, i32) {
    %c0_i32 = arith.constant 0 : i32
    %c0_i32_0 = arith.constant 0 : i32
    %c0_i32_1 = arith.constant 0 : i32
    return %c0_i32, %c0_i32_0 : i32, i32
  }
  func.func @transform_10(%arg0: i32) -> (i32, i32) {
    %c0_i32 = arith.constant 0 : i32
    %c0_i32_0 = arith.constant 0 : i32
    %c0_i32_1 = arith.constant 0 : i32
    return %c0_i32, %c0_i32_0 : i32, i32
  }
  func.func @transform_11(%arg0: i32) -> (i32, i32) {
    %c0_i32 = arith.constant 0 : i32
    %c0_i32_0 = arith.constant 0 : i32
    return %arg0, %c0_i32 : i32, i32
  }
  func.func @transform_12(%arg0: i32) -> (i32, i32) {
    %c0_i32 = arith.constant 0 : i32
    %c0_i32_0 = arith.constant 0 : i32
    return %arg0, %c0_i32 : i32, i32
  }
}

</mosaic_0001>

<bundles_post_ra>
// kernel: tpu_custom_call.1
= control target key start
LH: loop header
LB: loop body
LE: loop exit
PB: predicated region body
PF: predicated region fallthrough
CT: control target
= control target key end

     0   :  { %18 = vsyncpa [#allocation3], 0  ;;  %s7201_s0 = inlined_call_operand.hbm [shape: bf16[16,896], index: 0, kind: input, shape index: {}]   ;;  %s7202_s1 = inlined_call_operand.hbm [shape: bf16[896,896], index: 1, kind: input, shape index: {}]   ;;  %s7203_s2 = inlined_call_operand.hbm [shape: f32[1,896], index: 2, kind: input, shape index: {}]   ;;  %s7204_s3 = inlined_call_operand.hbm [shape: bf16[896,256], index: 3, kind: input, shape index: {}]   ;;  %s7205_s4 = inlined_call_operand.hbm [shape: f32[1,256], index: 4, kind: input, shape index: {}]   ;;  %s7206_s5 = inlined_call_operand.hbm [shape: bf16[256,256], index: 5, kind: input, shape index: {}]   ;;  %s7207_s6 = inlined_call_operand.hbm [shape: f32[1,256], index: 6, kind: input, shape index: {}]   ;;  %s7208_s7 = inlined_call_operand.hbm [shape: bf16[256,256], index: 7, kind: input, shape index: {}]   ;;  %s7209_s8 = inlined_call_operand.hbm [shape: f32[1,256], index: 8, kind: input, shape index: {}]   ;;  %s7210_s9 = inlined_call_operand.hbm [shape: bf16[256,128], index: 9, kind: input, shape index: {}]   ;;  %s7211_s10 = inlined_call_operand.hbm [shape: f32[1,128], index: 10, kind: input, shape index: {}]   ;;  %s7212_s11 = inlined_call_operand.hbm [shape: f32[16,128], index: 11, kind: output, shape index: {0}]   ;;  %s7213_s12 = inlined_call_operand.hbm [shape: f32[16,128], index: 12, kind: output, shape index: {1}]  }
   0x1   :  { %19 = vsyncpa [#allocation6], 0 }
   0x2   :  { %20 = vsyncpa [#allocation9], 0 }
   0x3   :  { %21 = vsyncpa [#allocation12], 0 }
   0x4   :  { %22 = vsyncpa [#allocation15], 0 }
   0x5   :  { %23 = vsyncpa [#allocation18], 0 }
   0x6   :  { %24 = vsyncpa [#allocation4], 0 }
   0x7   :  { %25 = vsyncpa [#allocation22], 0  ;;  %s6913_s21 = smov [#allocation5]   ;;  %s6914_s23 = smov [#allocation8]  }
   0x8   :  { %s43_s22 = sshll.u32 %s6913_s21, 4  ;;  %s65_s24 = sshll.u32 %s6914_s23, 4  ;;  %s44_s22 = int_to_ptr.vmem [resolvable:$true] %s43_s22  ;;  %s66_s24 = int_to_ptr.vmem [resolvable:$true] %s65_s24 }
   0x9   :  { %s6645_s25 = scalar_lea.vmem %s44_s22, 50176  ;;  %p6650_p1 = scmp.lt.s32.totalorder %s44_s22, %s44_s22 }
   0xa   :  { %p6646_p0 = scmp.ne.s32.totalorder %s44_s22, %s6645_s25  ;;  %p6651_p2 = scmp.lt.s32.totalorder %s6645_s25, %s6645_s25 }
   0xc   :  { %p6652_p3 = por %p6651_p2, %p6650_p1 }
   0xe   :  { %p6653_p4 = pnand %p6652_p3, %p6646_p0 }
  0x10   :  { %6656 = shalt.err (!%p6653_p4)
}
  0x11   :  { %s6915_s26 = smov 448   ;;  %s6916_s27 = smov 28  }
  0x12   :  { %49 = dma.hbm_to_vmem [thread:$0]  %s7202_s1, 50176, %s44_s22, [#allocation6], %s6915_s26, %s6915_s26, %s6916_s27  }
  0x13   :  { %s6665_s30 = scalar_lea.vmem %s66_s24, 14336  ;;  %p6670_p6 = scmp.lt.s32.totalorder %s66_s24, %s66_s24 }
  0x14   :  { %p6666_p5 = scmp.ne.s32.totalorder %s66_s24, %s6665_s30  ;;  %p6671_p7 = scmp.lt.s32.totalorder %s6665_s30, %s6665_s30 }
  0x16   :  { %p6672_p8 = por %p6671_p7, %p6670_p6 }
  0x18   :  { %p6673_p9 = pnand %p6672_p8, %p6666_p5 }
  0x1a   :  { %6676 = shalt.err (!%p6673_p9)
}
  0x1b   :  { %s6917_s13 = smov 128   ;;  %s6918_s14 = smov 8  }
  0x1c   :  { %71 = dma.hbm_to_vmem [thread:$0]  %s7204_s3, 14336, %s66_s24, [#allocation9], %s6917_s13, %s6917_s13, %s6918_s14  }
  0x1d   :  { %s6919_s17 = smov [#allocation11]   ;;  %s6920_s19 = smov [#allocation14]  }
  0x1e   :  { %s87_s18 = sshll.u32 %s6919_s17, 4  ;;  %s109_s1 = sshll.u32 %s6920_s19, 4  ;;  %s88_s18 = int_to_ptr.vmem [resolvable:$true] %s87_s18  ;;  %s110_s1 = int_to_ptr.vmem [resolvable:$true] %s109_s1 }
  0x1f   :  { %s6685_s20 = scalar_lea.vmem %s88_s18, 4096  ;;  %p6690_p11 = scmp.lt.s32.totalorder %s88_s18, %s88_s18 }
  0x20   :  { %p6686_p10 = scmp.ne.s32.totalorder %s88_s18, %s6685_s20  ;;  %p6691_p12 = scmp.lt.s32.totalorder %s6685_s20, %s6685_s20 }
  0x22   :  { %p6692_p13 = por %p6691_p12, %p6690_p11 }
  0x24   :  { %p6693_p0 = pnand %p6692_p13, %p6686_p10 }
  0x26   :  { %6696 = shalt.err (!%p6693_p0)
}
  0x27   :  { %93 = dma.hbm_to_vmem [thread:$0]  %s7206_s5, 4096, %s88_s18, [#allocation12], %s6917_s13, %s6917_s13, %s6918_s14  }
  0x28   :  { %s6705_s3 = scalar_lea.vmem %s110_s1, 4096  ;;  %p6710_p2 = scmp.lt.s32.totalorder %s110_s1, %s110_s1 }
  0x29   :  { %p6706_p1 = scmp.ne.s32.totalorder %s110_s1, %s6705_s3  ;;  %p6711_p3 = scmp.lt.s32.totalorder %s6705_s3, %s6705_s3 }
  0x2b   :  { %p6712_p4 = por %p6711_p3, %p6710_p2 }
  0x2d   :  { %p6713_p5 = pnand %p6712_p4, %p6706_p1 }
  0x2f   :  { %6716 = shalt.err (!%p6713_p5)
}
  0x30   :  { %115 = dma.hbm_to_vmem [thread:$0]  %s7208_s7, 4096, %s110_s1, [#allocation15], %s6917_s13, %s6917_s13, %s6918_s14  }
  0x31   :  { %s6921_s25 = smov [#allocation17]  }
  0x32   :  { %s131_s28 = sshll.u32 %s6921_s25, 4  ;;  %s132_s28 = int_to_ptr.vmem [resolvable:$true] %s131_s28 }
  0x33   :  { %s6725_s29 = scalar_lea.vmem %s132_s28, 2048  ;;  %p6730_p7 = scmp.lt.s32.totalorder %s132_s28, %s132_s28 }
  0x34   :  { %p6726_p6 = scmp.ne.s32.totalorder %s132_s28, %s6725_s29  ;;  %p6731_p8 = scmp.lt.s32.totalorder %s6725_s29, %s6725_s29 }
  0x36   :  { %p6732_p9 = por %p6731_p8, %p6730_p7 }
  0x38   :  { %p6733_p10 = pnand %p6732_p9, %p6726_p6 }
  0x3a   :  { %6736 = shalt.err (!%p6733_p10)
}
  0x3b   :  { %s6922_s5 = smov 64   ;;  %s6923_s30 = smov 4  }
  0x3c   :  { %137 = dma.hbm_to_vmem [thread:$0]  %s7210_s9, 2048, %s132_s28, [#allocation18], %s6922_s5, %s6922_s5, %s6923_s30  }
  0x3d   :  { %s6924_s17 = smov [#allocation2]   ;;  %s6925_s7 = smov [#allocation7]  }
  0x3e   :  { %s31_s18 = sshll.u32 %s6924_s17, 4  ;;  %s56_s19 = sshll.u32 %s6925_s7, 4  ;;  %s32_s18 = int_to_ptr.vmem [resolvable:$true] %s31_s18  ;;  %s57_s19 = int_to_ptr.vmem [resolvable:$true] %s56_s19 }
  0x3f   :  { %s6745_s1 = scalar_lea.vmem %s32_s18, 896  ;;  %p6750_p12 = scmp.lt.s32.totalorder %s32_s18, %s32_s18 }
  0x40   :  { %p6746_p11 = scmp.ne.s32.totalorder %s32_s18, %s6745_s1  ;;  %p6751_p13 = scmp.lt.s32.totalorder %s6745_s1, %s6745_s1 }
  0x42   :  { %p6752_p0 = por %p6751_p13, %p6750_p12 }
  0x44   :  { %p6753_p1 = pnand %p6752_p0, %p6746_p11 }
  0x46   :  { %6756 = shalt.err (!%p6753_p1)
}
  0x47   :  { %37 = dma.hbm_to_vmem [thread:$0]  %s7201_s0, 896, %s32_s18, [#allocation3], %s6915_s26, %s6915_s26, %s6916_s27  }
  0x48   :  { %s6765_s9 = scalar_lea.vmem %s57_s19, 112  ;;  %s6769_s22 = scalar_lea.vmem %s57_s19, 128 }
  0x49   :  { %p6766_p2 = scmp.ne.s32.totalorder %s57_s19, %s6765_s9  ;;  %p6770_p3 = scmp.lt.s32.totalorder %s57_s19, %s57_s19 }
  0x4a   :  { %p6771_p4 = scmp.lt.s32.totalorder %s6769_s22, %s6765_s9 }
  0x4c   :  { %p6772_p5 = por %p6771_p4, %p6770_p3 }
  0x4e   :  { %p6773_p6 = pnand %p6772_p5, %p6766_p2 }
  0x50   :  { %6776 = shalt.err (!%p6773_p6)
}
  0x51   :  { %59 = dma.hbm_to_vmem [thread:$0]  %s7203_s2, 112, %s57_s19, [#allocation6]  }
  0x52   :  { %s6926_s24 = smov [#allocation10]   ;;  %s6927_s28 = smov [#allocation13]  }
  0x53   :  { %s78_s25 = sshll.u32 %s6926_s24, 4  ;;  %s100_s29 = sshll.u32 %s6927_s28, 4  ;;  %s79_s25 = int_to_ptr.vmem [resolvable:$true] %s78_s25  ;;  %s101_s29 = int_to_ptr.vmem [resolvable:$true] %s100_s29 }
  0x54   :  { %s6785_s5 = scalar_lea.vmem %s79_s25, 32  ;;  %p6790_p8 = scmp.lt.s32.totalorder %s79_s25, %s79_s25 }
  0x55   :  { %p6786_p7 = scmp.ne.s32.totalorder %s79_s25, %s6785_s5  ;;  %p6791_p9 = scmp.lt.s32.totalorder %s6785_s5, %s6785_s5 }
  0x57   :  { %p6792_p10 = por %p6791_p9, %p6790_p8 }
  0x59   :  { %p6793_p11 = pnand %p6792_p10, %p6786_p7 }
  0x5b   :  { %6796 = shalt.err (!%p6793_p11)
}
  0x5c   :  { %81 = dma.hbm_to_vmem [thread:$0]  %s7205_s4, 32, %s79_s25, [#allocation9]  }
  0x5d   :  { %s6805_s27 = scalar_lea.vmem %s101_s29, 32  ;;  %p6810_p13 = scmp.lt.s32.totalorder %s101_s29, %s101_s29 }
  0x5e   :  { %p6806_p12 = scmp.ne.s32.totalorder %s101_s29, %s6805_s27  ;;  %p6811_p0 = scmp.lt.s32.totalorder %s6805_s27, %s6805_s27 }
  0x60   :  { %p6812_p1 = por %p6811_p0, %p6810_p13 }
  0x62   :  { %p6813_p2 = pnand %p6812_p1, %p6806_p12 }
  0x64   :  { %6816 = shalt.err (!%p6813_p2)
}
  0x65   :  { %103 = dma.hbm_to_vmem [thread:$0]  %s7207_s6, 32, %s101_s29, [#allocation12]  }
  0x66   :  { %s6928_s15 = smov [#allocation16]   ;;  %s6929_s17 = smov [#allocation19]  }
  0x67   :  { %s122_s16 = sshll.u32 %s6928_s15, 4  ;;  %s144_s18 = sshll.u32 %s6929_s17, 4  ;;  %s123_s16 = int_to_ptr.vmem [resolvable:$true] %s122_s16  ;;  %s145_s18 = int_to_ptr.vmem [resolvable:$true] %s144_s18 }
  0x68   :  { %s6825_s7 = scalar_lea.vmem %s123_s16, 32  ;;  %p6830_p4 = scmp.lt.s32.totalorder %s123_s16, %s123_s16 }
  0x69   :  { %p6826_p3 = scmp.ne.s32.totalorder %s123_s16, %s6825_s7  ;;  %p6831_p5 = scmp.lt.s32.totalorder %s6825_s7, %s6825_s7 }
  0x6b   :  { %p6832_p6 = por %p6831_p5, %p6830_p4 }
  0x6d   :  { %p6833_p7 = pnand %p6832_p6, %p6826_p3 }
  0x6f   :  { %6836 = shalt.err (!%p6833_p7)
}
  0x70   :  { %125 = dma.hbm_to_vmem [thread:$0]  %s7209_s8, 32, %s123_s16, [#allocation15]  }
  0x71   :  { %s6845_s1 = scalar_lea.vmem %s145_s18, 16  ;;  %s6849_s6 = scalar_lea.vmem %s145_s18, 32 }
  0x72   :  { %p6846_p8 = scmp.ne.s32.totalorder %s145_s18, %s6845_s1  ;;  %p6850_p9 = scmp.lt.s32.totalorder %s145_s18, %s145_s18 }
  0x73   :  { %p6851_p10 = scmp.lt.s32.totalorder %s6849_s6, %s6845_s1 }
  0x75   :  { %p6852_p11 = por %p6851_p10, %p6850_p9 }
  0x77   :  { %p6853_p12 = pnand %p6852_p11, %p6846_p8 }
  0x79   :  { %6856 = shalt.err (!%p6853_p12)
}
  0x7a   :  { %147 = dma.hbm_to_vmem [thread:$0]  %s7211_s10, 16, %s145_s18, [#allocation18]  }
  0x7b   :  { %6897 = dma.done.wait [#allocation3], 896  }
  0x7c   :  { %6898 = vsyncadd [#allocation3], 4294966400 }
  0x7d   :  { %6899 = dma.done.wait [#allocation6], 50288  }
  0x7e   :  { %6900 = vsyncadd [#allocation6], 4294917008 }
  0x7f   :  { %6901 = dma.done.wait [#allocation9], 14368  }
  0x80   :  { %6902 = vsyncadd [#allocation9], 4294952928 }
  0x81   :  { %6903 = dma.done.wait [#allocation12], 4128  }
  0x82   :  { %6904 = vsyncadd [#allocation12], 4294963168 }
  0x83   :  { %6905 = dma.done.wait [#allocation15], 4128  }
  0x84   :  { %6906 = vsyncadd [#allocation15], 4294963168 }
  0x85   :  { %6907 = dma.done.wait [#allocation18], 2064  }
  0x86   :  { %6908 = vsyncadd [#allocation18], 4294965232  ;;  %v5770_v0 = vld [vmem:[#allocation5 + $0x18c] ss:$28 sps:$4 sm:$0xff]   ;;  %v5776_v4 = vld [vmem:[#allocation5 + $0x154] ss:$28 sps:$4 sm:$0xff]  }
  0x87   :  { %v5772_v1 = vld [vmem:[#allocation5 + $0x50c] ss:$28 sps:$4 sm:$0xff]   ;;  %2727 = vmatprep.subr.bf16.mxu0 %v5770_v0  ;;  %v5778_v5 = vld [vmem:[#allocation5 + $0x4d4] ss:$28 sps:$4 sm:$0xff]   ;;  %v5782_v8 = vld [vmem:[#allocation5 + $0x11c] ss:$28 sps:$4 sm:$0xff]  }
  0x88   :  { %v5774_v2 = vld [vmem:[#allocation5 + $0x188] ss:$28 sps:$4 sm:$0xff]   ;;  %2770 = vmatprep.subr.bf16.mxu1 %v5772_v1  ;;  %v5780_v6 = vld [vmem:[#allocation5 + $0x150] ss:$28 sps:$4 sm:$0xff]   ;;  %v5784_v9 = vld [vmem:[#allocation5 + $0x49c] ss:$28 sps:$4 sm:$0xff]  }
  0x89   :  { %v5775_v3 = vld [vmem:[#allocation5 + $0x508] ss:$28 sps:$4 sm:$0xff]   ;;  %2728 = vmatpush1.bf16.msra.mxu0 %v5774_v2  ;;  %v5781_v7 = vld [vmem:[#allocation5 + $0x4d0] ss:$28 sps:$4 sm:$0xff]   ;;  %v5786_v10 = vld [vmem:[#allocation5 + $0x118] ss:$28 sps:$4 sm:$0xff]  }
  0x8a   :  { %2771 = vmatpush1.bf16.msra.mxu1 %v5775_v3  ;;  %2729 = vmatprep.subr.bf16.mxu0 %v5776_v4  ;;  %v5787_v11 = vld [vmem:[#allocation5 + $0x498] ss:$28 sps:$4 sm:$0xff]   ;;  %v5788_v12 = vld [vmem:[#allocation5 + $0xe4] ss:$28 sps:$4 sm:$0xff]   ;;  %v5794_v16 = vld [vmem:[#allocation5 + $0xac] ss:$28 sps:$4 sm:$0xff]  }
  0x8b   :  { %2772 = vmatprep.subr.bf16.mxu1 %v5778_v5  ;;  %v5790_v13 = vld [vmem:[#allocation5 + $0x464] ss:$28 sps:$4 sm:$0xff]   ;;  %v5796_v17 = vld [vmem:[#allocation5 + $0x42c] ss:$28 sps:$4 sm:$0xff]   ;;  %v5800_v20 = vld [vmem:[#allocation5 + $0x74] ss:$28 sps:$4 sm:$0xff]  }
  0x8c   :  { %v5792_v14 = vld [vmem:[#allocation5 + $0xe0] ss:$28 sps:$4 sm:$0xff]   ;;  %v5798_v18 = vld [vmem:[#allocation5 + $0xa8] ss:$28 sps:$4 sm:$0xff]   ;;  %v5802_v21 = vld [vmem:[#allocation5 + $0x3f4] ss:$28 sps:$4 sm:$0xff]  }
  0x8d   :  { %2730 = vmatpush1.bf16.msra.mxu0 %v5780_v6  ;;  %v5793_v15 = vld [vmem:[#allocation5 + $0x460] ss:$28 sps:$4 sm:$0xff]   ;;  %v5799_v19 = vld [vmem:[#allocation5 + $0x428] ss:$28 sps:$4 sm:$0xff]   ;;  %v5804_v22 = vld [vmem:[#allocation5 + $0x70] ss:$28 sps:$4 sm:$0xff]  }
  0x8e   :  { %2773 = vmatpush1.bf16.msra.mxu1 %v5781_v7  ;;  %2731 = vmatprep.subr.bf16.mxu0 %v5782_v8  ;;  %v5805_v23 = vld [vmem:[#allocation5 + $0x3f0] ss:$28 sps:$4 sm:$0xff]   ;;  %v5806_v24 = vld [vmem:[#allocation5 + $0x3c] ss:$28 sps:$4 sm:$0xff]   ;;  %v5812_v28 = vld [vmem:[#allocation5 + $0x4] ss:$28 sps:$4 sm:$0xff]  }
  0x8f   :  { %2774 = vmatprep.subr.bf16.mxu1 %v5784_v9  ;;  %v5808_v25 = vld [vmem:[#allocation5 + $0x3bc] ss:$28 sps:$4 sm:$0xff]   ;;  %v5814_v29 = vld [vmem:[#allocation5 + $0x384] ss:$28 sps:$4 sm:$0xff]   ;;  %v5818_v32 = vld [vmem:[#allocation5 + $0x34c] ss:$28 sps:$4 sm:$0xff]  }
  0x90   :  { %v5810_v26 = vld [vmem:[#allocation5 + $0x38] ss:$28 sps:$4 sm:$0xff]   ;;  %v5816_v30 = vld [vmem:[#allocation5] ss:$28 sps:$4 sm:$0xff]   ;;  %v5820_v33 = vld [vmem:[#allocation5 + $0x6cc] ss:$28 sps:$4 sm:$0xff]  }
  0x91   :  { %2732 = vmatpush1.bf16.msra.mxu0 %v5786_v10  ;;  %v5811_v27 = vld [vmem:[#allocation5 + $0x3b8] ss:$28 sps:$4 sm:$0xff]   ;;  %v5817_v31 = vld [vmem:[#allocation5 + $0x380] ss:$28 sps:$4 sm:$0xff]   ;;  %v5822_v34 = vld [vmem:[#allocation5 + $0x348] ss:$28 sps:$4 sm:$0xff]  }
  0x92   :  { %2775 = vmatpush1.bf16.msra.mxu1 %v5787_v11  ;;  %2733 = vmatprep.subr.bf16.mxu0 %v5788_v12  ;;  %v5823_v35 = vld [vmem:[#allocation5 + $0x6c8] ss:$28 sps:$4 sm:$0xff]   ;;  %v5824_v36 = vld [vmem:[#allocation5 + $0x314] ss:$28 sps:$4 sm:$0xff]   ;;  %v5830_v40 = vld [vmem:[#allocation5 + $0x2dc] ss:$28 sps:$4 sm:$0xff]  }
  0x93   :  { %2776 = vmatprep.subr.bf16.mxu1 %v5790_v13  ;;  %v5826_v37 = vld [vmem:[#allocation5 + $0x694] ss:$28 sps:$4 sm:$0xff]   ;;  %v5832_v41 = vld [vmem:[#allocation5 + $0x65c] ss:$28 sps:$4 sm:$0xff]   ;;  %v5836_v44 = vld [vmem:[#allocation5 + $0x2a4] ss:$28 sps:$4 sm:$0xff]  }
  0x94   :  { %v5828_v38 = vld [vmem:[#allocation5 + $0x310] ss:$28 sps:$4 sm:$0xff]   ;;  %v5834_v42 = vld [vmem:[#allocation5 + $0x2d8] ss:$28 sps:$4 sm:$0xff]   ;;  %v5838_v45 = vld [vmem:[#allocation5 + $0x624] ss:$28 sps:$4 sm:$0xff]  }
  0x95   :  { %2734 = vmatpush1.bf16.msra.mxu0 %v5792_v14  ;;  %v5829_v39 = vld [vmem:[#allocation5 + $0x690] ss:$28 sps:$4 sm:$0xff]   ;;  %v5835_v43 = vld [vmem:[#allocation5 + $0x658] ss:$28 sps:$4 sm:$0xff]   ;;  %v5840_v46 = vld [vmem:[#allocation5 + $0x2a0] ss:$28 sps:$4 sm:$0xff]  }
  0x96   :  { %2777 = vmatpush1.bf16.msra.mxu1 %v5793_v15  ;;  %2735 = vmatprep.subr.bf16.mxu0 %v5794_v16  ;;  %v5841_v47 = vld [vmem:[#allocation5 + $0x620] ss:$28 sps:$4 sm:$0xff]   ;;  %v5842_v48 = vld [vmem:[#allocation5 + $0x26c] ss:$28 sps:$4 sm:$0xff]   ;;  %v7050_v50 = vld [vmem:[#allocation2 + $0xc] ss:$28 sps:$4 sm:$0xff]  }
  0x97   :  { %2778 = vmatprep.subr.bf16.mxu1 %v5796_v17  ;;  %v7048_v49 = vld [vmem:[#allocation2 + $0x4] ss:$28 sps:$4 sm:$0xff]   ;;  %2802 = vmatprep.mubr.bf16.mxu1 %v7050_v50  ;;  %v5848_v54 = vld [vmem:[#allocation5 + $0x234] ss:$28 sps:$4 sm:$0xff]   ;;  %v5854_v58 = vld [vmem:[#allocation5 + $0x1fc] ss:$28 sps:$4 sm:$0xff]  }
  0x98   :  { %v5844_v51 = vld [vmem:[#allocation5 + $0x5ec] ss:$28 sps:$4 sm:$0xff]   ;;  %2759 = vmatprep.mubr.bf16.mxu0 %v7048_v49  ;;  %v5850_v55 = vld [vmem:[#allocation5 + $0x5b4] ss:$28 sps:$4 sm:$0xff]   ;;  %v5856_v59 = vld [vmem:[#allocation5 + $0x57c] ss:$28 sps:$4 sm:$0xff]  }
  0x99   :  { %2736 = vmatpush1.bf16.msra.mxu0 %v5798_v18  ;;  %v5846_v52 = vld [vmem:[#allocation5 + $0x268] ss:$28 sps:$4 sm:$0xff]   ;;  %v5852_v56 = vld [vmem:[#allocation5 + $0x230] ss:$28 sps:$4 sm:$0xff]   ;;  %v5858_v60 = vld [vmem:[#allocation5 + $0x1f8] ss:$28 sps:$4 sm:$0xff]  }
  0x9a   :  { %2779 = vmatpush1.bf16.msra.mxu1 %v5799_v19  ;;  %2737 = vmatprep.subr.bf16.mxu0 %v5800_v20  ;;  %v5847_v53 = vld [vmem:[#allocation5 + $0x5e8] ss:$28 sps:$4 sm:$0xff]   ;;  %v5853_v57 = vld [vmem:[#allocation5 + $0x5b0] ss:$28 sps:$4 sm:$0xff]   ;;  %v5859_v61 = vld [vmem:[#allocation5 + $0x578] ss:$28 sps:$4 sm:$0xff]  }
  0x9b   :  { %2780 = vmatprep.subr.bf16.mxu1 %v5802_v21  ;;  %v5860_v62 = vld [vmem:[#allocation5 + $0x1c4] ss:$28 sps:$4 sm:$0xff]   ;;  %v5873_v2 = vld [vmem:[#allocation5 + $0x88c] ss:$28 sps:$4 sm:$0xff]   ;;  %v5880_v8 = vld [vmem:[#allocation5 + $0x854] ss:$28 sps:$4 sm:$0xff]  }
  0x9c   :  { %v5862_v63 = vld [vmem:[#allocation5 + $0x544] ss:$28 sps:$4 sm:$0xff]   ;;  %v5876_v3 = vld [vmem:[#allocation5 + $0xc0c] ss:$28 sps:$4 sm:$0xff]   ;;  %v5883_v9 = vld [vmem:[#allocation5 + $0xbd4] ss:$28 sps:$4 sm:$0xff]  }
  0x9d   :  { %2738 = vmatpush1.bf16.msra.mxu0 %v5804_v22  ;;  %v5864_v0 = vld [vmem:[#allocation5 + $0x1c0] ss:$28 sps:$4 sm:$0xff]   ;;  %v7054_v4 = vld [vmem:[#allocation2] ss:$28 sps:$4 sm:$0xff]   ;;  %v7056_v7 = vld [vmem:[#allocation2 + $0x8] ss:$28 sps:$4 sm:$0xff]  }
  0x9e   :  { %2781 = vmatpush1.bf16.msra.mxu1 %v5805_v23  ;;  %2739 = vmatprep.subr.bf16.mxu0 %v5806_v24  ;;  %v5865_v1 = vld [vmem:[#allocation5 + $0x540] ss:$28 sps:$4 sm:$0xff]   ;;  %v5871_v5 = vld [vmem:[#allocation5 + $0x888] ss:$28 sps:$4 sm:$0xff]   ;;  %v5878_v10 = vld [vmem:[#allocation5 + $0x850] ss:$28 sps:$4 sm:$0xff]  }
  0x9f   :  { %2782 = vmatprep.subr.bf16.mxu1 %v5808_v25  ;;  %v5874_v6 = vld [vmem:[#allocation5 + $0xc08] ss:$28 sps:$4 sm:$0xff]   ;;  %v5881_v11 = vld [vmem:[#allocation5 + $0xbd0] ss:$28 sps:$4 sm:$0xff]   ;;  %v5886_v12 = vld [vmem:[#allocation5 + $0x81c] ss:$28 sps:$4 sm:$0xff]  }
  0xa0   :  { %v5889_v13 = vld [vmem:[#allocation5 + $0xb9c] ss:$28 sps:$4 sm:$0xff]   ;;  %v6930_v14 = vmov 0   ;;  %v5892_v17 = vld [vmem:[#allocation5 + $0x7e4] ss:$28 sps:$4 sm:$0xff]   ;;  %vm6932_vm0 = vmmov 0  }
  0xa1   :  { %2740 = vmatpush1.bf16.msra.mxu0 %v5810_v26  ;;  %v5884_v15 = vld [vmem:[#allocation5 + $0x818] ss:$28 sps:$4 sm:$0xff]   ;;  %v5895_v18 = vld [vmem:[#allocation5 + $0xb64] ss:$28 sps:$4 sm:$0xff]   ;;  %v5898_v21 = vld [vmem:[#allocation5 + $0x7ac] ss:$28 sps:$4 sm:$0xff]  }
  0xa2   :  { %2783 = vmatpush1.bf16.msra.mxu1 %v5811_v27  ;;  %2741 = vmatprep.subr.bf16.mxu0 %v5812_v28  ;;  %v5887_v16 = vld [vmem:[#allocation5 + $0xb98] ss:$28 sps:$4 sm:$0xff]   ;;  %v5890_v19 = vld [vmem:[#allocation5 + $0x7e0] ss:$28 sps:$4 sm:$0xff]   ;;  %v5901_v22 = vld [vmem:[#allocation5 + $0xb2c] ss:$28 sps:$4 sm:$0xff]  }
  0xa3   :  { %2784 = vmatprep.subr.bf16.mxu1 %v5814_v29  ;;  %v5893_v20 = vld [vmem:[#allocation5 + $0xb60] ss:$28 sps:$4 sm:$0xff]   ;;  %v5896_v23 = vld [vmem:[#allocation5 + $0x7a8] ss:$28 sps:$4 sm:$0xff]   ;;  %v5904_v25 = vld [vmem:[#allocation5 + $0x774] ss:$28 sps:$4 sm:$0xff]  }
  0xa4   :  { %v5899_v24 = vld [vmem:[#allocation5 + $0xb28] ss:$28 sps:$4 sm:$0xff]   ;;  %v5907_v26 = vld [vmem:[#allocation5 + $0xaf4] ss:$28 sps:$4 sm:$0xff]   ;;  %v5910_v29 = vld [vmem:[#allocation5 + $0x73c] ss:$28 sps:$4 sm:$0xff]  }
  0xa5   :  { %2742 = vmatpush1.bf16.msra.mxu0 %v5816_v30  ;;  %v5902_v27 = vld [vmem:[#allocation5 + $0x770] ss:$28 sps:$4 sm:$0xff]   ;;  %v5913_v30 = vld [vmem:[#allocation5 + $0xabc] ss:$28 sps:$4 sm:$0xff]   ;;  %s6933_s8 = smov [#allocation20]  }
  0xa6   :  { %2785 = vmatpush1.bf16.msra.mxu1 %v5817_v31  ;;  %2743 = vmatprep.subr.bf16.mxu0 %v5818_v32  ;;  %v5905_v28 = vld [vmem:[#allocation5 + $0xaf0] ss:$28 sps:$4 sm:$0xff]   ;;  %v5908_v31 = vld [vmem:[#allocation5 + $0x738] ss:$28 sps:$4 sm:$0xff]   ;;  %s5006_s10 = sshll.u32 %s6933_s8, 4  ;;  %s5007_s10 = int_to_ptr.vmem [resolvable:$true] %s5006_s10 }
  0xa7   :  { %2786 = vmatprep.subr.bf16.mxu1 %v5820_v33  ;;  %v5911_v32 = vld [vmem:[#allocation5 + $0xab8] ss:$28 sps:$4 sm:$0xff]   ;;  %v5916_v33 = vld [vmem:[#allocation5 + $0x704] ss:$28 sps:$4 sm:$0xff]   ;;  %s6857_s9 = scalar_lea.vmem %s5007_s10, 256  ;;  %p6862_p0 = scmp.lt.s32.totalorder %s5007_s10, %s5007_s10 }
  0xa8   :  { %p6858_p13 = scmp.ne.s32.totalorder %s5007_s10, %s6857_s9  ;;  %p6863_p1 = scmp.lt.s32.totalorder %s6857_s9, %s6857_s9 }
  0xa9   :  { %2744 = vmatpush2.bf16.msra.mxu0 %v5822_v34  ;;  %v5919_v34 = vld [vmem:[#allocation5 + $0xa84] ss:$28 sps:$4 sm:$0xff]  }
  0xaa   :  { %2787 = vmatpush2.bf16.msra.mxu1 %v5823_v35  ;;  %2745 = vmatprep.subr.bf16.mxu0 %v5824_v36  ;;  %v7061_v35 = vld [vmem:[#allocation2 + $0x14] ss:$28 sps:$4 sm:$0xff]   ;;  %p6864_p2 = por %p6863_p1, %p6862_p0 }
  0xab   :  { %2788 = vmatprep.subr.bf16.mxu1 %v5826_v37  ;;  %v5914_v36 = vld [vmem:[#allocation5 + $0x700] ss:$28 sps:$4 sm:$0xff]  }
  0xac   :  { %v5917_v37 = vld [vmem:[#allocation5 + $0xa80] ss:$28 sps:$4 sm:$0xff]   ;;  %p6865_p3 = pnand %p6864_p2, %p6858_p13 }
  0xad   :  { %2746 = vmatpush2.bf16.msra.mxu0 %v5828_v38  ;;  %v5922_v38 = vld [vmem:[#allocation5 + $0xa4c] ss:$28 sps:$4 sm:$0xff]  }
  0xae   :  { %2789 = vmatpush2.bf16.msra.mxu1 %v5829_v39  ;;  %2747 = vmatprep.subr.bf16.mxu0 %v5830_v40  ;;  %v5925_v39 = vld [vmem:[#allocation5 + $0x194] ss:$28 sps:$4 sm:$0xff]   ;;  %v5920_v40 = vld [vmem:[#allocation5 + $0xa48] ss:$28 sps:$4 sm:$0xff]  }
  0xaf   :  { %2790 = vmatprep.subr.bf16.mxu1 %v5832_v41  ;;  %v7064_v41 = vld [vmem:[#allocation2 + $0x18] ss:$28 sps:$4 sm:$0xff]  }
  0xb1   :  { %2748 = vmatpush2.bf16.msra.mxu0 %v5834_v42  ;;  %v5923_v42 = vld [vmem:[#allocation5 + $0x190] ss:$28 sps:$4 sm:$0xff]  }
  0xb2   :  { %2791 = vmatpush2.bf16.msra.mxu1 %v5835_v43  ;;  %2749 = vmatprep.subr.bf16.mxu0 %v5836_v44  ;;  %v5929_v43 = vld [vmem:[#allocation5 + $0xa14] ss:$28 sps:$4 sm:$0xff]   ;;  %v5932_v44 = vld [vmem:[#allocation5 + $0x15c] ss:$28 sps:$4 sm:$0xff]  }
  0xb3   :  { %2792 = vmatprep.subr.bf16.mxu1 %v5838_v45  ;;  %v5927_v45 = vld [vmem:[#allocation5 + $0xa10] ss:$28 sps:$4 sm:$0xff]  }
  0xb5   :  { %2750 = vmatpush2.bf16.msra.mxu0 %v5840_v46  ;;  %v5930_v46 = vld [vmem:[#allocation5 + $0x158] ss:$28 sps:$4 sm:$0xff]  }
  0xb6   :  { %2793 = vmatpush2.bf16.msra.mxu1 %v5841_v47  ;;  %2751 = vmatprep.subr.bf16.mxu0 %v5842_v48  ;;  %v5935_v47 = vld [vmem:[#allocation5 + $0x9dc] ss:$28 sps:$4 sm:$0xff]   ;;  %v5938_v48 = vld [vmem:[#allocation5 + $0x124] ss:$28 sps:$4 sm:$0xff]  }
  0xb7   :  { %2794 = vmatprep.subr.bf16.mxu1 %v5844_v51  ;;  %v5933_v51 = vld [vmem:[#allocation5 + $0x9d8] ss:$28 sps:$4 sm:$0xff]  }
  0xb9   :  { %2752 = vmatpush2.bf16.msra.mxu0 %v5846_v52  ;;  %v5936_v52 = vld [vmem:[#allocation5 + $0x120] ss:$28 sps:$4 sm:$0xff]  }
  0xba   :  { %2795 = vmatpush2.bf16.msra.mxu1 %v5847_v53  ;;  %2753 = vmatprep.subr.bf16.mxu0 %v5848_v54  ;;  %v5941_v53 = vld [vmem:[#allocation5 + $0x9a4] ss:$28 sps:$4 sm:$0xff]   ;;  %v5944_v54 = vld [vmem:[#allocation5 + $0xec] ss:$28 sps:$4 sm:$0xff]  }
  0xbb   :  { %2796 = vmatprep.subr.bf16.mxu1 %v5850_v55  ;;  %v5939_v55 = vld [vmem:[#allocation5 + $0x9a0] ss:$28 sps:$4 sm:$0xff]  }
  0xbd   :  { %2754 = vmatpush2.bf16.msra.mxu0 %v5852_v56  ;;  %v5942_v56 = vld [vmem:[#allocation5 + $0xe8] ss:$28 sps:$4 sm:$0xff]  }
  0xbe   :  { %2797 = vmatpush2.bf16.msra.mxu1 %v5853_v57  ;;  %2755 = vmatprep.subr.bf16.mxu0 %v5854_v58  ;;  %v5947_v57 = vld [vmem:[#allocation5 + $0x96c] ss:$28 sps:$4 sm:$0xff]   ;;  %v5950_v58 = vld [vmem:[#allocation5 + $0xb4] ss:$28 sps:$4 sm:$0xff]  }
  0xbf   :  { %2798 = vmatprep.subr.bf16.mxu1 %v5856_v59  ;;  %v5945_v59 = vld [vmem:[#allocation5 + $0x968] ss:$28 sps:$4 sm:$0xff]  }
  0xc1   :  { %2756 = vmatpush2.bf16.msra.mxu0 %v5858_v60  ;;  %v5953_v60 = vld [vmem:[#allocation5 + $0x934] ss:$28 sps:$4 sm:$0xff]  }
  0xc2   :  { %2799 = vmatpush2.bf16.msra.mxu1 %v5859_v61  ;;  %2757 = vmatprep.subr.bf16.mxu0 %v5860_v62  ;;  %v5956_v61 = vld [vmem:[#allocation5 + $0x7c] ss:$28 sps:$4 sm:$0xff]   ;;  %v5951_v62 = vld [vmem:[#allocation5 + $0x930] ss:$28 sps:$4 sm:$0xff]  }
  0xc3   :  { %2800 = vmatprep.subr.bf16.mxu1 %v5862_v63  ;;  %v5954_v63 = vld [vmem:[#allocation5 + $0x78] ss:$28 sps:$4 sm:$0xff]  }
  0xc5   :  { %2758 = vmatpush2.bf16.msra.mxu0 %v5864_v0  ;;  %v5959_v0 = vld [vmem:[#allocation5 + $0x8fc] ss:$28 sps:$4 sm:$0xff]  }
  0xc6   :  { %2801 = vmatpush2.bf16.msra.mxu1 %v5865_v1  ;;  %2813 = vmatprep.subr.bf16.mxu0 %v5873_v2  ;;  %v5962_v1 = vld [vmem:[#allocation5 + $0x44] ss:$28 sps:$4 sm:$0xff]   ;;  %v5957_v2 = vld [vmem:[#allocation5 + $0x8f8] ss:$28 sps:$4 sm:$0xff]  }
  0xc7   :  { %2856 = vmatprep.subr.bf16.mxu1 %v5876_v3  ;;  %v5960_v3 = vld [vmem:[#allocation5 + $0x40] ss:$28 sps:$4 sm:$0xff]  }
  0xc8   :  { %2760 = vmatmul.mubr.bf16.vlgmr.msra.gmra.mxu0 %v7054_v4 }
  0xc9   :  { %2803 = vmatmul.mubr.bf16.vlgmr.msra.gmra.mxu1 %v7056_v7  ;;  %2814 = vmatpush1.bf16.msra.mxu0 %v5871_v5  ;;  %v5965_v5 = vld [vmem:[#allocation5 + $0x8c4] ss:$28 sps:$4 sm:$0xff]  }
  0xca   :  { %2857 = vmatpush1.bf16.msra.mxu1 %v5874_v6  ;;  %2815 = vmatprep.subr.bf16.mxu0 %v5880_v8  ;;  %v5968_v6 = vld [vmem:[#allocation5 + $0xc] ss:$28 sps:$4 sm:$0xff]   ;;  %v5963_v8 = vld [vmem:[#allocation5 + $0x8c0] ss:$28 sps:$4 sm:$0xff]  }
  0xcb   :  { %2858 = vmatprep.subr.bf16.mxu1 %v5883_v9  ;;  %2888 = vmatprep.mubr.bf16.mxu1 %v6930_v14  ;;  %v5966_v9 = vld [vmem:[#allocation5 + $0x8] ss:$28 sps:$4 sm:$0xff]  }
  0xcc   :  { %2845 = vmatprep.mubr.bf16.mxu0 %v7061_v35 }
  0xcd   :  { %2816 = vmatpush1.bf16.msra.mxu0 %v5878_v10  ;;  %v5974_v10 = vld [vmem:[#allocation5 + $0x354] ss:$28 sps:$4 sm:$0xff]  }
  0xce   :  { %2859 = vmatpush1.bf16.msra.mxu1 %v5881_v11  ;;  %2817 = vmatprep.subr.bf16.mxu0 %v5886_v12  ;;  %v5977_v11 = vld [vmem:[#allocation5 + $0x514] ss:$28 sps:$4 sm:$0xff]  }
  0xcf   :  { %2860 = vmatprep.subr.bf16.mxu1 %v5889_v13  ;;  %v7068_v12 = vld [vmem:[#allocation2 + $0x10] ss:$28 sps:$4 sm:$0xff]   ;;  %v5972_v13 = vld [vmem:[#allocation5 + $0x350] ss:$28 sps:$4 sm:$0xff]  }
  0xd1   :  { %2818 = vmatpush1.bf16.msra.mxu0 %v5884_v15  ;;  %v5975_v15 = vld [vmem:[#allocation5 + $0x510] ss:$28 sps:$4 sm:$0xff]  }
  0xd2   :  { %2861 = vmatpush1.bf16.msra.mxu1 %v5887_v16  ;;  %2819 = vmatprep.subr.bf16.mxu0 %v5892_v17  ;;  %v5980_v16 = vld [vmem:[#allocation5 + $0x31c] ss:$28 sps:$4 sm:$0xff]  }
  0xd3   :  { %2862 = vmatprep.subr.bf16.mxu1 %v5895_v18  ;;  %v5983_v17 = vld [vmem:[#allocation5 + $0x4dc] ss:$28 sps:$4 sm:$0xff]  }
  0xd4   :  { %v5978_v18 = vld [vmem:[#allocation5 + $0x318] ss:$28 sps:$4 sm:$0xff]  }
  0xd5   :  { %2820 = vmatpush1.bf16.msra.mxu0 %v5890_v19  ;;  %v5981_v19 = vld [vmem:[#allocation5 + $0x4d8] ss:$28 sps:$4 sm:$0xff]  }
  0xd6   :  { %2863 = vmatpush1.bf16.msra.mxu1 %v5893_v20  ;;  %2821 = vmatprep.subr.bf16.mxu0 %v5898_v21  ;;  %v5986_v20 = vld [vmem:[#allocation5 + $0x2e4] ss:$28 sps:$4 sm:$0xff]  }
  0xd7   :  { %2864 = vmatprep.subr.bf16.mxu1 %v5901_v22  ;;  %v5989_v21 = vld [vmem:[#allocation5 + $0x4a4] ss:$28 sps:$4 sm:$0xff]  }
  0xd8   :  { %v5984_v22 = vld [vmem:[#allocation5 + $0x2e0] ss:$28 sps:$4 sm:$0xff]  }
  0xd9   :  { %2822 = vmatpush1.bf16.msra.mxu0 %v5896_v23  ;;  %v5987_v23 = vld [vmem:[#allocation5 + $0x4a0] ss:$28 sps:$4 sm:$0xff]  }
  0xda   :  { %2865 = vmatpush1.bf16.msra.mxu1 %v5899_v24  ;;  %2823 = vmatprep.subr.bf16.mxu0 %v5904_v25  ;;  %v5992_v24 = vld [vmem:[#allocation5 + $0x2ac] ss:$28 sps:$4 sm:$0xff]  }
  0xdb   :  { %2866 = vmatprep.subr.bf16.mxu1 %v5907_v26  ;;  %v5995_v25 = vld [vmem:[#allocation5 + $0x46c] ss:$28 sps:$4 sm:$0xff]  }
  0xdc   :  { %v5990_v26 = vld [vmem:[#allocation5 + $0x2a8] ss:$28 sps:$4 sm:$0xff]  }
  0xdd   :  { %2824 = vmatpush1.bf16.msra.mxu0 %v5902_v27  ;;  %v5993_v27 = vld [vmem:[#allocation5 + $0x468] ss:$28 sps:$4 sm:$0xff]  }
  0xde   :  { %2867 = vmatpush1.bf16.msra.mxu1 %v5905_v28  ;;  %2825 = vmatprep.subr.bf16.mxu0 %v5910_v29  ;;  %v5998_v28 = vld [vmem:[#allocation5 + $0x274] ss:$28 sps:$4 sm:$0xff]  }
  0xdf   :  { %2868 = vmatprep.subr.bf16.mxu1 %v5913_v30  ;;  %v6001_v29 = vld [vmem:[#allocation5 + $0x434] ss:$28 sps:$4 sm:$0xff]  }
  0xe0   :  { %v5996_v30 = vld [vmem:[#allocation5 + $0x270] ss:$28 sps:$4 sm:$0xff]  }
  0xe1   :  { %2826 = vmatpush1.bf16.msra.mxu0 %v5908_v31  ;;  %v6004_v31 = vld [vmem:[#allocation5 + $0x23c] ss:$28 sps:$4 sm:$0xff]  }
  0xe2   :  { %2869 = vmatpush1.bf16.msra.mxu1 %v5911_v32  ;;  %2827 = vmatprep.subr.bf16.mxu0 %v5916_v33  ;;  %v6007_v32 = vld [vmem:[#allocation5 + $0x3fc] ss:$28 sps:$4 sm:$0xff]  }
  0xe3   :  { %2870 = vmatprep.subr.bf16.mxu1 %v5919_v34  ;;  %v6002_v33 = vld [vmem:[#allocation5 + $0x238] ss:$28 sps:$4 sm:$0xff]  }
  0xe4   :  { %v6005_v34 = vld [vmem:[#allocation5 + $0x3f8] ss:$28 sps:$4 sm:$0xff]  }
  0xe5   :  { %2828 = vmatpush1.bf16.msra.mxu0 %v5914_v36  ;;  %v6010_v36 = vld [vmem:[#allocation5 + $0x204] ss:$28 sps:$4 sm:$0xff]  }
  0xe6   :  { %2871 = vmatpush1.bf16.msra.mxu1 %v5917_v37  ;;  %2829 = vmatprep.subr.bf16.mxu0 %v5922_v38  ;;  %v6013_v37 = vld [vmem:[#allocation5 + $0x3c4] ss:$28 sps:$4 sm:$0xff]  }
  0xe7   :  { %2899 = vmatprep.subr.bf16.mxu1 %v5925_v39  ;;  %v6008_v38 = vld [vmem:[#allocation5 + $0x200] ss:$28 sps:$4 sm:$0xff]  }
  0xe8   :  { %v6011_v39 = vld [vmem:[#allocation5 + $0x3c0] ss:$28 sps:$4 sm:$0xff]  }
  0xe9   :  { %2889 = vmatmul.mubr.bf16.vlgmr.msra.gmra.mxu1 %v7064_v41  ;;  %2830 = vmatpush2.bf16.msra.mxu0 %v5920_v40  ;;  %v6016_v40 = vld [vmem:[#allocation5 + $0x1cc] ss:$28 sps:$4 sm:$0xff]  }
  0xea   :  { %2900 = vmatpush1.bf16.msra.mxu1 %v5923_v42  ;;  %2831 = vmatprep.subr.bf16.mxu0 %v5929_v43  ;;  %v6019_v42 = vld [vmem:[#allocation5 + $0x38c] ss:$28 sps:$4 sm:$0xff]  }
  0xeb   :  { %2901 = vmatprep.subr.bf16.mxu1 %v5932_v44  ;;  %2931 = vmatprep.mubr.bf16.mxu1 %v7048_v49  ;;  %v5948_v49 = vld [vmem:[#allocation5 + $0xb0] ss:$28 sps:$4 sm:$0xff]   ;;  %v6014_v43 = vld [vmem:[#allocation5 + $0x1c8] ss:$28 sps:$4 sm:$0xff]  }
  0xec   :  { %v6017_v44 = vld [vmem:[#allocation5 + $0x388] ss:$28 sps:$4 sm:$0xff]  }
  0xed   :  { %2832 = vmatpush2.bf16.msra.mxu0 %v5927_v45  ;;  %v6022_v45 = vld [vmem:[#allocation5 + $0x6d4] ss:$28 sps:$4 sm:$0xff]  }
  0xee   :  { %2902 = vmatpush1.bf16.msra.mxu1 %v5930_v46  ;;  %2833 = vmatprep.subr.bf16.mxu0 %v5935_v47  ;;  %v6025_v46 = vld [vmem:[#allocation5 + $0x894] ss:$28 sps:$4 sm:$0xff]  }
  0xef   :  { %2903 = vmatprep.subr.bf16.mxu1 %v5938_v48  ;;  %v6020_v47 = vld [vmem:[#allocation5 + $0x6d0] ss:$28 sps:$4 sm:$0xff]  }
  0xf0   :  { %v6023_v48 = vld [vmem:[#allocation5 + $0x890] ss:$28 sps:$4 sm:$0xff]  }
  0xf1   :  { %2834 = vmatpush2.bf16.msra.mxu0 %v5933_v51  ;;  %v6028_v51 = vld [vmem:[#allocation5 + $0x69c] ss:$28 sps:$4 sm:$0xff]  }
  0xf2   :  { %2904 = vmatpush1.bf16.msra.mxu1 %v5936_v52  ;;  %2835 = vmatprep.subr.bf16.mxu0 %v5941_v53  ;;  %v6031_v52 = vld [vmem:[#allocation5 + $0x85c] ss:$28 sps:$4 sm:$0xff]  }
  0xf3   :  { %2905 = vmatprep.subr.bf16.mxu1 %v5944_v54  ;;  %v6026_v53 = vld [vmem:[#allocation5 + $0x698] ss:$28 sps:$4 sm:$0xff]  }
  0xf4   :  { %v6029_v54 = vld [vmem:[#allocation5 + $0x858] ss:$28 sps:$4 sm:$0xff]  }
  0xf5   :  { %2836 = vmatpush2.bf16.msra.mxu0 %v5939_v55  ;;  %v6034_v55 = vld [vmem:[#allocation5 + $0x664] ss:$28 sps:$4 sm:$0xff]  }
  0xf6   :  { %2906 = vmatpush1.bf16.msra.mxu1 %v5942_v56  ;;  %2837 = vmatprep.subr.bf16.mxu0 %v5947_v57  ;;  %v6037_v56 = vld [vmem:[#allocation5 + $0x824] ss:$28 sps:$4 sm:$0xff]  }
  0xf7   :  { %2907 = vmatprep.subr.bf16.mxu1 %v5950_v58  ;;  %v6032_v57 = vld [vmem:[#allocation5 + $0x660] ss:$28 sps:$4 sm:$0xff]  }
  0xf8   :  { %v6035_v58 = vld [vmem:[#allocation5 + $0x820] ss:$28 sps:$4 sm:$0xff]  }
  0xf9   :  { %2838 = vmatpush2.bf16.msra.mxu0 %v5945_v59  ;;  %v6040_v59 = vld [vmem:[#allocation5 + $0x62c] ss:$28 sps:$4 sm:$0xff]  }
  0xfa   :  { %2908 = vmatpush1.bf16.msra.mxu1 %v5948_v49  ;;  %2839 = vmatprep.subr.bf16.mxu0 %v5953_v60  ;;  %v6043_v49 = vld [vmem:[#allocation5 + $0x7ec] ss:$28 sps:$4 sm:$0xff]  }
  0xfb   :  { %2909 = vmatprep.subr.bf16.mxu1 %v5956_v61  ;;  %v6038_v60 = vld [vmem:[#allocation5 + $0x628] ss:$28 sps:$4 sm:$0xff]   ;;  %v6046_v61 = vld [vmem:[#allocation5 + $0x5f4] ss:$28 sps:$4 sm:$0xff]  }
  0xfd   :  { %2840 = vmatpush2.bf16.msra.mxu0 %v5951_v62  ;;  %v6049_v62 = vld [vmem:[#allocation5 + $0x7b4] ss:$28 sps:$4 sm:$0xff]  }
  0xfe   :  { %2910 = vmatpush1.bf16.msra.mxu1 %v5954_v63  ;;  %2841 = vmatprep.subr.bf16.mxu0 %v5959_v0  ;;  %v6044_v63 = vld [vmem:[#allocation5 + $0x5f0] ss:$28 sps:$4 sm:$0xff]  }
  0xff   :  { %2911 = vmatprep.subr.bf16.mxu1 %v5962_v1  ;;  %v6047_v0 = vld [vmem:[#allocation5 + $0x7b0] ss:$28 sps:$4 sm:$0xff]   ;;  %v6055_v1 = vld [vmem:[#allocation5 + $0x77c] ss:$28 sps:$4 sm:$0xff]  }
 0x101   :  { %2842 = vmatpush2.bf16.msra.mxu0 %v5957_v2  ;;  %v6050_v2 = vld [vmem:[#allocation5 + $0x5b8] ss:$28 sps:$4 sm:$0xff]  }
 0x102   :  { %2912 = vmatpush1.bf16.msra.mxu1 %v5960_v3  ;;  %2843 = vmatprep.subr.bf16.mxu0 %v5965_v5  ;;  %v6053_v3 = vld [vmem:[#allocation5 + $0x778] ss:$28 sps:$4 sm:$0xff]   ;;  %v6058_v5 = vld [vmem:[#allocation5 + $0x584] ss:$28 sps:$4 sm:$0xff]  }
 0x103   :  { %2913 = vmatprep.subr.bf16.mxu1 %v5968_v6  ;;  %v6061_v6 = vld [vmem:[#allocation5 + $0x744] ss:$28 sps:$4 sm:$0xff]  }
 0x105   :  { %2844 = vmatpush2.bf16.msra.mxu0 %v5963_v8  ;;  %v6056_v8 = vld [vmem:[#allocation5 + $0x580] ss:$28 sps:$4 sm:$0xff]  }
 0x106   :  { %2914 = vmatpush1.bf16.msra.mxu1 %v5966_v9  ;;  %2942 = vmatprep.subr.bf16.mxu0 %v5977_v11  ;;  %v6059_v9 = vld [vmem:[#allocation5 + $0x740] ss:$28 sps:$4 sm:$0xff]   ;;  %v6067_v11 = vld [vmem:[#allocation5 + $0x70c] ss:$28 sps:$4 sm:$0xff]  }
 0x107   :  { %2915 = vmatprep.subr.bf16.mxu1 %v5974_v10  ;;  %v6064_v10 = vld [vmem:[#allocation5 + $0x54c] ss:$28 sps:$4 sm:$0xff]  }
 0x108   :  { %2846 = vmatmul.mubr.bf16.vlgmr.msra.gmra.mxu0 %v7068_v12 }
 0x109   :  { %2943 = vmatpush1.bf16.msra.mxu0 %v5975_v15  ;;  %2974 = vmatprep.mubr.bf16.mxu0 %v7050_v50  ;;  %v5999_v50 = vld [vmem:[#allocation5 + $0x430] ss:$28 sps:$4 sm:$0xff]   ;;  %v6065_v15 = vld [vmem:[#allocation5 + $0x708] ss:$28 sps:$4 sm:$0xff]  }
 0x10a   :  { %2916 = vmatpush2.bf16.msra.mxu1 %v5972_v13  ;;  %2944 = vmatprep.subr.bf16.mxu0 %v5983_v17  ;;  %v6062_v13 = vld [vmem:[#allocation5 + $0x548] ss:$28 sps:$4 sm:$0xff]   ;;  %v6073_v17 = vld [vmem:[#allocation5 + $0xc14] ss:$28 sps:$4 sm:$0xff]  }
 0x10b   :  { %2917 = vmatprep.subr.bf16.mxu1 %v5980_v16  ;;  %v6070_v16 = vld [vmem:[#allocation5 + $0xa54] ss:$28 sps:$4 sm:$0xff]  }
 0x10d   :  { %2945 = vmatpush1.bf16.msra.mxu0 %v5981_v19  ;;  %v6071_v19 = vld [vmem:[#allocation5 + $0xc10] ss:$28 sps:$4 sm:$0xff]  }
 0x10e   :  { %2918 = vmatpush2.bf16.msra.mxu1 %v5978_v18  ;;  %2946 = vmatprep.subr.bf16.mxu0 %v5989_v21  ;;  %v6068_v18 = vld [vmem:[#allocation5 + $0xa50] ss:$28 sps:$4 sm:$0xff]   ;;  %v6079_v21 = vld [vmem:[#allocation5 + $0xbdc] ss:$28 sps:$4 sm:$0xff]  }
 0x10f   :  { %2919 = vmatprep.subr.bf16.mxu1 %v5986_v20  ;;  %v6076_v20 = vld [vmem:[#allocation5 + $0xa1c] ss:$28 sps:$4 sm:$0xff]  }
 0x111   :  { %2947 = vmatpush1.bf16.msra.mxu0 %v5987_v23  ;;  %v6077_v23 = vld [vmem:[#allocation5 + $0xbd8] ss:$28 sps:$4 sm:$0xff]  }
 0x112   :  { %2920 = vmatpush2.bf16.msra.mxu1 %v5984_v22  ;;  %2948 = vmatprep.subr.bf16.mxu0 %v5995_v25  ;;  %v6074_v22 = vld [vmem:[#allocation5 + $0xa18] ss:$28 sps:$4 sm:$0xff]   ;;  %v6085_v25 = vld [vmem:[#allocation5 + $0xba4] ss:$28 sps:$4 sm:$0xff]  }
 0x113   :  { %2921 = vmatprep.subr.bf16.mxu1 %v5992_v24  ;;  %v6082_v24 = vld [vmem:[#allocation5 + $0x9e4] ss:$28 sps:$4 sm:$0xff]  }
 0x115   :  { %2949 = vmatpush1.bf16.msra.mxu0 %v5993_v27  ;;  %v6083_v27 = vld [vmem:[#allocation5 + $0xba0] ss:$28 sps:$4 sm:$0xff]  }
 0x116   :  { %2922 = vmatpush2.bf16.msra.mxu1 %v5990_v26  ;;  %2950 = vmatprep.subr.bf16.mxu0 %v6001_v29  ;;  %v6080_v26 = vld [vmem:[#allocation5 + $0x9e0] ss:$28 sps:$4 sm:$0xff]   ;;  %v6091_v29 = vld [vmem:[#allocation5 + $0xb6c] ss:$28 sps:$4 sm:$0xff]  }
 0x117   :  { %2923 = vmatprep.subr.bf16.mxu1 %v5998_v28  ;;  %v6088_v28 = vld [vmem:[#allocation5 + $0x9ac] ss:$28 sps:$4 sm:$0xff]  }
 0x119   :  { %2951 = vmatpush1.bf16.msra.mxu0 %v5999_v50  ;;  %v6094_v50 = vld [vmem:[#allocation5 + $0x974] ss:$28 sps:$4 sm:$0xff]  }
 0x11a   :  { %2924 = vmatpush2.bf16.msra.mxu1 %v5996_v30  ;;  %2952 = vmatprep.subr.bf16.mxu0 %v6007_v32  ;;  %v6086_v30 = vld [vmem:[#allocation5 + $0x9a8] ss:$28 sps:$4 sm:$0xff]   ;;  %v6092_v32 = vld [vmem:[#allocation5 + $0x970] ss:$28 sps:$4 sm:$0xff]  }
 0x11b   :  { %2925 = vmatprep.subr.bf16.mxu1 %v6004_v31  ;;  %v6097_v31 = vld [vmem:[#allocation5 + $0xb34] ss:$28 sps:$4 sm:$0xff]  }
 0x11d   :  { %2953 = vmatpush1.bf16.msra.mxu0 %v6005_v34  ;;  %v6100_v34 = vld [vmem:[#allocation5 + $0x93c] ss:$28 sps:$4 sm:$0xff]  }
 0x11e   :  { %2926 = vmatpush2.bf16.msra.mxu1 %v6002_v33  ;;  %2954 = vmatprep.subr.bf16.mxu0 %v6013_v37  ;;  %v6095_v33 = vld [vmem:[#allocation5 + $0xb30] ss:$28 sps:$4 sm:$0xff]   ;;  %v6098_v37 = vld [vmem:[#allocation5 + $0x938] ss:$28 sps:$4 sm:$0xff]  }
 0x11f   :  { %2927 = vmatprep.subr.bf16.mxu1 %v6010_v36  ;;  %v6103_v36 = vld [vmem:[#allocation5 + $0xafc] ss:$28 sps:$4 sm:$0xff]  }
 0x121   :  { %2955 = vmatpush1.bf16.msra.mxu0 %v6011_v39  ;;  %v6106_v39 = vld [vmem:[#allocation5 + $0x904] ss:$28 sps:$4 sm:$0xff]  }
 0x122   :  { %2928 = vmatpush2.bf16.msra.mxu1 %v6008_v38  ;;  %2956 = vmatprep.subr.bf16.mxu0 %v6019_v42  ;;  %v6101_v38 = vld [vmem:[#allocation5 + $0xaf8] ss:$28 sps:$4 sm:$0xff]   ;;  %v6104_v42 = vld [vmem:[#allocation5 + $0x900] ss:$28 sps:$4 sm:$0xff]  }
 0x123   :  { %2929 = vmatprep.subr.bf16.mxu1 %v6016_v40  ;;  %v6109_v40 = vld [vmem:[#allocation5 + $0xac4] ss:$28 sps:$4 sm:$0xff]  }
 0x125   :  { %2957 = vmatpush1.bf16.msra.mxu0 %v6017_v44  ;;  %v6112_v44 = vld [vmem:[#allocation5 + $0x8cc] ss:$28 sps:$4 sm:$0xff]  }
 0x126   :  { %2930 = vmatpush2.bf16.msra.mxu1 %v6014_v43  ;;  %2958 = vmatprep.subr.bf16.mxu0 %v6022_v45  ;;  %v6107_v43 = vld [vmem:[#allocation5 + $0xac0] ss:$28 sps:$4 sm:$0xff]   ;;  %v6115_v45 = vld [vmem:[#allocation5 + $0xa8c] ss:$28 sps:$4 sm:$0xff]  }
 0x127   :  { %2985 = vmatprep.subr.bf16.mxu1 %v6025_v46  ;;  %v6110_v46 = vld [vmem:[#allocation5 + $0x8c8] ss:$28 sps:$4 sm:$0xff]  }
 0x129   :  { %2932 = vmatmul.mubr.bf16.vlgmr.msra.gmra.mxu1 %v7054_v4  ;;  %2959 = vmatpush2.bf16.msra.mxu0 %v6020_v47  ;;  %v6041_v4 = vld [vmem:[#allocation5 + $0x7e8] ss:$28 sps:$4 sm:$0xff]  }
 0x12a   :  { %2986 = vmatpush1.bf16.msra.mxu1 %v6023_v48  ;;  %2960 = vmatprep.subr.bf16.mxu0 %v6028_v51  ;;  %v6113_v47 = vld [vmem:[#allocation5 + $0xa88] ss:$28 sps:$4 sm:$0xff]   ;;  %v6118_v48 = vld [vmem:[#allocation5 + $0x19c] ss:$28 sps:$4 sm:$0xff]  }
 0x12b   :  { %2987 = vmatprep.subr.bf16.mxu1 %v6031_v52  ;;  %3017 = vmatprep.mubr.bf16.mxu1 %v7061_v35  ;;  %v6052_v35 = vld [vmem:[#allocation5 + $0x5bc] ss:$28 sps:$4 sm:$0xff]  }
 0x12c   :  { %v6121_v51 = vld [vmem:[#allocation5 + $0x51c] ss:$28 sps:$4 sm:$0xff]  }
 0x12d   :  { %2961 = vmatpush2.bf16.msra.mxu0 %v6026_v53  ;;  %v6116_v52 = vld [vmem:[#allocation5 + $0x198] ss:$28 sps:$4 sm:$0xff]  }
 0x12e   :  { %2988 = vmatpush1.bf16.msra.mxu1 %v6029_v54  ;;  %2962 = vmatprep.subr.bf16.mxu0 %v6034_v55  ;;  %v6119_v53 = vld [vmem:[#allocation5 + $0x518] ss:$28 sps:$4 sm:$0xff]   ;;  %v6124_v54 = vld [vmem:[#allocation5 + $0x164] ss:$28 sps:$4 sm:$0xff]  }
 0x12f   :  { %2989 = vmatprep.subr.bf16.mxu1 %v6037_v56  ;;  %v6127_v55 = vld [vmem:[#allocation5 + $0x4e4] ss:$28 sps:$4 sm:$0xff]  }
 0x130   :  { %v6122_v56 = vld [vmem:[#allocation5 + $0x160] ss:$28 sps:$4 sm:$0xff]  }
 0x131   :  { %2963 = vmatpush2.bf16.msra.mxu0 %v6032_v57  ;;  %v6125_v57 = vld [vmem:[#allocation5 + $0x4e0] ss:$28 sps:$4 sm:$0xff]  }
 0x132   :  { %2990 = vmatpush1.bf16.msra.mxu1 %v6035_v58  ;;  %2964 = vmatprep.subr.bf16.mxu0 %v6040_v59  ;;  %v6130_v58 = vld [vmem:[#allocation5 + $0x12c] ss:$28 sps:$4 sm:$0xff]  }
 0x133   :  { %2991 = vmatprep.subr.bf16.mxu1 %v6043_v49  ;;  %v6133_v59 = vld [vmem:[#allocation5 + $0x4ac] ss:$28 sps:$4 sm:$0xff]  }
 0x134   :  { %v6128_v49 = vld [vmem:[#allocation5 + $0x128] ss:$28 sps:$4 sm:$0xff]  }
 0x135   :  { %2965 = vmatpush2.bf16.msra.mxu0 %v6038_v60  ;;  %v7078_v60 = vld [vmem:[#allocation2 + $0x4] ss:$28 sps:$4 sm:$0xff]  }
 0x136   :  { %2992 = vmatpush1.bf16.msra.mxu1 %v6041_v4  ;;  %2966 = vmatprep.subr.bf16.mxu0 %v6046_v61  ;;  %v6629_v4 = vld [vmem:[#allocation2 + $0xc] ss:$28 sps:$4 sm:$0xff]   ;;  %v6131_v61 = vld [vmem:[#allocation5 + $0x4a8] ss:$28 sps:$4 sm:$0xff]  }
 0x137   :  { %2993 = vmatprep.subr.bf16.mxu1 %v6049_v62  ;;  %v6134_v62 = vld [vmem:[#allocation5 + $0xf0] ss:$28 sps:$4 sm:$0xff]  }
 0x139   :  { %2967 = vmatpush2.bf16.msra.mxu0 %v6044_v63  ;;  %v6137_v63 = vld [vmem:[#allocation5 + $0x470] ss:$28 sps:$4 sm:$0xff]  }
 0x13a   :  { %2994 = vmatpush1.bf16.msra.mxu1 %v6047_v0  ;;  %2968 = vmatprep.subr.bf16.mxu0 %v6052_v35  ;;  %v6142_v0 = vld [vmem:[#allocation5 + $0xbc] ss:$28 sps:$4 sm:$0xff]  }
 0x13b   :  { %2995 = vmatprep.subr.bf16.mxu1 %v6055_v1  ;;  %v6145_v35 = vld [vmem:[#allocation5 + $0x43c] ss:$28 sps:$4 sm:$0xff]   ;;  %v640_v1 = vlaneseq }
 0x13d   :  { %2969 = vmatpush2.bf16.msra.mxu0 %v6050_v2  ;;  %v6140_v2 = vld [vmem:[#allocation5 + $0xb8] ss:$28 sps:$4 sm:$0xff]  }
 0x13e   :  { %2996 = vmatpush1.bf16.msra.mxu1 %v6053_v3  ;;  %2970 = vmatprep.subr.bf16.mxu0 %v6058_v5  ;;  %v6143_v3 = vld [vmem:[#allocation5 + $0x438] ss:$28 sps:$4 sm:$0xff]   ;;  %v6148_v5 = vld [vmem:[#allocation5 + $0x84] ss:$28 sps:$4 sm:$0xff]  }
 0x13f   :  { %2997 = vmatprep.subr.bf16.mxu1 %v6061_v6  ;;  %v6151_v6 = vld [vmem:[#allocation5 + $0x404] ss:$28 sps:$4 sm:$0xff]  }
 0x141   :  { %2971 = vmatpush2.bf16.msra.mxu0 %v6056_v8  ;;  %v6146_v8 = vld [vmem:[#allocation5 + $0x80] ss:$28 sps:$4 sm:$0xff]  }
 0x142   :  { %2998 = vmatpush1.bf16.msra.mxu1 %v6059_v9  ;;  %2972 = vmatprep.subr.bf16.mxu0 %v6064_v10  ;;  %v7082_v9 = vshrl.u32 %v640_v1, 7  ;;  %v6149_v10 = vld [vmem:[#allocation5 + $0x400] ss:$28 sps:$4 sm:$0xff]  }
 0x143   :  { %2999 = vmatprep.subr.bf16.mxu1 %v6067_v11  ;;  %v6154_v11 = vld [vmem:[#allocation5 + $0x4c] ss:$28 sps:$4 sm:$0xff]  }
 0x145   :  { %2973 = vmatpush2.bf16.msra.mxu0 %v6062_v13  ;;  %v6157_v13 = vld [vmem:[#allocation5 + $0x3cc] ss:$28 sps:$4 sm:$0xff]  }
 0x146   :  { %3000 = vmatpush1.bf16.msra.mxu1 %v6065_v15  ;;  %3028 = vmatprep.subr.bf16.mxu0 %v6073_v17  ;;  %v6152_v15 = vld [vmem:[#allocation5 + $0x48] ss:$28 sps:$4 sm:$0xff]   ;;  %v6160_v17 = vld [vmem:[#allocation5 + $0x14] ss:$28 sps:$4 sm:$0xff]  }
 0x147   :  { %3001 = vmatprep.subr.bf16.mxu1 %v6070_v16  ;;  %v6155_v16 = vld [vmem:[#allocation5 + $0x3c8] ss:$28 sps:$4 sm:$0xff]  }
 0x148   :  { %2975 = vmatmul.mubr.bf16.vlgmr.msra.gmra.mxu0 %v7056_v7  ;;  %v6089_v7 = vld [vmem:[#allocation5 + $0xb68] ss:$28 sps:$4 sm:$0xff]  }
 0x149   :  { %3029 = vmatpush1.bf16.msra.mxu0 %v6071_v19  ;;  %3060 = vmatprep.mubr.bf16.mxu0 %v6930_v14  ;;  %v6158_v19 = vld [vmem:[#allocation5 + $0x10] ss:$28 sps:$4 sm:$0xff]  }
 0x14a   :  { %3002 = vmatpush2.bf16.msra.mxu1 %v6068_v18  ;;  %3030 = vmatprep.subr.bf16.mxu0 %v6079_v21  ;;  %v6163_v18 = vld [vmem:[#allocation5 + $0x394] ss:$28 sps:$4 sm:$0xff]   ;;  %v7084_v21 = vld [vmem:[#allocation7] sm:$0xff] }
 0x14b   :  { %3003 = vmatprep.subr.bf16.mxu1 %v6076_v20  ;;  %v6161_v20 = vld [vmem:[#allocation5 + $0x390] ss:$28 sps:$4 sm:$0xff]  }
 0x14d   :  { %3031 = vmatpush1.bf16.msra.mxu0 %v6077_v23  ;;  %v6166_v23 = vld [vmem:[#allocation5 + $0x35c] ss:$28 sps:$4 sm:$0xff]  }
 0x14e   :  { %3004 = vmatpush2.bf16.msra.mxu1 %v6074_v22  ;;  %3032 = vmatprep.subr.bf16.mxu0 %v6085_v25  ;;  %v7087_v22 = vsub.s32 0, %v7082_v9  ;;  %v6164_v25 = vld [vmem:[#allocation5 + $0x358] ss:$28 sps:$4 sm:$0xff]  }
 0x14f   :  { %3005 = vmatprep.subr.bf16.mxu1 %v6082_v24  ;;  %v6169_v24 = vld [vmem:[#allocation5 + $0x6dc] ss:$28 sps:$4 sm:$0xff]  }
 0x151   :  { %3033 = vmatpush1.bf16.msra.mxu0 %v6083_v27  ;;  %v643_v27 = vrot.slane %v7084_v21, %v7087_v22 }
 0x152   :  { %3006 = vmatpush2.bf16.msra.mxu1 %v6080_v26  ;;  %3034 = vmatprep.subr.bf16.mxu0 %v6091_v29  ;;  %v6167_v26 = vld [vmem:[#allocation5 + $0x6d8] ss:$28 sps:$4 sm:$0xff]   ;;  %v6175_v29 = vld [vmem:[#allocation5 + $0x6a4] ss:$28 sps:$4 sm:$0xff]  }
 0x153   :  { %3007 = vmatprep.subr.bf16.mxu1 %v6088_v28  ;;  %v6172_v28 = vld [vmem:[#allocation5 + $0x324] ss:$28 sps:$4 sm:$0xff]  }
 0x155   :  { %3035 = vmatpush1.bf16.msra.mxu0 %v6089_v7 }
 0x156   :  { %3008 = vmatpush2.bf16.msra.mxu1 %v6086_v30  ;;  %3036 = vmatprep.subr.bf16.mxu0 %v6097_v31  ;;  %v6170_v30 = vld [vmem:[#allocation5 + $0x320] ss:$28 sps:$4 sm:$0xff]  }
 0x157   :  { %3009 = vmatprep.subr.bf16.mxu1 %v6094_v50  ;;  %v6173_v31 = vld [vmem:[#allocation5 + $0x6a0] ss:$28 sps:$4 sm:$0xff]  }
 0x159   :  { %3037 = vmatpush1.bf16.msra.mxu0 %v6095_v33  ;;  %v6178_v33 = vld [vmem:[#allocation5 + $0x2ec] ss:$28 sps:$4 sm:$0xff]  }
 0x15a   :  { %3010 = vmatpush2.bf16.msra.mxu1 %v6092_v32  ;;  %3038 = vmatprep.subr.bf16.mxu0 %v6103_v36 }
 0x15b   :  { %3011 = vmatprep.subr.bf16.mxu1 %v6100_v34 }
 0x15d   :  { %3039 = vmatpush1.bf16.msra.mxu0 %v6101_v38 }
 0x15e   :  { %3012 = vmatpush2.bf16.msra.mxu1 %v6098_v37  ;;  %3040 = vmatprep.subr.bf16.mxu0 %v6109_v40  ;;  %v6181_v37 = vld [vmem:[#allocation5 + $0x66c] ss:$28 sps:$4 sm:$0xff]  }
 0x15f   :  { %3013 = vmatprep.subr.bf16.mxu1 %v6106_v39  ;;  %v6176_v39 = vld [vmem:[#allocation5 + $0x2e8] ss:$28 sps:$4 sm:$0xff]  }
 0x161   :  { %3041 = vmatpush1.bf16.msra.mxu0 %v6107_v43  ;;  %v6179_v43 = vld [vmem:[#allocation5 + $0x668] ss:$28 sps:$4 sm:$0xff]  }
 0x162   :  { %3014 = vmatpush2.bf16.msra.mxu1 %v6104_v42  ;;  %3042 = vmatprep.subr.bf16.mxu0 %v6115_v45  ;;  %v6184_v45 = vld [vmem:[#allocation5 + $0x2b4] ss:$28 sps:$4 sm:$0xff]  }
 0x163   :  { %3015 = vmatprep.subr.bf16.mxu1 %v6112_v44 }
 0x165   :  { %3043 = vmatpush1.bf16.msra.mxu0 %v6113_v47 }
 0x166   :  { %3016 = vmatpush2.bf16.msra.mxu1 %v6110_v46  ;;  %3071 = vmatprep.subr.bf16.mxu0 %v6118_v48  ;;  %v6187_v46 = vld [vmem:[#allocation5 + $0x634] ss:$28 sps:$4 sm:$0xff]  }
 0x167   :  { %3114 = vmatprep.subr.bf16.mxu1 %v6121_v51  ;;  %v6182_v48 = vld [vmem:[#allocation5 + $0x2b0] ss:$28 sps:$4 sm:$0xff]  }
 0x168   :  { %3061 = vmatmul.mubr.bf16.vlgmr.msra.gmra.mxu0 %v7064_v41  ;;  %v6139_v41 = vld [vmem:[#allocation5 + $0x474] ss:$28 sps:$4 sm:$0xff]  }
 0x169   :  { %3018 = vmatmul.mubr.bf16.vlgmr.msra.gmra.mxu1 %v7068_v12  ;;  %3072 = vmatpush1.bf16.msra.mxu0 %v6116_v52  ;;  %v6136_v12 = vld [vmem:[#allocation5 + $0xf4] ss:$28 sps:$4 sm:$0xff]   ;;  %v6190_v52 = vld [vmem:[#allocation5 + $0x27c] ss:$28 sps:$4 sm:$0xff]  }
 0x16a   :  { %3115 = vmatpush1.bf16.msra.mxu1 %v6119_v53  ;;  %3073 = vmatprep.subr.bf16.mxu0 %v6124_v54  ;;  %v6185_v51 = vld [vmem:[#allocation5 + $0x630] ss:$28 sps:$4 sm:$0xff]   ;;  %v6193_v53 = vld [vmem:[#allocation5 + $0x5fc] ss:$28 sps:$4 sm:$0xff]  }
 0x16b   :  { %3116 = vmatprep.subr.bf16.mxu1 %v6127_v55  ;;  %3103 = vmatprep.mubr.bf16.mxu0 %v7078_v60  ;;  %v6188_v54 = vld [vmem:[#allocation5 + $0x278] ss:$28 sps:$4 sm:$0xff]  }
 0x16c   :  { %3146 = vmatprep.mubr.bf16.mxu1 %v6629_v4  ;;  %v6191_v55 = vld [vmem:[#allocation5 + $0x5f8] ss:$28 sps:$4 sm:$0xff]   ;;  %v6205_v4 = vld [vmem:[#allocation5 + $0x58c] ss:$28 sps:$4 sm:$0xff]  }
 0x16d   :  { %3074 = vmatpush1.bf16.msra.mxu0 %v6122_v56  ;;  %v6196_v56 = vld [vmem:[#allocation5 + $0x244] ss:$28 sps:$4 sm:$0xff]  }
 0x16e   :  { %3117 = vmatpush1.bf16.msra.mxu1 %v6125_v57  ;;  %3075 = vmatprep.subr.bf16.mxu0 %v6130_v58  ;;  %v6199_v57 = vld [vmem:[#allocation5 + $0x5c4] ss:$28 sps:$4 sm:$0xff]  }
 0x16f   :  { %3118 = vmatprep.subr.bf16.mxu1 %v6133_v59  ;;  %v6194_v58 = vld [vmem:[#allocation5 + $0x240] ss:$28 sps:$4 sm:$0xff]  }
 0x170   :  { %v6197_v59 = vld [vmem:[#allocation5 + $0x5c0] ss:$28 sps:$4 sm:$0xff]  }
 0x171   :  { %3076 = vmatpush1.bf16.msra.mxu0 %v6128_v49  ;;  %v6202_v49 = vld [vmem:[#allocation5 + $0x20c] ss:$28 sps:$4 sm:$0xff]  }
 0x172   :  { %3119 = vmatpush1.bf16.msra.mxu1 %v6131_v61  ;;  %3077 = vmatprep.subr.bf16.mxu0 %v6136_v12  ;;  %v6200_v61 = vld [vmem:[#allocation5 + $0x208] ss:$28 sps:$4 sm:$0xff]  }
 0x173   :  { %3120 = vmatprep.subr.bf16.mxu1 %v6139_v41  ;;  %v6203_v12 = vld [vmem:[#allocation5 + $0x588] ss:$28 sps:$4 sm:$0xff]   ;;  %v6208_v41 = vld [vmem:[#allocation5 + $0x1d4] ss:$28 sps:$4 sm:$0xff]  }
 0x175   :  { %3078 = vmatpush1.bf16.msra.mxu0 %v6134_v62  ;;  %v6211_v62 = vld [vmem:[#allocation5 + $0x554] ss:$28 sps:$4 sm:$0xff]  }
 0x176   :  { %3121 = vmatpush1.bf16.msra.mxu1 %v6137_v63  ;;  %3079 = vmatprep.subr.bf16.mxu0 %v6142_v0  ;;  %v6206_v63 = vld [vmem:[#allocation5 + $0x1d0] ss:$28 sps:$4 sm:$0xff]  }
 0x177   :  { %3122 = vmatprep.subr.bf16.mxu1 %v6145_v35  ;;  %v6209_v0 = vld [vmem:[#allocation5 + $0x550] ss:$28 sps:$4 sm:$0xff]   ;;  %v6214_v35 = vld [vmem:[#allocation5 + $0x89c] ss:$28 sps:$4 sm:$0xff]  }
 0x179   :  { %3080 = vmatpush1.bf16.msra.mxu0 %v6140_v2  ;;  %v6217_v2 = vld [vmem:[#allocation5 + $0xc1c] ss:$28 sps:$4 sm:$0xff]  }
 0x17a   :  { %3123 = vmatpush1.bf16.msra.mxu1 %v6143_v3  ;;  %3081 = vmatprep.subr.bf16.mxu0 %v6148_v5  ;;  %v6212_v3 = vld [vmem:[#allocation5 + $0x898] ss:$28 sps:$4 sm:$0xff]  }
 0x17b   :  { %3124 = vmatprep.subr.bf16.mxu1 %v6151_v6  ;;  %v6215_v5 = vld [vmem:[#allocation5 + $0xc18] ss:$28 sps:$4 sm:$0xff]   ;;  %v6220_v6 = vld [vmem:[#allocation5 + $0x864] ss:$28 sps:$4 sm:$0xff]  }
 0x17d   :  { %3082 = vmatpush1.bf16.msra.mxu0 %v6146_v8  ;;  %v6223_v8 = vld [vmem:[#allocation5 + $0xbe4] ss:$28 sps:$4 sm:$0xff]  }
 0x17e   :  { %3125 = vmatpush1.bf16.msra.mxu1 %v6149_v10  ;;  %3083 = vmatprep.subr.bf16.mxu0 %v6154_v11  ;;  %v7099_v10 = vld [vmem:[#allocation2] ss:$28 sps:$4 sm:$0xff]   ;;  %v7102_v11 = vld [vmem:[#allocation2 + $0x8] ss:$28 sps:$4 sm:$0xff]  }
 0x17f   :  { %3126 = vmatprep.subr.bf16.mxu1 %v6157_v13  ;;  %v6218_v13 = vld [vmem:[#allocation5 + $0x860] ss:$28 sps:$4 sm:$0xff]  }
 0x181   :  { %3084 = vmatpush1.bf16.msra.mxu0 %v6152_v15  ;;  %v6221_v15 = vld [vmem:[#allocation5 + $0xbe0] ss:$28 sps:$4 sm:$0xff]  }
 0x182   :  { %3127 = vmatpush1.bf16.msra.mxu1 %v6155_v16  ;;  %3085 = vmatprep.subr.bf16.mxu0 %v6160_v17  ;;  %v6226_v16 = vld [vmem:[#allocation5 + $0x82c] ss:$28 sps:$4 sm:$0xff]  }
 0x183   :  { %3128 = vmatprep.subr.bf16.mxu1 %v6163_v18  ;;  %v6229_v17 = vld [vmem:[#allocation5 + $0xbac] ss:$28 sps:$4 sm:$0xff]   ;;  %v7106_v18 = vld [vmem:[#allocation2 + $0x14] ss:$28 sps:$4 sm:$0xff]  }
 0x185   :  { %3086 = vmatpush1.bf16.msra.mxu0 %v6158_v19  ;;  %v6224_v19 = vld [vmem:[#allocation5 + $0x828] ss:$28 sps:$4 sm:$0xff]  }
 0x186   :  { %3129 = vmatpush1.bf16.msra.mxu1 %v6161_v20  ;;  %3087 = vmatprep.subr.bf16.mxu0 %v6166_v23  ;;  %v6227_v20 = vld [vmem:[#allocation5 + $0xba8] ss:$28 sps:$4 sm:$0xff]   ;;  %v6232_v23 = vld [vmem:[#allocation5 + $0x7f4] ss:$28 sps:$4 sm:$0xff]  }
 0x187   :  { %3130 = vmatprep.subr.bf16.mxu1 %v6169_v24  ;;  %v6235_v24 = vld [vmem:[#allocation5 + $0xb74] ss:$28 sps:$4 sm:$0xff]  }
 0x188   :  { %v2761_v7 = vpop.f32.mrf.mxu0 }
 0x189   :  { %v2804_v50 = vpop.f32.mrf.mxu1  ;;  %v2762_v32 = vadd.f32 %v2761_v7, %v643_v27  ;;  %3088 = vmatpush2.bf16.msra.mxu0 %v6164_v25  ;;  %v6230_v25 = vld [vmem:[#allocation5 + $0x7f0] ss:$28 sps:$4 sm:$0xff]   ;;  %v6244_v7 = vld [vmem:[#allocation5 + $0x784] ss:$28 sps:$4 sm:$0xff]  }
 0x18a   :  { %3131 = vmatpush2.bf16.msra.mxu1 %v6167_v26  ;;  %v7091_v34 = vpop.f32.mrf.mxu0  ;;  %3089 = vmatprep.subr.bf16.mxu0 %v6172_v28  ;;  %v6233_v26 = vld [vmem:[#allocation5 + $0xb70] ss:$28 sps:$4 sm:$0xff]   ;;  %v6241_v28 = vld [vmem:[#allocation5 + $0xb3c] ss:$28 sps:$4 sm:$0xff]  }
 0x18b   :  { %v7093_v36 = vpop.f32.mrf.mxu1  ;;  %3132 = vmatprep.subr.bf16.mxu1 %v6175_v29  ;;  %v7095_v38 = vadd.f32 %v2804_v50, %v2762_v32  ;;  %v6236_v29 = vld [vmem:[#allocation5 + $0x7b8] ss:$28 sps:$4 sm:$0xff]   ;;  %v6247_v50 = vld [vmem:[#allocation5 + $0xb04] ss:$28 sps:$4 sm:$0xff]  }
 0x18c   :  { %v2765_v40 = vpop.f32.mrf.mxu0  ;;  %v6245_v32 = vld [vmem:[#allocation5 + $0xb00] ss:$28 sps:$4 sm:$0xff]  }
 0x18d   :  { %v2808_v42 = vpop.f32.mrf.mxu1  ;;  %v2766_v44 = vadd.f32 %v2765_v40, %v643_v27  ;;  %3090 = vmatpush2.bf16.msra.mxu0 %v6170_v30  ;;  %v6238_v27 = vld [vmem:[#allocation5 + $0x7bc] ss:$28 sps:$4 sm:$0xff]   ;;  %v6251_v40 = vld [vmem:[#allocation5 + $0xac8] ss:$28 sps:$4 sm:$0xff]  }
 0x18e   :  { %3133 = vmatpush2.bf16.msra.mxu1 %v6173_v31  ;;  %3091 = vmatprep.subr.bf16.mxu0 %v6178_v33  ;;  %v6239_v30 = vld [vmem:[#allocation5 + $0xb38] ss:$28 sps:$4 sm:$0xff]   ;;  %v6242_v31 = vld [vmem:[#allocation5 + $0x780] ss:$28 sps:$4 sm:$0xff]   ;;  %v6250_v33 = vld [vmem:[#allocation5 + $0x74c] ss:$28 sps:$4 sm:$0xff]  }
 0x18f   :  { %3134 = vmatprep.subr.bf16.mxu1 %v6181_v37  ;;  %v7097_v47 = vadd.f32 %v2808_v42, %v2766_v44  ;;  %v6253_v37 = vld [vmem:[#allocation5 + $0xacc] ss:$28 sps:$4 sm:$0xff]   ;;  %v6256_v42 = vld [vmem:[#allocation5 + $0x714] ss:$28 sps:$4 sm:$0xff]  }
 0x190   :  { %v6254_v44 = vld [vmem:[#allocation5 + $0x710] ss:$28 sps:$4 sm:$0xff]  }
 0x191   :  { %3092 = vmatpush2.bf16.msra.mxu0 %v6176_v39  ;;  %v6248_v39 = vld [vmem:[#allocation5 + $0x748] ss:$28 sps:$4 sm:$0xff]  }
 0x192   :  { %3135 = vmatpush2.bf16.msra.mxu1 %v6179_v43  ;;  %3093 = vmatprep.subr.bf16.mxu0 %v6184_v45  ;;  %v6259_v43 = vld [vmem:[#allocation5 + $0xa94] ss:$28 sps:$4 sm:$0xff]  }
 0x193   :  { %3136 = vmatprep.subr.bf16.mxu1 %v6187_v46  ;;  %v6257_v45 = vld [vmem:[#allocation5 + $0xa90] ss:$28 sps:$4 sm:$0xff]   ;;  %v6262_v46 = vld [vmem:[#allocation5 + $0xa5c] ss:$28 sps:$4 sm:$0xff]  }
 0x195   :  { %3094 = vmatpush2.bf16.msra.mxu0 %v6182_v48  ;;  %v6263_v48 = vld [vmem:[#allocation5 + $0x360] ss:$28 sps:$4 sm:$0xff]  }
 0x196   :  { %3137 = vmatpush2.bf16.msra.mxu1 %v6185_v51  ;;  %3095 = vmatprep.subr.bf16.mxu0 %v6190_v52  ;;  %v6260_v51 = vld [vmem:[#allocation5 + $0xa58] ss:$28 sps:$4 sm:$0xff]   ;;  %v6264_v52 = vld [vmem:[#allocation5 + $0x1a0] ss:$28 sps:$4 sm:$0xff]  }
 0x197   :  { %3138 = vmatprep.subr.bf16.mxu1 %v6193_v53  ;;  %v7109_v53 = vpop.f32.mrf.mxu1 }
 0x199   :  { %3096 = vmatpush2.bf16.msra.mxu0 %v6188_v54  ;;  %v6267_v54 = vld [vmem:[#allocation5 + $0xa24] ss:$28 sps:$4 sm:$0xff]  }
 0x19a   :  { %3139 = vmatpush2.bf16.msra.mxu1 %v6191_v55  ;;  %3097 = vmatprep.subr.bf16.mxu0 %v6196_v56  ;;  %v6268_v55 = vld [vmem:[#allocation5 + $0x328] ss:$28 sps:$4 sm:$0xff]   ;;  %v7111_v56 = vpop.f32.mrf.mxu0 }
 0x19b   :  { %3140 = vmatprep.subr.bf16.mxu1 %v6199_v57 }
 0x19d   :  { %3098 = vmatpush2.bf16.msra.mxu0 %v6194_v58  ;;  %v6265_v58 = vld [vmem:[#allocation5 + $0xa20] ss:$28 sps:$4 sm:$0xff]  }
 0x19e   :  { %3141 = vmatpush2.bf16.msra.mxu1 %v6197_v59  ;;  %3099 = vmatprep.subr.bf16.mxu0 %v6202_v49  ;;  %v7113_v49 = vld [vmem:[#allocation2 + $0x18] ss:$28 sps:$4 sm:$0xff]  }
 0x19f   :  { %3142 = vmatprep.subr.bf16.mxu1 %v6205_v4  ;;  %v6269_v4 = vld [vmem:[#allocation5 + $0x168] ss:$28 sps:$4 sm:$0xff]  }
 0x1a1   :  { %3100 = vmatpush2.bf16.msra.mxu0 %v6200_v61 }
 0x1a2   :  { %3143 = vmatpush2.bf16.msra.mxu1 %v6203_v12  ;;  %3101 = vmatprep.subr.bf16.mxu0 %v6208_v41  ;;  %v6272_v12 = vld [vmem:[#allocation5 + $0x9ec] ss:$28 sps:$4 sm:$0xff]  }
 0x1a3   :  { %3144 = vmatprep.subr.bf16.mxu1 %v6211_v62  ;;  %v6273_v41 = vld [vmem:[#allocation5 + $0x2f0] ss:$28 sps:$4 sm:$0xff]  }
 0x1a5   :  { %3102 = vmatpush2.bf16.msra.mxu0 %v6206_v63 }
 0x1a6   :  { %3145 = vmatpush2.bf16.msra.mxu1 %v6209_v0  ;;  %3157 = vmatprep.subr.bf16.mxu0 %v6214_v35  ;;  %v6270_v35 = vld [vmem:[#allocation5 + $0x9e8] ss:$28 sps:$4 sm:$0xff]  }
 0x1a7   :  { %3200 = vmatprep.subr.bf16.mxu1 %v6217_v2  ;;  %v6274_v2 = vld [vmem:[#allocation5 + $0x130] ss:$28 sps:$4 sm:$0xff]  }
 0x1a8   :  { %3104 = vmatmul.mubr.bf16.vlgmr.msra.gmra.mxu0 %v7099_v10 }
 0x1a9   :  { %3147 = vmatmul.mubr.bf16.vlgmr.msra.gmra.mxu1 %v7102_v11  ;;  %3158 = vmatpush1.bf16.msra.mxu0 %v6212_v3  ;;  %v2890_v57 = vpop.f32.mrf.mxu1 }
 0x1aa   :  { %3201 = vmatpush1.bf16.msra.mxu1 %v6215_v5  ;;  %3159 = vmatprep.subr.bf16.mxu0 %v6220_v6  ;;  %v6278_v6 = vld [vmem:[#allocation5 + $0x2b8] ss:$28 sps:$4 sm:$0xff]  }
 0x1ab   :  { %3202 = vmatprep.subr.bf16.mxu1 %v6223_v8  ;;  %3232 = vmatprep.mubr.bf16.mxu1 %v6930_v14  ;;  %v7117_v62 = vpop.f32.mrf.mxu1 }
 0x1ac   :  { %3189 = vmatprep.mubr.bf16.mxu0 %v7106_v18 }
 0x1ad   :  { %3160 = vmatpush1.bf16.msra.mxu0 %v6218_v13  ;;  %v2894_v8 = vpop.f32.mrf.mxu1 }
 0x1ae   :  { %3203 = vmatpush1.bf16.msra.mxu1 %v6221_v15  ;;  %3161 = vmatprep.subr.bf16.mxu0 %v6226_v16  ;;  %v6275_v15 = vld [vmem:[#allocation5 + $0x9b0] ss:$28 sps:$4 sm:$0xff]   ;;  %v6279_v16 = vld [vmem:[#allocation5 + $0xf8] ss:$28 sps:$4 sm:$0xff]  }
 0x1af   :  { %3204 = vmatprep.subr.bf16.mxu1 %v6229_v17  ;;  %v6282_v17 = vld [vmem:[#allocation5 + $0x97c] ss:$28 sps:$4 sm:$0xff]  }
 0x1b1   :  { %3162 = vmatpush1.bf16.msra.mxu0 %v6224_v19 }
 0x1b2   :  { %3205 = vmatpush1.bf16.msra.mxu1 %v6227_v20  ;;  %3163 = vmatprep.subr.bf16.mxu0 %v6232_v23  ;;  %v6283_v23 = vld [vmem:[#allocation5 + $0x280] ss:$28 sps:$4 sm:$0xff]  }
 0x1b3   :  { %3206 = vmatprep.subr.bf16.mxu1 %v6235_v24  ;;  %v6284_v24 = vld [vmem:[#allocation5 + $0xc0] ss:$28 sps:$4 sm:$0xff]  }
 0x1b5   :  { %3164 = vmatpush1.bf16.msra.mxu0 %v6230_v25  ;;  %v6287_v25 = vld [vmem:[#allocation5 + $0x944] ss:$28 sps:$4 sm:$0xff]  }
 0x1b6   :  { %3207 = vmatpush1.bf16.msra.mxu1 %v6233_v26  ;;  %3165 = vmatprep.subr.bf16.mxu0 %v6238_v27  ;;  %v6288_v26 = vld [vmem:[#allocation5 + $0x248] ss:$28 sps:$4 sm:$0xff]   ;;  %v6285_v27 = vld [vmem:[#allocation5 + $0x940] ss:$28 sps:$4 sm:$0xff]  }
 0x1b7   :  { %3208 = vmatprep.subr.bf16.mxu1 %v6241_v28  ;;  %v6289_v28 = vld [vmem:[#allocation5 + $0x88] ss:$28 sps:$4 sm:$0xff]  }
 0x1b9   :  { %3166 = vmatpush1.bf16.msra.mxu0 %v6236_v29  ;;  %v6292_v29 = vld [vmem:[#allocation5 + $0x90c] ss:$28 sps:$4 sm:$0xff]  }
 0x1ba   :  { %3209 = vmatpush1.bf16.msra.mxu1 %v6239_v30  ;;  %3167 = vmatprep.subr.bf16.mxu0 %v6244_v7  ;;  %v6293_v30 = vld [vmem:[#allocation5 + $0x210] ss:$28 sps:$4 sm:$0xff]   ;;  %v6290_v7 = vld [vmem:[#allocation5 + $0x908] ss:$28 sps:$4 sm:$0xff]  }
 0x1bb   :  { %3210 = vmatprep.subr.bf16.mxu1 %v6247_v50  ;;  %v6294_v50 = vld [vmem:[#allocation5 + $0x50] ss:$28 sps:$4 sm:$0xff]  }
 0x1bd   :  { %3168 = vmatpush1.bf16.msra.mxu0 %v6242_v31  ;;  %v6297_v31 = vld [vmem:[#allocation5 + $0x8d4] ss:$28 sps:$4 sm:$0xff]  }
 0x1be   :  { %3211 = vmatpush1.bf16.msra.mxu1 %v6245_v32  ;;  %3169 = vmatprep.subr.bf16.mxu0 %v6250_v33  ;;  %v6298_v32 = vld [vmem:[#allocation5 + $0x1d8] ss:$28 sps:$4 sm:$0xff]   ;;  %v6295_v33 = vld [vmem:[#allocation5 + $0x8d0] ss:$28 sps:$4 sm:$0xff]  }
 0x1bf   :  { %3212 = vmatprep.subr.bf16.mxu1 %v6253_v37  ;;  %v6299_v37 = vld [vmem:[#allocation5 + $0x18] ss:$28 sps:$4 sm:$0xff]  }
 0x1c1   :  { %3170 = vmatpush1.bf16.msra.mxu0 %v6248_v39  ;;  %v6300_v39 = vld [vmem:[#allocation5 + $0x6e0] ss:$28 sps:$4 sm:$0xff]  }
 0x1c2   :  { %3213 = vmatpush1.bf16.msra.mxu1 %v6251_v40  ;;  %3171 = vmatprep.subr.bf16.mxu0 %v6256_v42  ;;  %v6301_v40 = vld [vmem:[#allocation5 + $0xa60] ss:$28 sps:$4 sm:$0xff]  }
 0x1c3   :  { %3214 = vmatprep.subr.bf16.mxu1 %v6259_v43  ;;  %v6302_v42 = vld [vmem:[#allocation5 + $0x520] ss:$28 sps:$4 sm:$0xff]  }
 0x1c4   :  { %v6303_v43 = vld [vmem:[#allocation5 + $0x8a0] ss:$28 sps:$4 sm:$0xff]  }
 0x1c5   :  { %3172 = vmatpush1.bf16.msra.mxu0 %v6254_v44  ;;  %v6304_v44 = vld [vmem:[#allocation5 + $0x6a8] ss:$28 sps:$4 sm:$0xff]  }
 0x1c6   :  { %3215 = vmatpush1.bf16.msra.mxu1 %v6257_v45  ;;  %3173 = vmatprep.subr.bf16.mxu0 %v6262_v46  ;;  %v6305_v45 = vld [vmem:[#allocation5 + $0xa28] ss:$28 sps:$4 sm:$0xff]  }
 0x1c7   :  { %5631 = vmatprep.subr.bf16.mxu1 %v6263_v48  ;;  %v6306_v46 = vld [vmem:[#allocation5 + $0x4e8] ss:$28 sps:$4 sm:$0xff]  }
 0x1c8   :  { %v2847_v59 = vpop.f32.mrf.mxu0  ;;  %v6307_v48 = vld [vmem:[#allocation5 + $0x868] ss:$28 sps:$4 sm:$0xff]  }
 0x1c9   :  { %3233 = vmatmul.mubr.bf16.vlgmr.msra.gmra.mxu1 %v7113_v49  ;;  %v2848_v61 = vadd.f32 %v2847_v59, %v7095_v38  ;;  %3174 = vmatpush2.bf16.msra.mxu0 %v6260_v51  ;;  %v6277_v38 = vld [vmem:[#allocation5 + $0x9b4] ss:$28 sps:$4 sm:$0xff]  }
 0x1ca   :  { %5632 = vmatpush3.bf16.msra.mxu1 %v6264_v52  ;;  %v7119_v63 = vpop.f32.mrf.mxu0  ;;  %3175 = vmatprep.subr.bf16.mxu0 %v6267_v54  ;;  %v7125_v51 = vld [vmem:[#allocation2 + $0x10] ss:$28 sps:$4 sm:$0xff]   ;;  %v6308_v52 = vld [vmem:[#allocation5 + $0x670] ss:$28 sps:$4 sm:$0xff]  }
 0x1cb   :  { %5633 = vmatprep.subr.bf16.mxu1 %v6268_v55  ;;  %v2891_v0 = vadd.f32 %v2890_v57, %v2848_v61  ;;  %3275 = vmatprep.mubr.bf16.mxu1 %v7078_v60  ;;  %v6309_v54 = vld [vmem:[#allocation5 + $0x9f0] ss:$28 sps:$4 sm:$0xff]   ;;  %v6312_v59 = vld [vmem:[#allocation5 + $0x638] ss:$28 sps:$4 sm:$0xff]  }
 0x1cc   :  { %v2851_v3 = vpop.f32.mrf.mxu0  ;;  %v6310_v55 = vld [vmem:[#allocation5 + $0x4b0] ss:$28 sps:$4 sm:$0xff]   ;;  %v6314_v61 = vld [vmem:[#allocation5 + $0x478] ss:$28 sps:$4 sm:$0xff]  }
 0x1cd   :  { %v2852_v5 = vadd.f32 %v2851_v3, %v7097_v47  ;;  %3176 = vmatpush2.bf16.msra.mxu0 %v6265_v58  ;;  %v3407_v19 = vmax.f32 %v2891_v0, 0.0  ;;  %v6280_v47 = vld [vmem:[#allocation5 + $0x978] ss:$28 sps:$4 sm:$0xff]   ;;  %v6311_v57 = vld [vmem:[#allocation5 + $0x830] ss:$28 sps:$4 sm:$0xff]  }
 0x1ce   :  { %5634 = vmatpush3.bf16.msra.mxu1 %v6269_v4  ;;  %3177 = vmatprep.subr.bf16.mxu0 %v6272_v12  ;;  %v6635_v58 = vld [vmem:[#allocation2 + $0xc] ss:$28 sps:$4 sm:$0xff]   ;;  %v6317_v0 = vld [vmem:[#allocation5 + $0x980] ss:$28 sps:$4 sm:$0xff]  }
 0x1cf   :  { %5635 = vmatprep.subr.bf16.mxu1 %v6273_v41  ;;  %v2895_v13 = vadd.f32 %v2894_v8, %v2852_v5  ;;  %v6313_v4 = vld [vmem:[#allocation5 + $0x9b8] ss:$28 sps:$4 sm:$0xff]   ;;  %v6316_v41 = vld [vmem:[#allocation5 + $0x600] ss:$28 sps:$4 sm:$0xff]   ;;  %v6320_v5 = vld [vmem:[#allocation5 + $0x5c8] ss:$28 sps:$4 sm:$0xff]  }
 0x1d0   :  { %v6315_v12 = vld [vmem:[#allocation5 + $0x7f8] ss:$28 sps:$4 sm:$0xff]   ;;  %v6323_v8 = vld [vmem:[#allocation5 + $0x788] ss:$28 sps:$4 sm:$0xff]  }
 0x1d1   :  { %v3414_v20 = vmax.f32 %v2895_v13, 0.0  ;;  %3178 = vmatpush2.bf16.msra.mxu0 %v6270_v35  ;;  %v6318_v35 = vld [vmem:[#allocation5 + $0x440] ss:$28 sps:$4 sm:$0xff]  }
 0x1d2   :  { %5636 = vmatpush3.bf16.msra.mxu1 %v6274_v2  ;;  %3179 = vmatprep.subr.bf16.mxu0 %v6277_v38  ;;  %v6319_v2 = vld [vmem:[#allocation5 + $0x7c0] ss:$28 sps:$4 sm:$0xff]   ;;  %v6321_v38 = vld [vmem:[#allocation5 + $0x948] ss:$28 sps:$4 sm:$0xff]  }
 0x1d3   :  { %5637 = vmatprep.subr.bf16.mxu1 %v6278_v6  ;;  %v7123_v60 = vpack.c.bf16 %v3414_v20, %v3407_v19  ;;  %v6322_v6 = vld [vmem:[#allocation5 + $0x408] ss:$28 sps:$4 sm:$0xff]   ;;  %v6326_v19 = vld [vmem:[#allocation5 + $0x3d0] ss:$28 sps:$4 sm:$0xff]  }
 0x1d4   :  { %v6327_v20 = vld [vmem:[#allocation5 + $0x750] ss:$28 sps:$4 sm:$0xff]  }
 0x1d5   :  { %3180 = vmatpush2.bf16.msra.mxu0 %v6275_v15  ;;  %v6324_v15 = vld [vmem:[#allocation5 + $0x590] ss:$28 sps:$4 sm:$0xff]  }
 0x1d6   :  { %5638 = vmatpush3.bf16.msra.mxu1 %v6279_v16  ;;  %3181 = vmatprep.subr.bf16.mxu0 %v6282_v17  ;;  %v6325_v16 = vld [vmem:[#allocation5 + $0x910] ss:$28 sps:$4 sm:$0xff]   ;;  %v2853_v17 = vpop.f32.mrf.mxu0 }
 0x1d7   :  { %5639 = vmatprep.subr.bf16.mxu1 %v6283_v23 }
 0x1d9   :  { %3182 = vmatpush2.bf16.msra.mxu0 %v6280_v47  ;;  %v6328_v47 = vld [vmem:[#allocation5 + $0x558] ss:$28 sps:$4 sm:$0xff]  }
 0x1da   :  { %5640 = vmatpush3.bf16.msra.mxu1 %v6284_v24  ;;  %3183 = vmatprep.subr.bf16.mxu0 %v6287_v25  ;;  %v6329_v24 = vld [vmem:[#allocation5 + $0x8d8] ss:$28 sps:$4 sm:$0xff]   ;;  %v2896_v25 = vpop.f32.mrf.mxu1 }
 0x1db   :  { %5641 = vmatprep.subr.bf16.mxu1 %v6288_v26  ;;  %v6330_v26 = vld [vmem:[#allocation5 + $0x398] ss:$28 sps:$4 sm:$0xff]  }
 0x1dd   :  { %3184 = vmatpush2.bf16.msra.mxu0 %v6285_v27  ;;  %v6331_v27 = vld [vmem:[#allocation5 + $0x718] ss:$28 sps:$4 sm:$0xff]  }
 0x1de   :  { %5642 = vmatpush3.bf16.msra.mxu1 %v6289_v28  ;;  %3185 = vmatprep.subr.bf16.mxu0 %v6292_v29 }
 0x1df   :  { %5643 = vmatprep.subr.bf16.mxu1 %v6293_v30  ;;  %v6332_v30 = vld [vmem:[#allocation8 + $0x70] ss:$8 sps:$4 sm:$0xff]  }
 0x1e1   :  { %3186 = vmatpush2.bf16.msra.mxu0 %v6290_v7  ;;  %v6335_v7 = vld [vmem:[#allocation5 + $0xc20] ss:$28 sps:$4 sm:$0xff]  }
 0x1e2   :  { %5644 = vmatpush3.bf16.msra.mxu1 %v6294_v50  ;;  %3187 = vmatprep.subr.bf16.mxu0 %v6297_v31  ;;  %v6338_v31 = vld [vmem:[#allocation8 + $0x64] ss:$8 sps:$4 sm:$0xff]  }
 0x1e3   :  { %5645 = vmatprep.subr.bf16.mxu1 %v6298_v32 }
 0x1e5   :  { %3188 = vmatpush2.bf16.msra.mxu0 %v6295_v33  ;;  %v6339_v33 = vld [vmem:[#allocation5 + $0xbe8] ss:$28 sps:$4 sm:$0xff]  }
 0x1e6   :  { %5646 = vmatpush3.bf16.msra.mxu1 %v6299_v37  ;;  %5653 = vmatprep.subr.bf16.mxu0 %v6300_v39  ;;  %v6342_v37 = vld [vmem:[#allocation8 + $0x54] ss:$8 sps:$4 sm:$0xff]   ;;  %v6340_v39 = vld [vmem:[#allocation8 + $0x50] ss:$8 sps:$4 sm:$0xff]  }
 0x1e7   :  { %5675 = vmatprep.subr.bf16.mxu1 %v6301_v40  ;;  %v6343_v40 = vld [vmem:[#allocation5 + $0xbb0] ss:$28 sps:$4 sm:$0xff]  }
 0x1e8   :  { %3190 = vmatmul.mubr.bf16.vlgmr.msra.gmra.mxu0 %v7125_v51 }
 0x1e9   :  { %3276 = vmatmul.mubr.bf16.vlgmr.msra.gmra.mxu1 %v7099_v10  ;;  %5654 = vmatpush3.bf16.msra.mxu0 %v6302_v42  ;;  %v7131_v10 = vsub.s32 1, %v7082_v9  ;;  %v6344_v42 = vld [vmem:[#allocation8 + $0x40] ss:$8 sps:$4 sm:$0xff]  }
 0x1ea   :  { %5676 = vmatpush3.bf16.msra.mxu1 %v6303_v43  ;;  %5655 = vmatprep.subr.bf16.mxu0 %v6304_v44  ;;  %v6347_v43 = vld [vmem:[#allocation5 + $0xb78] ss:$28 sps:$4 sm:$0xff]   ;;  %v6350_v44 = vld [vmem:[#allocation8 + $0x34] ss:$8 sps:$4 sm:$0xff]  }
 0x1eb   :  { %5677 = vmatprep.subr.bf16.mxu1 %v6305_v45  ;;  %3316 = vmatprep.mubr.bf16.mxu0 %v6635_v58  ;;  %v6348_v45 = vld [vmem:[#allocation8 + $0x30] ss:$8 sps:$4 sm:$0xff]  }
 0x1ec   :  { %3357 = vmatprep.mubr.bf16.mxu1 %v7106_v18  ;;  %v647_v18 = vrot.slane %v7084_v21, %v7131_v10  ;;  %v6356_v58 = vld [vmem:[#allocation8 + $0x10] ss:$8 sps:$4 sm:$0xff]  }
 0x1ed   :  { %5656 = vmatpush3.bf16.msra.mxu0 %v6306_v46  ;;  %v6351_v46 = vld [vmem:[#allocation5 + $0xb40] ss:$28 sps:$4 sm:$0xff]  }
 0x1ee   :  { %5678 = vmatpush3.bf16.msra.mxu1 %v6307_v48  ;;  %5657 = vmatprep.subr.bf16.mxu0 %v6308_v52  ;;  %v2768_v3 = vadd.f32 %v7111_v56, %v647_v18  ;;  %v2764_v13 = vadd.f32 %v7091_v34, %v647_v18  ;;  %v6354_v48 = vld [vmem:[#allocation8 + $0x24] ss:$8 sps:$4 sm:$0xff]   ;;  %v6355_v52 = vld [vmem:[#allocation5 + $0xb08] ss:$28 sps:$4 sm:$0xff]  }
 0x1ef   :  { %5679 = vmatprep.subr.bf16.mxu1 %v6309_v54  ;;  %v7143_v54 = vpop.f32.mrf.mxu1  ;;  %v6363_v18 = vld [vmem:[#allocation5 + $0xa98] ss:$28 sps:$4 sm:$0xff]  }
 0x1f0   :  { %v2811_v21 = vadd.f32 %v7109_v53, %v2768_v3  ;;  %v2807_v56 = vadd.f32 %v7093_v36, %v2764_v13  ;;  %v6334_v53 = vld [vmem:[#allocation8 + $0x74] ss:$8 sps:$4 sm:$0xff]   ;;  %v6367_v13 = vld [vmem:[#allocation8 + $0x170] ss:$8 sps:$4 sm:$0xff]  }
 0x1f1   :  { %5658 = vmatpush3.bf16.msra.mxu0 %v6310_v55  ;;  %v6366_v3 = vld [vmem:[#allocation8 + $0xf4] ss:$8 sps:$4 sm:$0xff]  }
 0x1f2   :  { %5680 = vmatpush3.bf16.msra.mxu1 %v6311_v57  ;;  %5659 = vmatprep.subr.bf16.mxu0 %v6312_v59  ;;  %v2854_v23 = vadd.f32 %v2853_v17, %v2811_v21  ;;  %v2850_v34 = vadd.f32 %v7119_v63, %v2807_v56  ;;  %v6931_v63 = vmov 0.0   ;;  %v6358_v57 = vld [vmem:[#allocation8 + $0x14] ss:$8 sps:$4 sm:$0xff]   ;;  %v6359_v59 = vld [vmem:[#allocation5 + $0xad0] ss:$28 sps:$4 sm:$0xff]  }
 0x1f3   :  { %5681 = vmatprep.subr.bf16.mxu1 %v6313_v4  ;;  %v2935_v4 = vpop.f32.mrf.mxu1  ;;  %v6372_v17 = vld [vmem:[#allocation8 + $0xe4] ss:$8 sps:$4 sm:$0xff]  }
 0x1f4   :  { %v2897_v28 = vadd.f32 %v2896_v25, %v2854_v23  ;;  %v2893_v29 = vadd.f32 %v7117_v62, %v2850_v34  ;;  %v6336_v62 = vld [vmem:[#allocation8 + $0x60] ss:$8 sps:$4 sm:$0xff]   ;;  %v6375_v21 = vld [vmem:[#allocation8 + $0x164] ss:$8 sps:$4 sm:$0xff]  }
 0x1f5   :  { %5660 = vmatpush3.bf16.msra.mxu0 %v6314_v61 }
 0x1f6   :  { %5682 = vmatpush3.bf16.msra.mxu1 %v6315_v12  ;;  %5661 = vmatprep.subr.bf16.mxu0 %v6316_v41  ;;  %v3415_v36 = vmax.f32 %v2897_v28, 0.0  ;;  %v3408_v50 = vmax.f32 %v2893_v29, 0.0  ;;  %v6362_v12 = vld [vmem:[#allocation8 + $0x4] ss:$8 sps:$4 sm:$0xff]   ;;  %v654_v41 = vsub.s32 3, %v7082_v9 }
 0x1f7   :  { %5683 = vmatprep.subr.bf16.mxu1 %v6317_v0  ;;  %v6360_v0 = vld [vmem:[#allocation8] ss:$8 sps:$4 sm:$0xff]  }
 0x1f8   :  { %v3422_v32 = vpack.c.bf16 %v3415_v36, %v3408_v50 }
 0x1f9   :  { %5662 = vmatpush3.bf16.msra.mxu0 %v6318_v35  ;;  %v7148_v35 = vpop.f32.mrf.mxu1 }
 0x1fa   :  { %5684 = vmatpush3.bf16.msra.mxu1 %v6319_v2  ;;  %5663 = vmatprep.subr.bf16.mxu0 %v6320_v5  ;;  %v6369_v5 = vld [vmem:[#allocation8 + $0x174] ss:$8 sps:$4 sm:$0xff]  }
 0x1fb   :  { %5685 = vmatprep.subr.bf16.mxu1 %v6321_v38  ;;  %v7152_v38 = vld [vmem:[#allocation7] sm:$0xff] }
 0x1fd   :  { %5664 = vmatpush3.bf16.msra.mxu0 %v6322_v6  ;;  %v655_v6 = vrot.slane %v7152_v38, %v654_v41  ;;  %v6408_v41 = vld [vmem:[#allocation8 + $0x84] ss:$8 sps:$4 sm:$0xff]  }
 0x1fe   :  { %5686 = vmatpush3.bf16.msra.mxu1 %v6323_v8  ;;  %5665 = vmatprep.subr.bf16.mxu0 %v6324_v15  ;;  %v6364_v8 = vld [vmem:[#allocation8 + $0xf0] ss:$8 sps:$4 sm:$0xff]   ;;  %v2939_v15 = vpop.f32.mrf.mxu1 }
 0x1ff   :  { %5687 = vmatprep.subr.bf16.mxu1 %v6325_v16  ;;  %v2940_v28 = vadd.f32 %v2939_v15, %v655_v6  ;;  %v6417_v15 = vld [vmem:[#allocation8 + $0x1e4] ss:$8 sps:$4 sm:$0xff]  }
 0x201   :  { %5666 = vmatpush3.bf16.msra.mxu0 %v6326_v19  ;;  %v2936_v19 = vadd.f32 %v2935_v4, %v655_v6  ;;  %v6405_v4 = vld [vmem:[#allocation8 + $0x114] ss:$8 sps:$4 sm:$0xff]  }
 0x202   :  { %5688 = vmatpush3.bf16.msra.mxu1 %v6327_v20  ;;  %5667 = vmatprep.subr.bf16.mxu0 %v6328_v47  ;;  %v6370_v47 = vld [vmem:[#allocation8 + $0xe0] ss:$8 sps:$4 sm:$0xff]   ;;  %v6438_v6 = vld [vmem:[#allocation8 + $0x274] ss:$8 sps:$4 sm:$0xff]  }
 0x203   :  { %5689 = vmatprep.subr.bf16.mxu1 %v6329_v24  ;;  %v6373_v24 = vld [vmem:[#allocation8 + $0x160] ss:$8 sps:$4 sm:$0xff]  }
 0x205   :  { %5668 = vmatpush3.bf16.msra.mxu0 %v6330_v26  ;;  %v6378_v26 = vld [vmem:[#allocation8 + $0xd4] ss:$8 sps:$4 sm:$0xff]  }
 0x206   :  { %5690 = vmatpush3.bf16.msra.mxu1 %v6331_v27  ;;  %5728 = vmatprep.subr.bf16.mxu0 %v6931_v63  ;;  %v6381_v27 = vld [vmem:[#allocation8 + $0x154] ss:$8 sps:$4 sm:$0xff]  }
 0x207   :  { %4112 = vmatprep.subr.bf16.mxu1 %v6334_v53 }
 0x208   :  { %3317 = vmatmul.mubr.bf16.vlgmr.msra.gmra.mxu0 %v7102_v11  ;;  %v6346_v11 = vld [vmem:[#allocation8 + $0x44] ss:$8 sps:$4 sm:$0xff]   ;;  %v7145_v55 = vpop.f32.mrf.mxu0 }
 0x209   :  { %3358 = vmatmul.mubr.bf16.vlgmr.msra.gmra.mxu1 %v7125_v51  ;;  %5729 = vmatpush3.bf16.msra.mxu0 %v6335_v7  ;;  %v6352_v51 = vld [vmem:[#allocation8 + $0x20] ss:$8 sps:$4 sm:$0xff]   ;;  %v6379_v7 = vld [vmem:[#allocation8 + $0x150] ss:$8 sps:$4 sm:$0xff]  }
 0x20a   :  { %4113 = vmatpush1.bf16.msra.mxu1 %v6332_v30  ;;  %4144 = vmatprep.mubr.bf16.mxu1 %v3422_v32  ;;  %v2978_v61 = vpop.f32.mrf.mxu0 }
 0x20b   :  { %5730 = vmatprep.subr.bf16.mxu0 %v6931_v63  ;;  %4114 = vmatprep.subr.bf16.mxu1 %v6338_v31  ;;  %v2979_v23 = vadd.f32 %v2978_v61, %v2936_v19  ;;  %v6387_v31 = vld [vmem:[#allocation8 + $0x144] ss:$8 sps:$4 sm:$0xff]   ;;  %v6400_v61 = vld [vmem:[#allocation8 + $0x90] ss:$8 sps:$4 sm:$0xff]   ;;  %v6420_v19 = vld [vmem:[#allocation8 + $0x1d4] ss:$8 sps:$4 sm:$0xff]  }
 0x20c   :  { %5744 = vmatprep.mubr.msk.bf16.mxu0 %vm6932_vm0, %v6931_v63  ;;  %v7150_v2 = vpop.f32.mrf.mxu0 }
 0x20d   :  { %5731 = vmatpush3.bf16.msra.mxu0 %v6339_v33 }
 0x20e   :  { %4115 = vmatpush1.bf16.msra.mxu1 %v6336_v62  ;;  %5732 = vmatprep.subr.bf16.mxu0 %v6931_v63  ;;  %v2982_v16 = vpop.f32.mrf.mxu0 }
 0x20f   :  { %4116 = vmatprep.subr.bf16.mxu1 %v6342_v37  ;;  %v2983_v30 = vadd.f32 %v2982_v16, %v2940_v28  ;;  %v6441_v16 = vld [vmem:[#allocation8 + $0x264] ss:$8 sps:$4 sm:$0xff]  }
 0x211   :  { %5733 = vmatpush3.bf16.msra.mxu0 %v6343_v40  ;;  %v6385_v40 = vld [vmem:[#allocation8 + $0x140] ss:$8 sps:$4 sm:$0xff]  }
 0x212   :  { %4117 = vmatpush1.bf16.msra.mxu1 %v6340_v39  ;;  %5734 = vmatprep.subr.bf16.mxu0 %v6931_v63  ;;  %v6382_v39 = vld [vmem:[#allocation8 + $0xc0] ss:$8 sps:$4 sm:$0xff]  }
 0x213   :  { %4118 = vmatprep.subr.bf16.mxu1 %v6346_v11  ;;  %v6390_v11 = vld [vmem:[#allocation8 + $0xb4] ss:$8 sps:$4 sm:$0xff]  }
 0x215   :  { %5735 = vmatpush3.bf16.msra.mxu0 %v6347_v43 }
 0x216   :  { %4119 = vmatpush1.bf16.msra.mxu1 %v6344_v42  ;;  %5736 = vmatprep.subr.bf16.mxu0 %v6931_v63  ;;  %v6393_v42 = vld [vmem:[#allocation8 + $0x134] ss:$8 sps:$4 sm:$0xff]  }
 0x217   :  { %4120 = vmatprep.subr.bf16.mxu1 %v6350_v44 }
 0x219   :  { %5737 = vmatpush3.bf16.msra.mxu0 %v6351_v46  ;;  %v6388_v46 = vld [vmem:[#allocation8 + $0xb0] ss:$8 sps:$4 sm:$0xff]  }
 0x21a   :  { %4121 = vmatpush1.bf16.msra.mxu1 %v6348_v45  ;;  %5738 = vmatprep.subr.bf16.mxu0 %v6931_v63 }
 0x21b   :  { %4122 = vmatprep.subr.bf16.mxu1 %v6354_v48  ;;  %v6391_v48 = vld [vmem:[#allocation8 + $0x130] ss:$8 sps:$4 sm:$0xff]  }
 0x21d   :  { %5739 = vmatpush3.bf16.msra.mxu0 %v6355_v52  ;;  %v6399_v52 = vld [vmem:[#allocation8 + $0x124] ss:$8 sps:$4 sm:$0xff]  }
 0x21e   :  { %4123 = vmatpush1.bf16.msra.mxu1 %v6352_v51  ;;  %5740 = vmatprep.subr.bf16.mxu0 %v6931_v63  ;;  %v6396_v51 = vld [vmem:[#allocation8 + $0xa4] ss:$8 sps:$4 sm:$0xff]  }
 0x21f   :  { %4124 = vmatprep.subr.bf16.mxu1 %v6358_v57  ;;  %v6394_v57 = vld [vmem:[#allocation8 + $0xa0] ss:$8 sps:$4 sm:$0xff]  }
 0x221   :  { %5741 = vmatpush3.bf16.msra.mxu0 %v6359_v59  ;;  %v6402_v59 = vld [vmem:[#allocation8 + $0x94] ss:$8 sps:$4 sm:$0xff]  }
 0x222   :  { %4125 = vmatpush1.bf16.msra.mxu1 %v6356_v58  ;;  %5742 = vmatprep.subr.bf16.mxu0 %v6931_v63  ;;  %v6384_v63 = vld [vmem:[#allocation8 + $0xc4] ss:$8 sps:$4 sm:$0xff]   ;;  %v6397_v58 = vld [vmem:[#allocation8 + $0x120] ss:$8 sps:$4 sm:$0xff]  }
 0x223   :  { %4126 = vmatprep.subr.bf16.mxu1 %v6362_v12  ;;  %v6403_v12 = vld [vmem:[#allocation8 + $0x110] ss:$8 sps:$4 sm:$0xff]  }
 0x225   :  { %5743 = vmatpush3.bf16.msra.mxu0 %v6363_v18  ;;  %v6406_v18 = vld [vmem:[#allocation8 + $0x80] ss:$8 sps:$4 sm:$0xff]  }
 0x226   :  { %4127 = vmatpush1.bf16.msra.mxu1 %v6360_v0  ;;  %4155 = vmatprep.subr.bf16.mxu0 %v6369_v5  ;;  %v6411_v0 = vld [vmem:[#allocation8 + $0x104] ss:$8 sps:$4 sm:$0xff]   ;;  %v6414_v5 = vld [vmem:[#allocation8 + $0x1f4] ss:$8 sps:$4 sm:$0xff]  }
 0x227   :  { %4128 = vmatprep.subr.bf16.mxu1 %v6366_v3  ;;  %v6409_v3 = vld [vmem:[#allocation8 + $0x100] ss:$8 sps:$4 sm:$0xff]  }
 0x228   :  { %v7157_v56 = vpop.f32.mrf.mxu0  ;;  %5745 = vmatmul.mubr.bf16.vlgmr.msra.gmra.mxu0 %v7113_v49  ;;  %v6376_v49 = vld [vmem:[#allocation8 + $0xd0] ss:$8 sps:$4 sm:$0xff]  }
 0x229   :  { %v7155_v20 = vpop.f32.mrf.mxu1  ;;  %4156 = vmatpush1.bf16.msra.mxu0 %v6367_v13  ;;  %v6436_v13 = vld [vmem:[#allocation8 + $0x270] ss:$8 sps:$4 sm:$0xff]  }
 0x22a   :  { %4129 = vmatpush2.bf16.msra.mxu1 %v6364_v8  ;;  %v3064_v25 = vpop.f32.mrf.mxu0  ;;  %4157 = vmatprep.subr.bf16.mxu0 %v6375_v21  ;;  %v6412_v8 = vld [vmem:[#allocation8 + $0x1f0] ss:$8 sps:$4 sm:$0xff]   ;;  %v6439_v21 = vld [vmem:[#allocation8 + $0x260] ss:$8 sps:$4 sm:$0xff]  }
 0x22b   :  { %v3021_v34 = vpop.f32.mrf.mxu1  ;;  %4130 = vmatprep.subr.bf16.mxu1 %v6372_v17  ;;  %v6415_v17 = vld [vmem:[#allocation8 + $0x1e0] ss:$8 sps:$4 sm:$0xff]  }
 0x22c   :  { %v3022_v53 = vadd.f32 %v3021_v34, %v2979_v23  ;;  %v7162_v36 = vpop.f32.mrf.mxu0  ;;  %v6444_v23 = vld [vmem:[#allocation8 + $0x254] ss:$8 sps:$4 sm:$0xff]   ;;  %v650_v34 = vsub.s32 2, %v7082_v9 }
 0x22d   :  { %v7160_v29 = vpop.f32.mrf.mxu1  ;;  %4158 = vmatpush1.bf16.msra.mxu0 %v6373_v24  ;;  %v6442_v24 = vld [vmem:[#allocation8 + $0x250] ss:$8 sps:$4 sm:$0xff]  }
 0x22e   :  { %4131 = vmatpush2.bf16.msra.mxu1 %v6370_v47  ;;  %4159 = vmatprep.subr.bf16.mxu0 %v6381_v27  ;;  %v3065_v32 = vadd.f32 %v3064_v25, %v3022_v53  ;;  %v3068_v33 = vpop.f32.mrf.mxu0  ;;  %v6418_v47 = vld [vmem:[#allocation8 + $0x1d0] ss:$8 sps:$4 sm:$0xff]   ;;  %v6423_v25 = vld [vmem:[#allocation8 + $0x1c4] ss:$8 sps:$4 sm:$0xff]   ;;  %v6445_v27 = vld [vmem:[#allocation8 + $0x240] ss:$8 sps:$4 sm:$0xff]   ;;  %v651_v28 = vrot.slane %v7152_v38, %v650_v34 }
 0x22f   :  { %v3025_v50 = vpop.f32.mrf.mxu1  ;;  %4132 = vmatprep.subr.bf16.mxu1 %v6378_v26  ;;  %v6447_v26 = vld [vmem:[#allocation8 + $0x244] ss:$8 sps:$4 sm:$0xff]   ;;  %v6426_v53 = vld [vmem:[#allocation8 + $0x1b4] ss:$8 sps:$4 sm:$0xff]   ;;  %v6478_v34 = vld [vmem:[#allocation8 + $0x290] ss:$8 sps:$4 sm:$0xff]  }
 0x230   :  { %v3026_v62 = vadd.f32 %v3025_v50, %v2983_v30  ;;  %v3410_v43 = vmax.f32 %v3065_v32, 0.0  ;;  %v6450_v30 = vld [vmem:[#allocation8 + $0x234] ss:$8 sps:$4 sm:$0xff]   ;;  %v2938_v50 = vadd.f32 %v7148_v35, %v651_v28  ;;  %v2934_v32 = vadd.f32 %v7143_v54, %v651_v28  ;;  %v6454_v54 = vld [vmem:[#allocation8 + $0x210] ss:$8 sps:$4 sm:$0xff]  }
 0x231   :  { %4160 = vmatpush1.bf16.msra.mxu0 %v6379_v7  ;;  %v6448_v7 = vld [vmem:[#allocation8 + $0x230] ss:$8 sps:$4 sm:$0xff]   ;;  %v6456_v35 = vld [vmem:[#allocation8 + $0x214] ss:$8 sps:$4 sm:$0xff]   ;;  %v6505_v28 = vld [vmem:[#allocation8 + $0x300] ss:$8 sps:$4 sm:$0xff]  }
 0x232   :  { %v3069_v37 = vadd.f32 %v3068_v33, %v3026_v62  ;;  %4133 = vmatpush2.bf16.msra.mxu1 %v6376_v49  ;;  %4161 = vmatprep.subr.bf16.mxu0 %v6387_v31  ;;  %v6424_v49 = vld [vmem:[#allocation8 + $0x1b0] ss:$8 sps:$4 sm:$0xff]   ;;  %v6453_v31 = vld [vmem:[#allocation8 + $0x224] ss:$8 sps:$4 sm:$0xff]   ;;  %v2981_v62 = vadd.f32 %v7150_v2, %v2938_v50  ;;  %v6427_v33 = vld [vmem:[#allocation8 + $0x1a0] ss:$8 sps:$4 sm:$0xff]  }
 0x233   :  { %4134 = vmatprep.subr.bf16.mxu1 %v6384_v63  ;;  %v6429_v63 = vld [vmem:[#allocation8 + $0x1a4] ss:$8 sps:$4 sm:$0xff]   ;;  %v658_v50 = vsub.s32 4, %v7082_v9 }
 0x234   :  { %v3417_v44 = vmax.f32 %v3069_v37, 0.0  ;;  %v6451_v37 = vld [vmem:[#allocation8 + $0x220] ss:$8 sps:$4 sm:$0xff]  }
 0x235   :  { %4162 = vmatpush1.bf16.msra.mxu0 %v6385_v40  ;;  %v3024_v40 = vadd.f32 %v7160_v29, %v2981_v62  ;;  %v6433_v29 = vld [vmem:[#allocation8 + $0x180] ss:$8 sps:$4 sm:$0xff]   ;;  %v659_v62 = vrot.slane %v7152_v38, %v658_v50 }
 0x236   :  { %v3424_v45 = vpack.c.bf16 %v3417_v44, %v3410_v43  ;;  %4135 = vmatpush2.bf16.msra.mxu1 %v6382_v39  ;;  %4163 = vmatprep.subr.bf16.mxu0 %v6393_v42  ;;  %v2977_v39 = vadd.f32 %v7145_v55, %v2934_v32  ;;  %v6430_v43 = vld [vmem:[#allocation8 + $0x190] ss:$8 sps:$4 sm:$0xff]   ;;  %v6435_v44 = vld [vmem:[#allocation8 + $0x184] ss:$8 sps:$4 sm:$0xff]  }
 0x237   :  { %4136 = vmatprep.subr.bf16.mxu1 %v6390_v11  ;;  %v6432_v11 = vld [vmem:[#allocation8 + $0x194] ss:$8 sps:$4 sm:$0xff]   ;;  %v3067_v2 = vadd.f32 %v7162_v36, %v3024_v40  ;;  %v6484_v36 = vld [vmem:[#allocation8 + $0x370] ss:$8 sps:$4 sm:$0xff]  }
 0x238   :  { %4187 = vmatprep.mubr.bf16.mxu0 %v3424_v45  ;;  %v3020_v42 = vadd.f32 %v7155_v20, %v2977_v39  ;;  %v6459_v45 = vld [vmem:[#allocation8 + $0x204] ss:$8 sps:$4 sm:$0xff]   ;;  %v6462_v20 = vld [vmem:[#allocation8 + $0x2f4] ss:$8 sps:$4 sm:$0xff]  }
 0x239   :  { %4164 = vmatpush1.bf16.msra.mxu0 %v6391_v48  ;;  %v3416_v48 = vmax.f32 %v3067_v2, 0.0 }
 0x23a   :  { %4137 = vmatpush2.bf16.msra.mxu1 %v6388_v46  ;;  %4165 = vmatprep.subr.bf16.mxu0 %v6399_v52  ;;  %v3063_v55 = vadd.f32 %v7157_v56, %v3020_v42  ;;  %v6457_v46 = vld [vmem:[#allocation8 + $0x200] ss:$8 sps:$4 sm:$0xff]  }
 0x23b   :  { %4138 = vmatprep.subr.bf16.mxu1 %v6396_v51  ;;  %v6486_v51 = vld [vmem:[#allocation8 + $0x374] ss:$8 sps:$4 sm:$0xff]   ;;  %v6463_v56 = vld [vmem:[#allocation8 + $0x2e0] ss:$8 sps:$4 sm:$0xff]  }
 0x23c   :  { %v3409_v52 = vmax.f32 %v3063_v55, 0.0 }
 0x23d   :  { %4166 = vmatpush1.bf16.msra.mxu0 %v6397_v58 }
 0x23e   :  { %4139 = vmatpush2.bf16.msra.mxu1 %v6394_v57  ;;  %4167 = vmatprep.subr.bf16.mxu0 %v6405_v4  ;;  %v6460_v57 = vld [vmem:[#allocation8 + $0x2f0] ss:$8 sps:$4 sm:$0xff]   ;;  %v3423_v58 = vpack.c.bf16 %v3416_v48, %v3409_v52  ;;  %v6489_v4 = vld [vmem:[#allocation8 + $0x364] ss:$8 sps:$4 sm:$0xff]  }
 0x23f   :  { %4140 = vmatprep.subr.bf16.mxu1 %v6402_v59  ;;  %v6465_v59 = vld [vmem:[#allocation8 + $0x2e4] ss:$8 sps:$4 sm:$0xff]  }
 0x241   :  { %4168 = vmatpush1.bf16.msra.mxu0 %v6403_v12  ;;  %v6468_v12 = vld [vmem:[#allocation8 + $0x2d4] ss:$8 sps:$4 sm:$0xff]  }
 0x242   :  { %4141 = vmatpush2.bf16.msra.mxu1 %v6400_v61  ;;  %4169 = vmatprep.subr.bf16.mxu0 %v6411_v0  ;;  %v6487_v61 = vld [vmem:[#allocation8 + $0x360] ss:$8 sps:$4 sm:$0xff]   ;;  %v6466_v0 = vld [vmem:[#allocation8 + $0x2d0] ss:$8 sps:$4 sm:$0xff]  }
 0x243   :  { %4142 = vmatprep.subr.bf16.mxu1 %v6408_v41  ;;  %v6492_v41 = vld [vmem:[#allocation8 + $0x354] ss:$8 sps:$4 sm:$0xff]  }
 0x245   :  { %4170 = vmatpush1.bf16.msra.mxu0 %v6409_v3  ;;  %v6471_v3 = vld [vmem:[#allocation8 + $0x2c4] ss:$8 sps:$4 sm:$0xff]  }
 0x246   :  { %4143 = vmatpush2.bf16.msra.mxu1 %v6406_v18  ;;  %4171 = vmatprep.subr.bf16.mxu0 %v6414_v5  ;;  %v6490_v18 = vld [vmem:[#allocation8 + $0x350] ss:$8 sps:$4 sm:$0xff]   ;;  %v6495_v5 = vld [vmem:[#allocation8 + $0x344] ss:$8 sps:$4 sm:$0xff]  }
 0x247   :  { %4198 = vmatprep.subr.bf16.mxu1 %v6438_v6  ;;  %v6469_v6 = vld [vmem:[#allocation8 + $0x2c0] ss:$8 sps:$4 sm:$0xff]  }
 0x249   :  { %4145 = vmatmul.mubr.bf16.vlgmr.msra.gmra.mxu1 %v7123_v60  ;;  %4172 = vmatpush2.bf16.msra.mxu0 %v6412_v8  ;;  %v6421_v60 = vld [vmem:[#allocation8 + $0x1c0] ss:$8 sps:$4 sm:$0xff]  }
 0x24a   :  { %4199 = vmatpush1.bf16.msra.mxu1 %v6436_v13  ;;  %4173 = vmatprep.subr.bf16.mxu0 %v6417_v15  ;;  %v6493_v8 = vld [vmem:[#allocation8 + $0x340] ss:$8 sps:$4 sm:$0xff]   ;;  %v6474_v13 = vld [vmem:[#allocation8 + $0x2b4] ss:$8 sps:$4 sm:$0xff]  }
 0x24b   :  { %4200 = vmatprep.subr.bf16.mxu1 %v6441_v16  ;;  %v6498_v15 = vld [vmem:[#allocation8 + $0x334] ss:$8 sps:$4 sm:$0xff]   ;;  %v6472_v16 = vld [vmem:[#allocation8 + $0x2b0] ss:$8 sps:$4 sm:$0xff]  }
 0x24d   :  { %4174 = vmatpush2.bf16.msra.mxu0 %v6415_v17  ;;  %v6477_v17 = vld [vmem:[#allocation8 + $0x2a4] ss:$8 sps:$4 sm:$0xff]  }
 0x24e   :  { %4201 = vmatpush1.bf16.msra.mxu1 %v6439_v21  ;;  %4175 = vmatprep.subr.bf16.mxu0 %v6420_v19  ;;  %v6501_v21 = vld [vmem:[#allocation8 + $0x324] ss:$8 sps:$4 sm:$0xff]   ;;  %v6475_v19 = vld [vmem:[#allocation8 + $0x2a0] ss:$8 sps:$4 sm:$0xff]  }
 0x24f   :  { %4202 = vmatprep.subr.bf16.mxu1 %v6444_v23  ;;  %v6499_v23 = vld [vmem:[#allocation8 + $0x320] ss:$8 sps:$4 sm:$0xff]  }
 0x251   :  { %4176 = vmatpush2.bf16.msra.mxu0 %v6418_v47  ;;  %v6480_v47 = vld [vmem:[#allocation8 + $0x294] ss:$8 sps:$4 sm:$0xff]  }
 0x252   :  { %4203 = vmatpush1.bf16.msra.mxu1 %v6442_v24  ;;  %4177 = vmatprep.subr.bf16.mxu0 %v6423_v25  ;;  %v6504_v24 = vld [vmem:[#allocation8 + $0x314] ss:$8 sps:$4 sm:$0xff]   ;;  %v6502_v25 = vld [vmem:[#allocation8 + $0x310] ss:$8 sps:$4 sm:$0xff]  }
 0x253   :  { %4204 = vmatprep.subr.bf16.mxu1 %v6447_v26  ;;  %v6483_v26 = vld [vmem:[#allocation8 + $0x284] ss:$8 sps:$4 sm:$0xff]  }
 0x255   :  { %4178 = vmatpush2.bf16.msra.mxu0 %v6421_v60  ;;  %v6507_v60 = vld [vmem:[#allocation8 + $0x304] ss:$8 sps:$4 sm:$0xff]  }
 0x256   :  { %4205 = vmatpush1.bf16.msra.mxu1 %v6445_v27  ;;  %4179 = vmatprep.subr.bf16.mxu0 %v6426_v53  ;;  %v6481_v27 = vld [vmem:[#allocation8 + $0x280] ss:$8 sps:$4 sm:$0xff]  }
 0x257   :  { %4206 = vmatprep.subr.bf16.mxu1 %v6450_v30 }
 0x259   :  { %4180 = vmatpush2.bf16.msra.mxu0 %v6424_v49 }
 0x25a   :  { %4207 = vmatpush1.bf16.msra.mxu1 %v6448_v7  ;;  %4181 = vmatprep.subr.bf16.mxu0 %v6429_v63  ;;  %v662_v7 = vsub.s32 5, %v7082_v9 }
 0x25b   :  { %4208 = vmatprep.subr.bf16.mxu1 %v6453_v31 }
 0x25c   :  { %v663_v32 = vrot.slane %v7152_v38, %v662_v7 }
 0x25d   :  { %4182 = vmatpush2.bf16.msra.mxu0 %v6427_v33 }
 0x25e   :  { %4209 = vmatpush1.bf16.msra.mxu1 %v6451_v37  ;;  %4183 = vmatprep.subr.bf16.mxu0 %v6432_v11 }
 0x25f   :  { %4210 = vmatprep.subr.bf16.mxu1 %v6456_v35 }
 0x261   :  { %4184 = vmatpush2.bf16.msra.mxu0 %v6430_v43 }
 0x262   :  { %4211 = vmatpush1.bf16.msra.mxu1 %v6454_v54  ;;  %4185 = vmatprep.subr.bf16.mxu0 %v6435_v44 }
 0x263   :  { %4212 = vmatprep.subr.bf16.mxu1 %v6459_v45 }
 0x265   :  { %4186 = vmatpush2.bf16.msra.mxu0 %v6433_v29 }
 0x266   :  { %4213 = vmatpush1.bf16.msra.mxu1 %v6457_v46  ;;  %4241 = vmatprep.subr.bf16.mxu0 %v6486_v51 }
 0x267   :  { %4214 = vmatprep.subr.bf16.mxu1 %v6462_v20 }
 0x268   :  { %4188 = vmatmul.mubr.bf16.vlgmr.msra.gmra.mxu0 %v3423_v58  ;;  %v3105_v30 = vpop.f32.mrf.mxu0 }
 0x269   :  { %4242 = vmatpush1.bf16.msra.mxu0 %v6484_v36  ;;  %4273 = vmatprep.mubr.bf16.mxu0 %v6930_v14  ;;  %v6496_v14 = vld [vmem:[#allocation8 + $0x330] ss:$8 sps:$4 sm:$0xff]   ;;  %v3148_v53 = vpop.f32.mrf.mxu1  ;;  %v3106_v11 = vadd.f32 %v3105_v30, %v659_v62 }
 0x26a   :  { %4215 = vmatpush2.bf16.msra.mxu1 %v6460_v57  ;;  %4243 = vmatprep.subr.bf16.mxu0 %v6489_v4  ;;  %v3107_v63 = vpop.f32.mrf.mxu0 }
 0x26b   :  { %4216 = vmatprep.subr.bf16.mxu1 %v6465_v59  ;;  %v3150_v49 = vpop.f32.mrf.mxu1  ;;  %v3108_v40 = vadd.f32 %v3107_v63, %v663_v32  ;;  %v3149_v45 = vadd.f32 %v3148_v53, %v3106_v11 }
 0x26c   :  { %v3109_v33 = vpop.f32.mrf.mxu0 }
 0x26d   :  { %4244 = vmatpush1.bf16.msra.mxu0 %v6487_v61  ;;  %v3152_v31 = vpop.f32.mrf.mxu1  ;;  %v3110_v42 = vadd.f32 %v3109_v33, %v659_v62  ;;  %v3151_v2 = vadd.f32 %v3150_v49, %v3108_v40 }
 0x26e   :  { %4217 = vmatpush2.bf16.msra.mxu1 %v6463_v56  ;;  %4245 = vmatprep.subr.bf16.mxu0 %v6492_v41  ;;  %v3111_v35 = vpop.f32.mrf.mxu0 }
 0x26f   :  { %4218 = vmatprep.subr.bf16.mxu1 %v6468_v12  ;;  %v3154_v37 = vpop.f32.mrf.mxu1  ;;  %v3112_v44 = vadd.f32 %v3111_v35, %v663_v32  ;;  %v3153_v29 = vadd.f32 %v3152_v31, %v3110_v42 }
 0x271   :  { %4246 = vmatpush1.bf16.msra.mxu0 %v6490_v18  ;;  %v3155_v52 = vadd.f32 %v3154_v37, %v3112_v44  ;;  %v6511_v44 = vld [vmem:[#allocation11 + $0x60] ss:$8 sps:$4 sm:$0xff]  }
 0x272   :  { %4219 = vmatpush2.bf16.msra.mxu1 %v6466_v0  ;;  %4247 = vmatprep.subr.bf16.mxu0 %v6495_v5 }
 0x273   :  { %4220 = vmatprep.subr.bf16.mxu1 %v6471_v3 }
 0x275   :  { %4248 = vmatpush1.bf16.msra.mxu0 %v6493_v8 }
 0x276   :  { %4221 = vmatpush2.bf16.msra.mxu1 %v6469_v6  ;;  %4249 = vmatprep.subr.bf16.mxu0 %v6498_v15 }
 0x277   :  { %4222 = vmatprep.subr.bf16.mxu1 %v6474_v13 }
 0x279   :  { %4250 = vmatpush1.bf16.msra.mxu0 %v6496_v14 }
 0x27a   :  { %4223 = vmatpush2.bf16.msra.mxu1 %v6472_v16  ;;  %4251 = vmatprep.subr.bf16.mxu0 %v6501_v21 }
 0x27b   :  { %4224 = vmatprep.subr.bf16.mxu1 %v6477_v17 }
 0x27d   :  { %4252 = vmatpush1.bf16.msra.mxu0 %v6499_v23 }
 0x27e   :  { %4225 = vmatpush2.bf16.msra.mxu1 %v6475_v19  ;;  %4253 = vmatprep.subr.bf16.mxu0 %v6504_v24  ;;  %v666_v19 = vsub.s32 6, %v7082_v9 }
 0x27f   :  { %4226 = vmatprep.subr.bf16.mxu1 %v6480_v47 }
 0x280   :  { %v667_v24 = vrot.slane %v7152_v38, %v666_v19  ;;  %v6558_v19 = vld [vmem:[#allocation14 + $0x74] ss:$8 sps:$4 sm:$0xff]  }
 0x281   :  { %4254 = vmatpush1.bf16.msra.mxu0 %v6502_v25 }
 0x282   :  { %4227 = vmatpush2.bf16.msra.mxu1 %v6478_v34  ;;  %4255 = vmatprep.subr.bf16.mxu0 %v6507_v60 }
 0x283   :  { %4228 = vmatprep.subr.bf16.mxu1 %v6483_v26 }
 0x285   :  { %4256 = vmatpush1.bf16.msra.mxu0 %v6505_v28 }
 0x286   :  { %4229 = vmatpush2.bf16.msra.mxu1 %v6481_v27 }
 0x287   :  { %4747 = vmatprep.subr.bf16.mxu1 %v6558_v19 }
 0x289   :  { %v3234_v39 = vpop.f32.mrf.mxu1 }
 0x28b   :  { %v3236_v43 = vpop.f32.mrf.mxu1 }
 0x28d   :  { %v3238_v48 = vpop.f32.mrf.mxu1 }
 0x28f   :  { %v3240_v56 = vpop.f32.mrf.mxu1 }
 0x2a8   :  { %v3191_v54 = vpop.f32.mrf.mxu0 }
 0x2a9   :  { %v3192_v20 = vadd.f32 %v3191_v54, %v3149_v45  ;;  %v5647_v8 = vpop.f32.mrf.mxu1  ;;  %v6510_v54 = vld [vmem:[#allocation11 + $0x74] ss:$8 sps:$4 sm:$0xff]  }
 0x2aa   :  { %v3193_v55 = vpop.f32.mrf.mxu0  ;;  %4494 = vmatprep.subr.bf16.mxu0 %v6510_v54  ;;  %v6516_v45 = vld [vmem:[#allocation11 + $0x54] ss:$8 sps:$4 sm:$0xff]  }
 0x2ab   :  { %v3194_v46 = vadd.f32 %v3193_v55, %v3151_v2  ;;  %v3235_v61 = vadd.f32 %v3234_v39, %v3192_v20  ;;  %v5648_v13 = vpop.f32.mrf.mxu1  ;;  %v6513_v2 = vld [vmem:[#allocation11 + $0x64] ss:$8 sps:$4 sm:$0xff]   ;;  %v6514_v55 = vld [vmem:[#allocation11 + $0x50] ss:$8 sps:$4 sm:$0xff]  }
 0x2ac   :  { %v3195_v51 = vpop.f32.mrf.mxu0  ;;  %v5649_v34 = vadd.f32 %v5648_v13, %v5647_v8  ;;  %v6520_v20 = vld [vmem:[#allocation11 + $0x30] ss:$8 sps:$4 sm:$0xff]   ;;  %v6549_v8 = vld [vmem:[#allocation11 + $0xa4] ss:$8 sps:$4 sm:$0xff]   ;;  %v6547_v13 = vld [vmem:[#allocation11 + $0xa0] ss:$8 sps:$4 sm:$0xff]  }
 0x2ad   :  { %v3196_v57 = vadd.f32 %v3195_v51, %v3153_v29  ;;  %v3237_v58 = vadd.f32 %v3236_v43, %v3194_v46  ;;  %v3411_v3 = vmax.f32 %v3235_v61, 0.0  ;;  %v5650_v15 = vpop.f32.mrf.mxu1  ;;  %v6508_v43 = vld [vmem:[#allocation11 + $0x70] ss:$8 sps:$4 sm:$0xff]   ;;  %v6519_v29 = vld [vmem:[#allocation11 + $0x44] ss:$8 sps:$4 sm:$0xff]  }
 0x2ae   :  { %v3197_v36 = vpop.f32.mrf.mxu0  ;;  %v3278_v28 = vadd.f32 %v5649_v34, %v667_v24  ;;  %v6517_v46 = vld [vmem:[#allocation11 + $0x40] ss:$8 sps:$4 sm:$0xff]   ;;  %v6525_v51 = vld [vmem:[#allocation11 + $0x24] ss:$8 sps:$4 sm:$0xff]   ;;  %v6562_v34 = vld [vmem:[#allocation14 + $0x50] ss:$8 sps:$4 sm:$0xff]  }
 0x2af   :  { %v3239_v59 = vadd.f32 %v3238_v48, %v3196_v57  ;;  %v3198_v4 = vadd.f32 %v3197_v36, %v3155_v52  ;;  %v3412_v0 = vmax.f32 %v3237_v58, 0.0  ;;  %v5651_v14 = vpop.f32.mrf.mxu1  ;;  %v6522_v48 = vld [vmem:[#allocation11 + $0x34] ss:$8 sps:$4 sm:$0xff]   ;;  %v6523_v52 = vld [vmem:[#allocation11 + $0x20] ss:$8 sps:$4 sm:$0xff]  }
 0x2b0   :  { %v5652_v60 = vadd.f32 %v5651_v14, %v5650_v15  ;;  %v6528_v57 = vld [vmem:[#allocation11 + $0x14] ss:$8 sps:$4 sm:$0xff]   ;;  %v6526_v36 = vld [vmem:[#allocation11 + $0x10] ss:$8 sps:$4 sm:$0xff]   ;;  %v6531_v58 = vld [vmem:[#allocation11 + $0x4] ss:$8 sps:$4 sm:$0xff]  }
 0x2b1   :  { %v3241_v12 = vadd.f32 %v3240_v56, %v3198_v4  ;;  %v3418_v41 = vmax.f32 %v3239_v59, 0.0  ;;  %v6529_v59 = vld [vmem:[#allocation11] ss:$8 sps:$4 sm:$0xff]   ;;  %v6534_v4 = vld [vmem:[#allocation11 + $0xf4] ss:$8 sps:$4 sm:$0xff]  }
 0x2b2   :  { %v3281_v49 = vadd.f32 %v5652_v60, %v667_v24  ;;  %v6532_v56 = vld [vmem:[#allocation11 + $0xf0] ss:$8 sps:$4 sm:$0xff]   ;;  %v6537_v61 = vld [vmem:[#allocation11 + $0xe4] ss:$8 sps:$4 sm:$0xff]   ;;  %v6552_v15 = vld [vmem:[#allocation11 + $0x94] ss:$8 sps:$4 sm:$0xff]  }
 0x2b3   :  { %v3419_v18 = vmax.f32 %v3241_v12, 0.0  ;;  %v3425_v6 = vpack.c.bf16 %v3418_v41, %v3411_v3  ;;  %v6535_v12 = vld [vmem:[#allocation11 + $0xe0] ss:$8 sps:$4 sm:$0xff]   ;;  %v6540_v41 = vld [vmem:[#allocation11 + $0xd4] ss:$8 sps:$4 sm:$0xff]  }
 0x2b4   :  { %v6541_v3 = vld [vmem:[#allocation11 + $0xc0] ss:$8 sps:$4 sm:$0xff]   ;;  %v6555_v14 = vld [vmem:[#allocation11 + $0x84] ss:$8 sps:$4 sm:$0xff]  }
 0x2b5   :  { %v3426_v5 = vpack.c.bf16 %v3419_v18, %v3412_v0  ;;  %v6538_v0 = vld [vmem:[#allocation11 + $0xd0] ss:$8 sps:$4 sm:$0xff]   ;;  %v6543_v18 = vld [vmem:[#allocation11 + $0xc4] ss:$8 sps:$4 sm:$0xff]  }
 0x2b6   :  { %v6564_v24 = vld [vmem:[#allocation14 + $0x54] ss:$8 sps:$4 sm:$0xff]  }
 0x2b7   :  { %4230 = vmatprep.mubr.bf16.mxu1 %v3426_v5  ;;  %v6546_v5 = vld [vmem:[#allocation11 + $0xb4] ss:$8 sps:$4 sm:$0xff]  }
 0x2b8   :  { %4231 = vmatmul.mubr.bf16.vlgmr.msra.gmra.mxu1 %v3425_v6  ;;  %v6544_v6 = vld [vmem:[#allocation11 + $0xb0] ss:$8 sps:$4 sm:$0xff]  }
 0x2b9   :  { %v6570_v60 = vld [vmem:[#allocation14 + $0x34] ss:$8 sps:$4 sm:$0xff]  }
 0x2c8   :  { %v5669_v16 = vpop.f32.mrf.mxu0 }
 0x2c9   :  { %v5691_v21 = vpop.f32.mrf.mxu1 }
 0x2ca   :  { %v5670_v17 = vpop.f32.mrf.mxu0 }
 0x2cb   :  { %v5692_v47 = vpop.f32.mrf.mxu1  ;;  %v5671_v27 = vadd.f32 %v5670_v17, %v5669_v16  ;;  %v6550_v16 = vld [vmem:[#allocation11 + $0x90] ss:$8 sps:$4 sm:$0xff]   ;;  %v6553_v17 = vld [vmem:[#allocation11 + $0x80] ss:$8 sps:$4 sm:$0xff]  }
 0x2cc   :  { %v5672_v23 = vpop.f32.mrf.mxu0  ;;  %v5693_v50 = vadd.f32 %v5692_v47, %v5691_v21  ;;  %v6556_v21 = vld [vmem:[#allocation14 + $0x70] ss:$8 sps:$4 sm:$0xff]   ;;  %v6559_v47 = vld [vmem:[#allocation14 + $0x60] ss:$8 sps:$4 sm:$0xff]  }
 0x2cd   :  { %v5694_v26 = vpop.f32.mrf.mxu1  ;;  %v3319_v7 = vadd.f32 %v5671_v27, %v3278_v28  ;;  %4748 = vmatpush1.bf16.msra.mxu1 %v6556_v21  ;;  %v6568_v27 = vld [vmem:[#allocation14 + $0x30] ss:$8 sps:$4 sm:$0xff]   ;;  %v6573_v28 = vld [vmem:[#allocation14 + $0x24] ss:$8 sps:$4 sm:$0xff]  }
 0x2ce   :  { %v5673_v25 = vpop.f32.mrf.mxu0 }
 0x2cf   :  { %v5674_v53 = vadd.f32 %v5673_v25, %v5672_v23  ;;  %v5695_v30 = vpop.f32.mrf.mxu1  ;;  %v3360_v62 = vadd.f32 %v5693_v50, %v3319_v7  ;;  %v6561_v23 = vld [vmem:[#allocation14 + $0x64] ss:$8 sps:$4 sm:$0xff]   ;;  %v6577_v50 = vld [vmem:[#allocation14] ss:$8 sps:$4 sm:$0xff]  }
 0x2d0   :  { %v5696_v31 = vadd.f32 %v5695_v30, %v5694_v26  ;;  %4749 = vmatprep.subr.bf16.mxu1 %v6561_v23  ;;  %v6567_v25 = vld [vmem:[#allocation14 + $0x44] ss:$8 sps:$4 sm:$0xff]   ;;  %v6565_v26 = vld [vmem:[#allocation14 + $0x40] ss:$8 sps:$4 sm:$0xff]   ;;  %v6576_v30 = vld [vmem:[#allocation14 + $0x14] ss:$8 sps:$4 sm:$0xff]  }
 0x2d1   :  { %v3322_v63 = vadd.f32 %v5674_v53, %v3281_v49  ;;  %4750 = vmatpush1.bf16.msra.mxu1 %v6559_v47  ;;  %v6571_v53 = vld [vmem:[#allocation14 + $0x20] ss:$8 sps:$4 sm:$0xff]   ;;  %v6574_v49 = vld [vmem:[#allocation14 + $0x10] ss:$8 sps:$4 sm:$0xff]   ;;  %v6579_v7 = vld [vmem:[#allocation14 + $0x4] ss:$8 sps:$4 sm:$0xff]  }
 0x2d2   :  { %4751 = vmatprep.subr.bf16.mxu1 %v6564_v24 }
 0x2d3   :  { %v3363_v37 = vadd.f32 %v5696_v31, %v3322_v63  ;;  %v6582_v63 = vld [vmem:[#allocation14 + $0xf4] ss:$8 sps:$4 sm:$0xff]   ;;  %v6580_v31 = vld [vmem:[#allocation14 + $0xf0] ss:$8 sps:$4 sm:$0xff]  }
 0x2d5   :  { %4752 = vmatpush1.bf16.msra.mxu1 %v6562_v34 }
 0x2d6   :  { %4753 = vmatprep.subr.bf16.mxu1 %v6567_v25  ;;  %v6597_v25 = vld [vmem:[#allocation14 + $0xa4] ss:$8 sps:$4 sm:$0xff]  }
 0x2d9   :  { %4754 = vmatpush1.bf16.msra.mxu1 %v6565_v26  ;;  %v6595_v26 = vld [vmem:[#allocation14 + $0xa0] ss:$8 sps:$4 sm:$0xff]  }
 0x2da   :  { %4755 = vmatprep.subr.bf16.mxu1 %v6570_v60  ;;  %v6600_v60 = vld [vmem:[#allocation14 + $0x94] ss:$8 sps:$4 sm:$0xff]  }
 0x2dd   :  { %4756 = vmatpush1.bf16.msra.mxu1 %v6568_v27  ;;  %v6598_v27 = vld [vmem:[#allocation14 + $0x90] ss:$8 sps:$4 sm:$0xff]  }
 0x2de   :  { %4757 = vmatprep.subr.bf16.mxu1 %v6573_v28  ;;  %v6603_v28 = vld [vmem:[#allocation14 + $0x84] ss:$8 sps:$4 sm:$0xff]  }
 0x2e1   :  { %4758 = vmatpush1.bf16.msra.mxu1 %v6571_v53  ;;  %v6601_v53 = vld [vmem:[#allocation14 + $0x80] ss:$8 sps:$4 sm:$0xff]  }
 0x2e2   :  { %4759 = vmatprep.subr.bf16.mxu1 %v6576_v30  ;;  %v6604_v30 = vld [vmem:[#allocation17 + $0x78] sm:$0xff]  }
 0x2e5   :  { %4760 = vmatpush1.bf16.msra.mxu1 %v6574_v49  ;;  %v6605_v49 = vld [vmem:[#allocation17 + $0x38] sm:$0xff]  }
 0x2e6   :  { %4761 = vmatprep.subr.bf16.mxu1 %v6579_v7  ;;  %v6606_v7 = vld [vmem:[#allocation17 + $0x70] sm:$0xff]  }
 0x2e8   :  { %v3400_v32 = vpop.f32.mrf.mxu0 }
 0x2e9   :  { %v3401_v33 = vadd.f32 %v3400_v32, %v3360_v62  ;;  %4762 = vmatpush1.bf16.msra.mxu1 %v6577_v50  ;;  %v6585_v32 = vld [vmem:[#allocation14 + $0xe4] ss:$8 sps:$4 sm:$0xff]   ;;  %v6583_v62 = vld [vmem:[#allocation14 + $0xe0] ss:$8 sps:$4 sm:$0xff]   ;;  %v6607_v50 = vld [vmem:[#allocation17 + $0x30] sm:$0xff]  }
 0x2ea   :  { %v5746_v9 = vpop.f32.mrf.mxu0  ;;  %4763 = vmatprep.subr.bf16.mxu1 %v6582_v63  ;;  %v6608_v63 = vld [vmem:[#allocation17 + $0x68] sm:$0xff]  }
 0x2eb   :  { %v3413_v11 = vmax.f32 %v3401_v33, 0.0  ;;  %v6588_v9 = vld [vmem:[#allocation14 + $0xd4] ss:$8 sps:$4 sm:$0xff]   ;;  %v6586_v33 = vld [vmem:[#allocation14 + $0xd0] ss:$8 sps:$4 sm:$0xff]  }
 0x2ec   :  { %v3403_v39 = vpop.f32.mrf.mxu0 }
 0x2ed   :  { %v3404_v38 = vadd.f32 %v3403_v39, %v3363_v37  ;;  %4764 = vmatpush2.bf16.msra.mxu1 %v6580_v31  ;;  %v6591_v37 = vld [vmem:[#allocation14 + $0xc4] ss:$8 sps:$4 sm:$0xff]   ;;  %v6589_v39 = vld [vmem:[#allocation14 + $0xc0] ss:$8 sps:$4 sm:$0xff]  }
 0x2ee   :  { %v5747_v40 = vpop.f32.mrf.mxu0  ;;  %4765 = vmatprep.subr.bf16.mxu1 %v6585_v32  ;;  %v6609_v31 = vld [vmem:[#allocation17 + $0x28] sm:$0xff]   ;;  %v6610_v32 = vld [vmem:[#allocation17 + $0x60] sm:$0xff]  }
 0x2ef   :  { %v3420_v35 = vmax.f32 %v3404_v38, 0.0  ;;  %v6594_v38 = vld [vmem:[#allocation14 + $0xb4] ss:$8 sps:$4 sm:$0xff]   ;;  %v6592_v40 = vld [vmem:[#allocation14 + $0xb0] ss:$8 sps:$4 sm:$0xff]  }
 0x2f1   :  { %v3427_v42 = vpack.c.bf16 %v3420_v35, %v3413_v11  ;;  %4766 = vmatpush2.bf16.msra.mxu1 %v6583_v62  ;;  %v6611_v62 = vld [vmem:[#allocation17 + $0x20] sm:$0xff]  }
 0x2f2   :  { %4767 = vmatprep.subr.bf16.mxu1 %v6588_v9  ;;  %v6612_v9 = vld [vmem:[#allocation17 + $0x58] sm:$0xff]  }
 0x2f3   :  { %4274 = vmatmul.mubr.bf16.vlgmr.msra.gmra.mxu0 %v3427_v42 }
 0x2f4   :  { %4495 = vmatpush1.bf16.msra.mxu0 %v6508_v43 }
 0x2f5   :  { %4496 = vmatprep.subr.bf16.mxu0 %v6513_v2  ;;  %4768 = vmatpush2.bf16.msra.mxu1 %v6586_v33  ;;  %v6613_v33 = vld [vmem:[#allocation17 + $0x18] sm:$0xff]  }
 0x2f6   :  { %4769 = vmatprep.subr.bf16.mxu1 %v6591_v37  ;;  %v4322_v37 = vld [vmem:[#allocation13] sm:$0x3] }
 0x2f8   :  { %4497 = vmatpush1.bf16.msra.mxu0 %v6511_v44 }
 0x2f9   :  { %4498 = vmatprep.subr.bf16.mxu0 %v6516_v45  ;;  %4770 = vmatpush2.bf16.msra.mxu1 %v6589_v39  ;;  %v3540_v45 = vld [vmem:[#allocation10] sm:$0x3] }
 0x2fa   :  { %4771 = vmatprep.subr.bf16.mxu1 %v6594_v38  ;;  %v4331_v38 = vrot.slane %v4322_v37, %v7131_v10 }
 0x2fc   :  { %4499 = vmatpush1.bf16.msra.mxu0 %v6514_v55 }
 0x2fd   :  { %4500 = vmatprep.subr.bf16.mxu0 %v6519_v29  ;;  %4772 = vmatpush2.bf16.msra.mxu1 %v6592_v40  ;;  %v4327_v40 = vrot.slane %v4322_v37, %v7087_v22 }
 0x2fe   :  { %4773 = vmatprep.subr.bf16.mxu1 %v6597_v25 }
 0x300   :  { %4501 = vmatpush1.bf16.msra.mxu0 %v6517_v46  ;;  %v3549_v46 = vrot.slane %v3540_v45, %v7131_v10 }
 0x301   :  { %4502 = vmatprep.subr.bf16.mxu0 %v6522_v48  ;;  %v3545_v48 = vrot.slane %v3540_v45, %v7087_v22  ;;  %4774 = vmatpush2.bf16.msra.mxu1 %v6595_v26 }
 0x302   :  { %4775 = vmatprep.subr.bf16.mxu1 %v6600_v60 }
 0x304   :  { %4503 = vmatpush1.bf16.msra.mxu0 %v6520_v20 }
 0x305   :  { %4504 = vmatprep.subr.bf16.mxu0 %v6525_v51  ;;  %4776 = vmatpush2.bf16.msra.mxu1 %v6598_v27 }
 0x306   :  { %4777 = vmatprep.subr.bf16.mxu1 %v6603_v28 }
 0x308   :  { %4505 = vmatpush1.bf16.msra.mxu0 %v6523_v52 }
 0x309   :  { %4506 = vmatprep.subr.bf16.mxu0 %v6528_v57  ;;  %v4146_v11 = vpop.f32.mrf.mxu1  ;;  %4778 = vmatpush2.bf16.msra.mxu1 %v6601_v53 }
 0x30b   :  { %v4148_v35 = vpop.f32.mrf.mxu1 }
 0x30c   :  { %4507 = vmatpush1.bf16.msra.mxu0 %v6526_v36  ;;  %v4149_v52 = vadd.f32 %v4148_v35, %v3549_v46  ;;  %v4147_v36 = vadd.f32 %v4146_v11, %v3545_v48 }
 0x30d   :  { %4508 = vmatprep.subr.bf16.mxu0 %v6531_v58  ;;  %v4150_v42 = vpop.f32.mrf.mxu1 }
 0x30e   :  { %v4151_v57 = vadd.f32 %v4150_v42, %v3545_v48 }
 0x30f   :  { %v4152_v54 = vpop.f32.mrf.mxu1 }
 0x310   :  { %4509 = vmatpush1.bf16.msra.mxu0 %v6529_v59  ;;  %v4153_v59 = vadd.f32 %v4152_v54, %v3549_v46 }
 0x311   :  { %4510 = vmatprep.subr.bf16.mxu0 %v6534_v4 }
 0x314   :  { %4511 = vmatpush2.bf16.msra.mxu0 %v6532_v56 }
 0x315   :  { %4512 = vmatprep.subr.bf16.mxu0 %v6537_v61 }
 0x318   :  { %4513 = vmatpush2.bf16.msra.mxu0 %v6535_v12 }
 0x319   :  { %4514 = vmatprep.subr.bf16.mxu0 %v6540_v41 }
 0x31c   :  { %4515 = vmatpush2.bf16.msra.mxu0 %v6538_v0 }
 0x31d   :  { %4516 = vmatprep.subr.bf16.mxu0 %v6543_v18 }
 0x320   :  { %4517 = vmatpush2.bf16.msra.mxu0 %v6541_v3 }
 0x321   :  { %4518 = vmatprep.subr.bf16.mxu0 %v6546_v5 }
 0x324   :  { %4519 = vmatpush2.bf16.msra.mxu0 %v6544_v6 }
 0x325   :  { %4520 = vmatprep.subr.bf16.mxu0 %v6549_v8 }
 0x328   :  { %4521 = vmatpush2.bf16.msra.mxu0 %v6547_v13  ;;  %v4189_v43 = vpop.f32.mrf.mxu0 }
 0x329   :  { %4522 = vmatprep.subr.bf16.mxu0 %v6552_v15  ;;  %v4190_v61 = vadd.f32 %v4189_v43, %v4147_v36  ;;  %v6617_v36 = vld [vmem:[#allocation17 + $0x8] sm:$0xff]  }
 0x32a   :  { %v4191_v2 = vpop.f32.mrf.mxu0 }
 0x32b   :  { %v4192_v4 = vadd.f32 %v4191_v2, %v4149_v52  ;;  %v6615_v52 = vld [vmem:[#allocation17 + $0x10] sm:$0xff]  }
 0x32c   :  { %4523 = vmatpush2.bf16.msra.mxu0 %v6550_v16  ;;  %v4193_v55 = vpop.f32.mrf.mxu0 }
 0x32d   :  { %4524 = vmatprep.subr.bf16.mxu0 %v6555_v14  ;;  %v4194_v56 = vadd.f32 %v4193_v55, %v4151_v57  ;;  %v6616_v57 = vld [vmem:[#allocation17 + $0x48] sm:$0xff]  }
 0x32e   :  { %v4195_v20 = vpop.f32.mrf.mxu0 }
 0x32f   :  { %v4196_v0 = vadd.f32 %v4195_v20, %v4153_v59  ;;  %v6619_v59 = vld [vmem:[#allocation17] sm:$0xff]  }
 0x330   :  { %4525 = vmatpush2.bf16.msra.mxu0 %v6553_v17 }
 0x331   :  { %5706 = vmatprep.subr.bf16.mxu0 %v6604_v30 }
 0x378   :  { %v4232_v44 = vpop.f32.mrf.mxu1 }
 0x379   :  { %v4233_v5 = vadd.f32 %v4232_v44, %v4190_v61 }
 0x37a   :  { %v4234_v29 = vpop.f32.mrf.mxu1 }
 0x37b   :  { %v4235_v18 = vadd.f32 %v4234_v29, %v4192_v4  ;;  %v4575_v4 = vld [vmem:[#allocation16] sm:$0x3] }
 0x37c   :  { %v4236_v51 = vpop.f32.mrf.mxu1  ;;  %v4584_v61 = vrot.slane %v4575_v4, %v7131_v10 }
 0x37d   :  { %v4237_v3 = vadd.f32 %v4236_v51, %v4194_v56  ;;  %v6614_v51 = vld [vmem:[#allocation17 + $0x50] sm:$0xff]  }
 0x37e   :  { %v4238_v12 = vpop.f32.mrf.mxu1 }
 0x37f   :  { %v4239_v8 = vadd.f32 %v4238_v12, %v4196_v0  ;;  %v4580_v12 = vrot.slane %v4575_v4, %v7087_v22 }
 0x3b3   :  { %v4275_v58 = vpop.f32.mrf.mxu0 }
 0x3b4   :  { %v4276_v16 = vadd.f32 %v4275_v58, %v4233_v5  ;;  %v6618_v58 = vld [vmem:[#allocation17 + $0x40] sm:$0xff]  }
 0x3b5   :  { %v4277_v41 = vpop.f32.mrf.mxu0 }
 0x3b6   :  { %v4278_v13 = vadd.f32 %v4277_v41, %v4235_v18  ;;  %v4284_v47 = vmax.f32 %v4276_v16, 0.0 }
 0x3b7   :  { %v4279_v6 = vpop.f32.mrf.mxu0 }
 0x3b8   :  { %v4280_v15 = vadd.f32 %v4279_v6, %v4237_v3  ;;  %v4285_v19 = vmax.f32 %v4278_v13, 0.0 }
 0x3b9   :  { %v4281_v14 = vpop.f32.mrf.mxu0 }
 0x3ba   :  { %v4282_v17 = vadd.f32 %v4281_v14, %v4239_v8  ;;  %v4286_v21 = vmax.f32 %v4280_v15, 0.0 }
 0x3bc   :  { %v4287_v23 = vmax.f32 %v4282_v17, 0.0  ;;  %v4288_v34 = vpack.c.bf16 %v4286_v21, %v4284_v47 }
 0x3be   :  { %v4289_v24 = vpack.c.bf16 %v4287_v23, %v4285_v19  ;;  %v5614_v23 = vld [vmem:[#allocation19] ss:$0 sm:$0xff] }
 0x3c0   :  { %4526 = vmatprep.mubr.bf16.mxu0 %v4289_v24 }
 0x3c1   :  { %4527 = vmatmul.mubr.bf16.vlgmr.msra.gmra.mxu0 %v4288_v34 }
 0x3c2   :  { %5707 = vmatpush3.bf16.msra.mxu0 %v6605_v49 }
 0x3c3   :  { %5708 = vmatprep.subr.bf16.mxu0 %v6606_v7 }
 0x3c6   :  { %5709 = vmatpush3.bf16.msra.mxu0 %v6607_v50 }
 0x3c7   :  { %5710 = vmatprep.subr.bf16.mxu0 %v6608_v63  ;;  %v4977_v63 = vand.u32 127, %v640_v1 }
 0x3c9   :  { %vm4978_vm1 = vcmp.lt.s32.totalorder %v4977_v63, 10 }
 0x3ca   :  { %5711 = vmatpush3.bf16.msra.mxu0 %v6609_v31 }
 0x3cb   :  { %5712 = vmatprep.subr.bf16.mxu0 %v6610_v32 }
 0x3ce   :  { %5713 = vmatpush3.bf16.msra.mxu0 %v6611_v62 }
 0x3cf   :  { %5714 = vmatprep.subr.bf16.mxu0 %v6612_v9 }
 0x3d2   :  { %5715 = vmatpush3.bf16.msra.mxu0 %v6613_v33 }
 0x3d3   :  { %5716 = vmatprep.subr.bf16.mxu0 %v6614_v51 }
 0x3d6   :  { %5717 = vmatpush3.bf16.msra.mxu0 %v6615_v52 }
 0x3d7   :  { %5718 = vmatprep.subr.bf16.mxu0 %v6616_v57 }
 0x3da   :  { %5719 = vmatpush3.bf16.msra.mxu0 %v6617_v36 }
 0x3db   :  { %5720 = vmatprep.subr.bf16.mxu0 %v6618_v58 }
 0x3de   :  { %5721 = vmatpush3.bf16.msra.mxu0 %v6619_v59 }
 0x481   :  { %v4528_v39 = vpop.f32.mrf.mxu0 }
 0x482   :  { %v4529_v54 = vadd.f32 %v4528_v39, %v4327_v40 }
 0x483   :  { %v4530_v11 = vpop.f32.mrf.mxu0 }
 0x484   :  { %v4531_v42 = vadd.f32 %v4530_v11, %v4331_v38  ;;  %v4537_v46 = vmax.f32 %v4529_v54, 0.0 }
 0x485   :  { %v4532_v35 = vpop.f32.mrf.mxu0 }
 0x486   :  { %v4533_v43 = vadd.f32 %v4532_v35, %v4327_v40  ;;  %v4538_v55 = vmax.f32 %v4531_v42, 0.0 }
 0x487   :  { %v4534_v2 = vpop.f32.mrf.mxu0 }
 0x488   :  { %v4535_v44 = vadd.f32 %v4534_v2, %v4331_v38  ;;  %v4539_v45 = vmax.f32 %v4533_v43, 0.0 }
 0x48a   :  { %v4540_v29 = vmax.f32 %v4535_v44, 0.0  ;;  %v4541_v20 = vpack.c.bf16 %v4539_v45, %v4537_v46 }
 0x48c   :  { %v4542_v48 = vpack.c.bf16 %v4540_v29, %v4538_v55 }
 0x48e   :  { %4779 = vmatprep.mubr.bf16.mxu1 %v4542_v48 }
 0x48f   :  { %4780 = vmatmul.mubr.bf16.vlgmr.msra.gmra.mxu1 %v4541_v20 }
 0x54f   :  { %v4781_v56 = vpop.f32.mrf.mxu1 }
 0x550   :  { %v4782_v5 = vadd.f32 %v4781_v56, %v4580_v12 }
 0x551   :  { %v4783_v41 = vpop.f32.mrf.mxu1 }
 0x552   :  { %v4784_v18 = vadd.f32 %v4783_v41, %v4584_v61  ;;  %v4790_v14 = vmax.f32 %v4782_v5, 0.0 }
 0x553   :  { %v4785_v0 = vpop.f32.mrf.mxu1 }
 0x554   :  { %v4786_v3 = vadd.f32 %v4785_v0, %v4580_v12  ;;  %v4791_v15 = vmax.f32 %v4784_v18, 0.0 }
 0x555   :  { %v4787_v6 = vpop.f32.mrf.mxu1 }
 0x556   :  { %v4788_v8 = vadd.f32 %v4787_v6, %v4584_v61  ;;  %v4792_v13 = vmax.f32 %v4786_v3, 0.0 }
 0x558   :  { %v4793_v16 = vmax.f32 %v4788_v8, 0.0  ;;  %v4794_v21 = vpack.c.bf16 %v4792_v13, %v4790_v14 }
 0x55a   :  { %v4795_v17 = vpack.c.bf16 %v4793_v16, %v4791_v15 }
 0x55c   :  { %4963 = vmatprep.mubr.bf16.mxu0 %v4795_v17 }
 0x55d   :  { %4964 = vmatmul.mubr.bf16.vlgmr.msra.gmra.mxu0 %v4794_v21 }
 0x61d   :  { %v5722_v19 = vpop.f32.mrf.mxu0 }
 0x61f   :  { %v5723_v10 = vpop.f32.mrf.mxu0 }
 0x620   :  { %v5724_v47 = vadd.f32 %v5723_v10, %v5722_v19 }
 0x621   :  { %v5725_v22 = vpop.f32.mrf.mxu0 }
 0x622   :  { %v4966_v24 = vadd.f32 %v5724_v47, %v5614_v23 }
 0x623   :  { %v5726_v34 = vpop.f32.mrf.mxu0 }
 0x624   :  { %v4972_v25 = vmax.f32 %v4966_v24, 0.0  ;;  %v5727_v26 = vadd.f32 %v5726_v34, %v5725_v22 }
 0x626   :  { %4974 = vst [vmem:[#allocation20] sm:$0xff] %v4972_v25  ;;  %v4969_v60 = vadd.f32 %v5727_v26, %v5614_v23  ;;  %4979 = vmax.xlane.f32.xlu0 %v4972_v25 }
 0x628   :  { %v4973_v27 = vmax.f32 %v4969_v60, 0.0 }
 0x62a   :  { %4975 = vst [vmem:[#allocation20 + $0x8] sm:$0xff] %v4973_v27  ;;  %4981 = vmax.xlane.f32.xlu0 %v4973_v27 }
 0x6af   :  { %v4980_v28 = vpop.xlane.xlu0 %4979 }
 0x6b0   :  { %v4983_v53 = vsub.f32 %v4972_v25, %v4980_v28 }
 0x6b2   :  { %v4985_v30 = vmul.f32 1.442695, %v4983_v53 }
 0x6b3   :  { %v4982_v49 = vpop.xlane.xlu0 %4981 }
 0x6b4   :  { %6620 = vpow2.f32 %v4985_v30  ;;  %v4984_v7 = vsub.f32 %v4973_v27, %v4982_v49 }
 0x6b6   :  { %v4987_v50 = vmul.f32 1.442695, %v4984_v7 }
 0x6b8   :  { %6622 = vpow2.f32 %v4987_v50 }
 0x6c1   :  { %v6621_v31 = vpop.eup %6620 }
 0x6c2   :  { %v4989_v32 = vsel %vm4978_vm1, %v6621_v31, 0.0 }
 0x6c3   :  { %4991 = vadd.xlane.f32.xlu1 %v4989_v32 }
 0x6c5   :  { %v6623_v62 = vpop.eup %6622 }
 0x6c6   :  { %v4990_v9 = vsel %vm4978_vm1, %v6623_v62, 0.0 }
 0x6c7   :  { %4993 = vadd.xlane.f32.xlu1 %v4990_v9 }
 0x6c8   :  { %6868 = shalt.err (!%p6865_p3)
}
 0x6c9   :  { %5012 = dma.vmem_to_hbm [thread:$0]  %s5007_s10, 256, %s7212_s11, [#allocation4], %s6917_s13, %s6917_s13, %s6918_s14  }
 0x6ca   :  { %s6934_s23 = smov [#allocation21]  }
 0x6cb   :  { %s5018_s24 = sshll.u32 %s6934_s23, 4  ;;  %s5019_s24 = int_to_ptr.vmem [resolvable:$true] %s5018_s24 }
 0x6cc   :  { %s6877_s25 = scalar_lea.vmem %s5019_s24, 256  ;;  %p6882_p5 = scmp.lt.s32.totalorder %s5019_s24, %s5019_s24 }
 0x6cd   :  { %p6878_p4 = scmp.ne.s32.totalorder %s5019_s24, %s6877_s25  ;;  %p6883_p6 = scmp.lt.s32.totalorder %s6877_s25, %s6877_s25 }
 0x6cf   :  { %p6884_p7 = por %p6883_p6, %p6882_p5 }
 0x6d1   :  { %p6885_p8 = pnand %p6884_p7, %p6878_p4 }
 0x74c   :  { %v4992_v1 = vpop.xlane.xlu1 %4991 }
 0x74d   :  { %6624 = vrcp.f32 %v4992_v1 }
 0x750   :  { %v4994_v33 = vpop.xlane.xlu1 %4993 }
 0x751   :  { %6626 = vrcp.f32 %v4994_v33 }
 0x75a   :  { %v6625_v37 = vpop.eup %6624 }
 0x75b   :  { %v4997_v39 = vmul.f32 %v6625_v37, %v4989_v32 }
 0x75d   :  { %4999 = vst [vmem:[#allocation21] sm:$0xff] %v4997_v39 }
 0x75e   :  { %v6627_v38 = vpop.eup %6626 }
 0x75f   :  { %v4998_v40 = vmul.f32 %v6627_v38, %v4990_v9 }
 0x761   :  { %5000 = vst [vmem:[#allocation21 + $0x8] sm:$0xff] %v4998_v40 }
 0x762   :  { %6888 = shalt.err (!%p6885_p8)
}
 0x763   :  { %5024 = dma.vmem_to_hbm [thread:$0]  %s5019_s24, 256, %s7213_s12, [#allocation22], %s6917_s13, %s6917_s13, %s6918_s14  }
 0x764   :  { %6909 = dma.done.wait [#allocation4], 256  }
 0x765   :  { %6910 = vsyncadd [#allocation4], 4294967040 }
 0x766   :  { %6911 = dma.done.wait [#allocation22], 256  }
 0x767   :  { %6912 = vsyncadd [#allocation22], 4294967040 }
 0x768   :  { %5031 = vsyncpa [#allocation3], 1 }
 0x769   :  { %5032 = vsyncpa [#allocation6], 1 }
 0x76a   :  { %5033 = vsyncpa [#allocation9], 1 }
 0x76b   :  { %5034 = vsyncpa [#allocation12], 1 }
 0x76c   :  { %5035 = vsyncpa [#allocation15], 1 }
 0x76d   :  { %5036 = vsyncpa [#allocation18], 1 }
 0x76e   :  { %5037 = vsyncpa [#allocation4], 1 }
 0x76f   :  { %5038 = vsyncpa [#allocation22], 1 }

</bundles_post_ra>
